<compile_context>
chip_gen: v5e
topology: v5e:2x2
jax: 0.10.0
libtpu: 0.0.40
codegen_flags: <defaults>
</compile_context>

<pallas_src>
import jax
import jax.numpy as jnp
from jax.experimental import pallas as pl
from jax.experimental.pallas import tpu as pltpu


# --------------------------- fused LSTM-chain kernel ---------------------------
def _fused_lstm_rand_kernel(x_ref, params_ref, bits_ref, y3_ref, z_ref):
    # x_ref   : VMEM (seq, batch) f32   input sequence (feature dim of size 1 squeezed)
    # params_ref : SMEM (36,) f32       3 layers x [w_ih(4), w_hh(4), b_ih+b_hh(4)],
    #                                   PyTorch gate order (i, f, g, o)
    # bits_ref: VMEM (1, batch) i32     random bits in [0, 2^24)
    # y3_ref  : VMEM (seq, batch) f32   final-layer output (kept for fidelity)
    # z_ref   : VMEM (1, batch) f32     uniform [0, 1) == rand_like(y3)[0]
    seq, batch = x_ref.shape
    xs = x_ref[...]                                            # (seq, batch)

    for layer in range(3):
        base = layer * 12
        # Hoist all scalar reads out of the recurrence (read once per layer).
        wi = [params_ref[base + g] for g in range(4)]
        wh = [params_ref[base + 4 + g] for g in range(4)]
        bb = [params_ref[base + 8 + g] for g in range(4)]

        h = jnp.zeros((1, batch), jnp.float32)
        c = jnp.zeros((1, batch), jnp.float32)
        rows = []
        for t in range(seq):                                   # fully unrolled (seq small, static)
            xt = xs[t:t + 1, :]                                # (1, batch)
            i = jax.nn.sigmoid(xt * wi[0] + h * wh[0] + bb[0])
            f = jax.nn.sigmoid(xt * wi[1] + h * wh[1] + bb[1])
            g = jnp.tanh(      xt * wi[2] + h * wh[2] + bb[2])
            o = jax.nn.sigmoid(xt * wi[3] + h * wh[3] + bb[3])
            c = f * c + i * g
            h = o * jnp.tanh(c)
            rows.append(h)
        xs = jnp.concatenate(rows, axis=0)                     # (seq, batch), stays in vregs

    y3_ref[...] = xs                                           # single dense store per kernel

    # uniform [0, 1) from 24-bit integer random bits (torch.rand_like equivalent)
    z_ref[...] = bits_ref[...].astype(jnp.float32) * jnp.float32(1.0 / 16777216.0)


# --------------------------------- wrapper ------------------------------------
@jax.jit
def model_forward(params_flat, x1, x2, rng_key):
    # x1: (seq, batch, 1) like PyTorch LSTM default layout; x2 is unused (matches signature).
    del x2
    seq, batch, _ = x1.shape
    x_sb = x1[..., 0].astype(jnp.float32)                      # (seq, batch)

    # 24-bit random integers -> converted to uniform [0,1) inside the kernel.
    bits = (jax.random.bits(rng_key, (1, batch), jnp.uint32) >> 8).astype(jnp.int32)

    _y3, z_row = pl.pallas_call(
        _fused_lstm_rand_kernel,
        out_shape=(
            jax.ShapeDtypeStruct((seq, batch), jnp.float32),   # final LSTM output (fidelity)
            jax.ShapeDtypeStruct((1, batch), jnp.float32),     # rand_like(y3)[0] row
        ),
        in_specs=[
            pl.BlockSpec(memory_space=pltpu.MemorySpace.VMEM),  # x
            pl.BlockSpec(memory_space=pltpu.MemorySpace.SMEM),  # stacked params (36,)
            pl.BlockSpec(memory_space=pltpu.MemorySpace.VMEM),  # random bits
        ],
        out_specs=(
            pl.BlockSpec(memory_space=pltpu.MemorySpace.VMEM),
            pl.BlockSpec(memory_space=pltpu.MemorySpace.VMEM),
        ),
    )(x_sb, params_flat, bits)

    # z1[0] of torch.rand_like(y3_output) -> shape (batch, 1)
    return z_row.reshape(batch, 1)


def init_params(key):
    # PyTorch default init: U(-1/sqrt(hidden), 1/sqrt(hidden)) = U(-1, 1) for hidden=1.
    # TODO(synk): the original module passes the whole LSTM output tuple to the next LSTM
    # (a runtime error in PyTorch); we chain the output sequences and fold b_ih + b_hh.
    keys = jax.random.split(key, 12)
    chunks = []
    for l in range(3):
        k1, k2, k3, k4 = keys[4 * l: 4 * l + 4]
        w_ih = jax.random.uniform(k1, (4,), jnp.float32, -1.0, 1.0)   # (4*H, I) squeezed
        w_hh = jax.random.uniform(k2, (4,), jnp.float32, -1.0, 1.0)   # (4*H, H) squeezed
        b_ih = jax.random.uniform(k3, (4,), jnp.float32, -1.0, 1.0)
        b_hh = jax.random.uniform(k4, (4,), jnp.float32, -1.0, 1.0)
        chunks.append(jnp.concatenate([w_ih, w_hh, b_ih + b_hh]))
    return jnp.concatenate(chunks)                                    # (36,)


if __name__ == "__main__":
    key = jax.random.PRNGKey(0)
    k_x, k_p, k_rand = jax.random.split(key, 3)

    seq, batch = 8, 2
    x1 = jax.random.normal(k_x, (seq, batch, 1), jnp.float32)
    x2 = jnp.zeros_like(x1)                                    # unused by forward

    params_flat = init_params(k_p)

    out = model_forward(params_flat, x1, x2, k_rand)
    jax.block_until_ready(out)

    assert out.shape == (batch, 1) and out.dtype == jnp.float32
    assert bool(jnp.all((out >= 0.0) & (out < 1.0)))
    print("KERNEL_OK")
</pallas_src>

<mosaic_0001>
module attributes {stable_mosaic.version = 11 : i64} {
  func.func @_fused_lstm_rand_kernel(%arg0: memref<8x2xf32, #tpu.memory_space<vmem>>, %arg1: memref<36xf32, #tpu.memory_space<smem>>, %arg2: memref<1x2xi32, #tpu.memory_space<vmem>>, %arg3: memref<8x2xf32, #tpu.memory_space<vmem>>, %arg4: memref<1x2xf32, #tpu.memory_space<vmem>>) attributes {dimension_semantics = [], scalar_prefetch = 0 : i64, scratch_operands = 0 : i64, tpu.core_type = #tpu.core_type<tc>} {
    %c0 = arith.constant 0 : index
    %c0_0 = arith.constant 0 : index
    %0 = vector.load %arg0[%c0, %c0_0] : memref<8x2xf32, #tpu.memory_space<vmem>>, vector<8x2xf32>
    %c0_1 = arith.constant 0 : index
    %1 = memref.load %arg1[%c0_1] : memref<36xf32, #tpu.memory_space<smem>>
    %c1 = arith.constant 1 : index
    %2 = memref.load %arg1[%c1] : memref<36xf32, #tpu.memory_space<smem>>
    %c2 = arith.constant 2 : index
    %3 = memref.load %arg1[%c2] : memref<36xf32, #tpu.memory_space<smem>>
    %c3 = arith.constant 3 : index
    %4 = memref.load %arg1[%c3] : memref<36xf32, #tpu.memory_space<smem>>
    %c4 = arith.constant 4 : index
    %5 = memref.load %arg1[%c4] : memref<36xf32, #tpu.memory_space<smem>>
    %c5 = arith.constant 5 : index
    %6 = memref.load %arg1[%c5] : memref<36xf32, #tpu.memory_space<smem>>
    %c6 = arith.constant 6 : index
    %7 = memref.load %arg1[%c6] : memref<36xf32, #tpu.memory_space<smem>>
    %c7 = arith.constant 7 : index
    %8 = memref.load %arg1[%c7] : memref<36xf32, #tpu.memory_space<smem>>
    %c8 = arith.constant 8 : index
    %9 = memref.load %arg1[%c8] : memref<36xf32, #tpu.memory_space<smem>>
    %c9 = arith.constant 9 : index
    %10 = memref.load %arg1[%c9] : memref<36xf32, #tpu.memory_space<smem>>
    %c10 = arith.constant 10 : index
    %11 = memref.load %arg1[%c10] : memref<36xf32, #tpu.memory_space<smem>>
    %c11 = arith.constant 11 : index
    %12 = memref.load %arg1[%c11] : memref<36xf32, #tpu.memory_space<smem>>
    %cst = arith.constant 0.000000e+00 : f32
    %13 = vector.broadcast %cst : f32 to vector<1x2xf32>
    %cst_2 = arith.constant 0.000000e+00 : f32
    %14 = vector.broadcast %cst_2 : f32 to vector<1x2xf32>
    %15 = vector.extract_strided_slice %0 {offsets = [0, 0], sizes = [1, 2], strides = [1, 1]} : vector<8x2xf32> to vector<1x2xf32>
    %16 = vector.broadcast %1 : f32 to vector<1x2xf32>
    %17 = arith.mulf %15, %16 : vector<1x2xf32>
    %18 = vector.broadcast %5 : f32 to vector<1x2xf32>
    %19 = arith.mulf %13, %18 : vector<1x2xf32>
    %20 = arith.addf %17, %19 : vector<1x2xf32>
    %21 = vector.broadcast %9 : f32 to vector<1x2xf32>
    %22 = arith.addf %20, %21 : vector<1x2xf32>
    %23 = arith.negf %22 : vector<1x2xf32>
    %24 = math.exp %23 : vector<1x2xf32>
    %cst_3 = arith.constant 1.000000e+00 : f32
    %25 = vector.broadcast %cst_3 : f32 to vector<1x2xf32>
    %26 = arith.addf %25, %24 : vector<1x2xf32>
    %27 = arith.divf %25, %26 : vector<1x2xf32>
    %28 = vector.broadcast %2 : f32 to vector<1x2xf32>
    %29 = arith.mulf %15, %28 : vector<1x2xf32>
    %30 = vector.broadcast %6 : f32 to vector<1x2xf32>
    %31 = arith.mulf %13, %30 : vector<1x2xf32>
    %32 = arith.addf %29, %31 : vector<1x2xf32>
    %33 = vector.broadcast %10 : f32 to vector<1x2xf32>
    %34 = arith.addf %32, %33 : vector<1x2xf32>
    %35 = arith.negf %34 : vector<1x2xf32>
    %36 = math.exp %35 : vector<1x2xf32>
    %cst_4 = arith.constant 1.000000e+00 : f32
    %37 = vector.broadcast %cst_4 : f32 to vector<1x2xf32>
    %38 = arith.addf %37, %36 : vector<1x2xf32>
    %39 = arith.divf %37, %38 : vector<1x2xf32>
    %40 = vector.broadcast %3 : f32 to vector<1x2xf32>
    %41 = arith.mulf %15, %40 : vector<1x2xf32>
    %42 = vector.broadcast %7 : f32 to vector<1x2xf32>
    %43 = arith.mulf %13, %42 : vector<1x2xf32>
    %44 = arith.addf %41, %43 : vector<1x2xf32>
    %45 = vector.broadcast %11 : f32 to vector<1x2xf32>
    %46 = arith.addf %44, %45 : vector<1x2xf32>
    %47 = math.tanh %46 : vector<1x2xf32>
    %48 = vector.broadcast %4 : f32 to vector<1x2xf32>
    %49 = arith.mulf %15, %48 : vector<1x2xf32>
    %50 = vector.broadcast %8 : f32 to vector<1x2xf32>
    %51 = arith.mulf %13, %50 : vector<1x2xf32>
    %52 = arith.addf %49, %51 : vector<1x2xf32>
    %53 = vector.broadcast %12 : f32 to vector<1x2xf32>
    %54 = arith.addf %52, %53 : vector<1x2xf32>
    %55 = arith.negf %54 : vector<1x2xf32>
    %56 = math.exp %55 : vector<1x2xf32>
    %cst_5 = arith.constant 1.000000e+00 : f32
    %57 = vector.broadcast %cst_5 : f32 to vector<1x2xf32>
    %58 = arith.addf %57, %56 : vector<1x2xf32>
    %59 = arith.divf %57, %58 : vector<1x2xf32>
    %60 = arith.mulf %39, %14 : vector<1x2xf32>
    %61 = arith.mulf %27, %47 : vector<1x2xf32>
    %62 = arith.addf %60, %61 : vector<1x2xf32>
    %63 = math.tanh %62 : vector<1x2xf32>
    %64 = arith.mulf %59, %63 : vector<1x2xf32>
    %65 = vector.extract_strided_slice %0 {offsets = [1, 0], sizes = [1, 2], strides = [1, 1]} : vector<8x2xf32> to vector<1x2xf32>
    %66 = vector.broadcast %1 : f32 to vector<1x2xf32>
    %67 = arith.mulf %65, %66 : vector<1x2xf32>
    %68 = vector.broadcast %5 : f32 to vector<1x2xf32>
    %69 = arith.mulf %64, %68 : vector<1x2xf32>
    %70 = arith.addf %67, %69 : vector<1x2xf32>
    %71 = vector.broadcast %9 : f32 to vector<1x2xf32>
    %72 = arith.addf %70, %71 : vector<1x2xf32>
    %73 = arith.negf %72 : vector<1x2xf32>
    %74 = math.exp %73 : vector<1x2xf32>
    %cst_6 = arith.constant 1.000000e+00 : f32
    %75 = vector.broadcast %cst_6 : f32 to vector<1x2xf32>
    %76 = arith.addf %75, %74 : vector<1x2xf32>
    %77 = arith.divf %75, %76 : vector<1x2xf32>
    %78 = vector.broadcast %2 : f32 to vector<1x2xf32>
    %79 = arith.mulf %65, %78 : vector<1x2xf32>
    %80 = vector.broadcast %6 : f32 to vector<1x2xf32>
    %81 = arith.mulf %64, %80 : vector<1x2xf32>
    %82 = arith.addf %79, %81 : vector<1x2xf32>
    %83 = vector.broadcast %10 : f32 to vector<1x2xf32>
    %84 = arith.addf %82, %83 : vector<1x2xf32>
    %85 = arith.negf %84 : vector<1x2xf32>
    %86 = math.exp %85 : vector<1x2xf32>
    %cst_7 = arith.constant 1.000000e+00 : f32
    %87 = vector.broadcast %cst_7 : f32 to vector<1x2xf32>
    %88 = arith.addf %87, %86 : vector<1x2xf32>
    %89 = arith.divf %87, %88 : vector<1x2xf32>
    %90 = vector.broadcast %3 : f32 to vector<1x2xf32>
    %91 = arith.mulf %65, %90 : vector<1x2xf32>
    %92 = vector.broadcast %7 : f32 to vector<1x2xf32>
    %93 = arith.mulf %64, %92 : vector<1x2xf32>
    %94 = arith.addf %91, %93 : vector<1x2xf32>
    %95 = vector.broadcast %11 : f32 to vector<1x2xf32>
    %96 = arith.addf %94, %95 : vector<1x2xf32>
    %97 = math.tanh %96 : vector<1x2xf32>
    %98 = vector.broadcast %4 : f32 to vector<1x2xf32>
    %99 = arith.mulf %65, %98 : vector<1x2xf32>
    %100 = vector.broadcast %8 : f32 to vector<1x2xf32>
    %101 = arith.mulf %64, %100 : vector<1x2xf32>
    %102 = arith.addf %99, %101 : vector<1x2xf32>
    %103 = vector.broadcast %12 : f32 to vector<1x2xf32>
    %104 = arith.addf %102, %103 : vector<1x2xf32>
    %105 = arith.negf %104 : vector<1x2xf32>
    %106 = math.exp %105 : vector<1x2xf32>
    %cst_8 = arith.constant 1.000000e+00 : f32
    %107 = vector.broadcast %cst_8 : f32 to vector<1x2xf32>
    %108 = arith.addf %107, %106 : vector<1x2xf32>
    %109 = arith.divf %107, %108 : vector<1x2xf32>
    %110 = arith.mulf %89, %62 : vector<1x2xf32>
    %111 = arith.mulf %77, %97 : vector<1x2xf32>
    %112 = arith.addf %110, %111 : vector<1x2xf32>
    %113 = math.tanh %112 : vector<1x2xf32>
    %114 = arith.mulf %109, %113 : vector<1x2xf32>
    %115 = vector.extract_strided_slice %0 {offsets = [2, 0], sizes = [1, 2], strides = [1, 1]} : vector<8x2xf32> to vector<1x2xf32>
    %116 = vector.broadcast %1 : f32 to vector<1x2xf32>
    %117 = arith.mulf %115, %116 : vector<1x2xf32>
    %118 = vector.broadcast %5 : f32 to vector<1x2xf32>
    %119 = arith.mulf %114, %118 : vector<1x2xf32>
    %120 = arith.addf %117, %119 : vector<1x2xf32>
    %121 = vector.broadcast %9 : f32 to vector<1x2xf32>
    %122 = arith.addf %120, %121 : vector<1x2xf32>
    %123 = arith.negf %122 : vector<1x2xf32>
    %124 = math.exp %123 : vector<1x2xf32>
    %cst_9 = arith.constant 1.000000e+00 : f32
    %125 = vector.broadcast %cst_9 : f32 to vector<1x2xf32>
    %126 = arith.addf %125, %124 : vector<1x2xf32>
    %127 = arith.divf %125, %126 : vector<1x2xf32>
    %128 = vector.broadcast %2 : f32 to vector<1x2xf32>
    %129 = arith.mulf %115, %128 : vector<1x2xf32>
    %130 = vector.broadcast %6 : f32 to vector<1x2xf32>
    %131 = arith.mulf %114, %130 : vector<1x2xf32>
    %132 = arith.addf %129, %131 : vector<1x2xf32>
    %133 = vector.broadcast %10 : f32 to vector<1x2xf32>
    %134 = arith.addf %132, %133 : vector<1x2xf32>
    %135 = arith.negf %134 : vector<1x2xf32>
    %136 = math.exp %135 : vector<1x2xf32>
    %cst_10 = arith.constant 1.000000e+00 : f32
    %137 = vector.broadcast %cst_10 : f32 to vector<1x2xf32>
    %138 = arith.addf %137, %136 : vector<1x2xf32>
    %139 = arith.divf %137, %138 : vector<1x2xf32>
    %140 = vector.broadcast %3 : f32 to vector<1x2xf32>
    %141 = arith.mulf %115, %140 : vector<1x2xf32>
    %142 = vector.broadcast %7 : f32 to vector<1x2xf32>
    %143 = arith.mulf %114, %142 : vector<1x2xf32>
    %144 = arith.addf %141, %143 : vector<1x2xf32>
    %145 = vector.broadcast %11 : f32 to vector<1x2xf32>
    %146 = arith.addf %144, %145 : vector<1x2xf32>
    %147 = math.tanh %146 : vector<1x2xf32>
    %148 = vector.broadcast %4 : f32 to vector<1x2xf32>
    %149 = arith.mulf %115, %148 : vector<1x2xf32>
    %150 = vector.broadcast %8 : f32 to vector<1x2xf32>
    %151 = arith.mulf %114, %150 : vector<1x2xf32>
    %152 = arith.addf %149, %151 : vector<1x2xf32>
    %153 = vector.broadcast %12 : f32 to vector<1x2xf32>
    %154 = arith.addf %152, %153 : vector<1x2xf32>
    %155 = arith.negf %154 : vector<1x2xf32>
    %156 = math.exp %155 : vector<1x2xf32>
    %cst_11 = arith.constant 1.000000e+00 : f32
    %157 = vector.broadcast %cst_11 : f32 to vector<1x2xf32>
    %158 = arith.addf %157, %156 : vector<1x2xf32>
    %159 = arith.divf %157, %158 : vector<1x2xf32>
    %160 = arith.mulf %139, %112 : vector<1x2xf32>
    %161 = arith.mulf %127, %147 : vector<1x2xf32>
    %162 = arith.addf %160, %161 : vector<1x2xf32>
    %163 = math.tanh %162 : vector<1x2xf32>
    %164 = arith.mulf %159, %163 : vector<1x2xf32>
    %165 = vector.extract_strided_slice %0 {offsets = [3, 0], sizes = [1, 2], strides = [1, 1]} : vector<8x2xf32> to vector<1x2xf32>
    %166 = vector.broadcast %1 : f32 to vector<1x2xf32>
    %167 = arith.mulf %165, %166 : vector<1x2xf32>
    %168 = vector.broadcast %5 : f32 to vector<1x2xf32>
    %169 = arith.mulf %164, %168 : vector<1x2xf32>
    %170 = arith.addf %167, %169 : vector<1x2xf32>
    %171 = vector.broadcast %9 : f32 to vector<1x2xf32>
    %172 = arith.addf %170, %171 : vector<1x2xf32>
    %173 = arith.negf %172 : vector<1x2xf32>
    %174 = math.exp %173 : vector<1x2xf32>
    %cst_12 = arith.constant 1.000000e+00 : f32
    %175 = vector.broadcast %cst_12 : f32 to vector<1x2xf32>
    %176 = arith.addf %175, %174 : vector<1x2xf32>
    %177 = arith.divf %175, %176 : vector<1x2xf32>
    %178 = vector.broadcast %2 : f32 to vector<1x2xf32>
    %179 = arith.mulf %165, %178 : vector<1x2xf32>
    %180 = vector.broadcast %6 : f32 to vector<1x2xf32>
    %181 = arith.mulf %164, %180 : vector<1x2xf32>
    %182 = arith.addf %179, %181 : vector<1x2xf32>
    %183 = vector.broadcast %10 : f32 to vector<1x2xf32>
    %184 = arith.addf %182, %183 : vector<1x2xf32>
    %185 = arith.negf %184 : vector<1x2xf32>
    %186 = math.exp %185 : vector<1x2xf32>
    %cst_13 = arith.constant 1.000000e+00 : f32
    %187 = vector.broadcast %cst_13 : f32 to vector<1x2xf32>
    %188 = arith.addf %187, %186 : vector<1x2xf32>
    %189 = arith.divf %187, %188 : vector<1x2xf32>
    %190 = vector.broadcast %3 : f32 to vector<1x2xf32>
    %191 = arith.mulf %165, %190 : vector<1x2xf32>
    %192 = vector.broadcast %7 : f32 to vector<1x2xf32>
    %193 = arith.mulf %164, %192 : vector<1x2xf32>
    %194 = arith.addf %191, %193 : vector<1x2xf32>
    %195 = vector.broadcast %11 : f32 to vector<1x2xf32>
    %196 = arith.addf %194, %195 : vector<1x2xf32>
    %197 = math.tanh %196 : vector<1x2xf32>
    %198 = vector.broadcast %4 : f32 to vector<1x2xf32>
    %199 = arith.mulf %165, %198 : vector<1x2xf32>
    %200 = vector.broadcast %8 : f32 to vector<1x2xf32>
    %201 = arith.mulf %164, %200 : vector<1x2xf32>
    %202 = arith.addf %199, %201 : vector<1x2xf32>
    %203 = vector.broadcast %12 : f32 to vector<1x2xf32>
    %204 = arith.addf %202, %203 : vector<1x2xf32>
    %205 = arith.negf %204 : vector<1x2xf32>
    %206 = math.exp %205 : vector<1x2xf32>
    %cst_14 = arith.constant 1.000000e+00 : f32
    %207 = vector.broadcast %cst_14 : f32 to vector<1x2xf32>
    %208 = arith.addf %207, %206 : vector<1x2xf32>
    %209 = arith.divf %207, %208 : vector<1x2xf32>
    %210 = arith.mulf %189, %162 : vector<1x2xf32>
    %211 = arith.mulf %177, %197 : vector<1x2xf32>
    %212 = arith.addf %210, %211 : vector<1x2xf32>
    %213 = math.tanh %212 : vector<1x2xf32>
    %214 = arith.mulf %209, %213 : vector<1x2xf32>
    %215 = vector.extract_strided_slice %0 {offsets = [4, 0], sizes = [1, 2], strides = [1, 1]} : vector<8x2xf32> to vector<1x2xf32>
    %216 = vector.broadcast %1 : f32 to vector<1x2xf32>
    %217 = arith.mulf %215, %216 : vector<1x2xf32>
    %218 = vector.broadcast %5 : f32 to vector<1x2xf32>
    %219 = arith.mulf %214, %218 : vector<1x2xf32>
    %220 = arith.addf %217, %219 : vector<1x2xf32>
    %221 = vector.broadcast %9 : f32 to vector<1x2xf32>
    %222 = arith.addf %220, %221 : vector<1x2xf32>
    %223 = arith.negf %222 : vector<1x2xf32>
    %224 = math.exp %223 : vector<1x2xf32>
    %cst_15 = arith.constant 1.000000e+00 : f32
    %225 = vector.broadcast %cst_15 : f32 to vector<1x2xf32>
    %226 = arith.addf %225, %224 : vector<1x2xf32>
    %227 = arith.divf %225, %226 : vector<1x2xf32>
    %228 = vector.broadcast %2 : f32 to vector<1x2xf32>
    %229 = arith.mulf %215, %228 : vector<1x2xf32>
    %230 = vector.broadcast %6 : f32 to vector<1x2xf32>
    %231 = arith.mulf %214, %230 : vector<1x2xf32>
    %232 = arith.addf %229, %231 : vector<1x2xf32>
    %233 = vector.broadcast %10 : f32 to vector<1x2xf32>
    %234 = arith.addf %232, %233 : vector<1x2xf32>
    %235 = arith.negf %234 : vector<1x2xf32>
    %236 = math.exp %235 : vector<1x2xf32>
    %cst_16 = arith.constant 1.000000e+00 : f32
    %237 = vector.broadcast %cst_16 : f32 to vector<1x2xf32>
    %238 = arith.addf %237, %236 : vector<1x2xf32>
    %239 = arith.divf %237, %238 : vector<1x2xf32>
    %240 = vector.broadcast %3 : f32 to vector<1x2xf32>
    %241 = arith.mulf %215, %240 : vector<1x2xf32>
    %242 = vector.broadcast %7 : f32 to vector<1x2xf32>
    %243 = arith.mulf %214, %242 : vector<1x2xf32>
    %244 = arith.addf %241, %243 : vector<1x2xf32>
    %245 = vector.broadcast %11 : f32 to vector<1x2xf32>
    %246 = arith.addf %244, %245 : vector<1x2xf32>
    %247 = math.tanh %246 : vector<1x2xf32>
    %248 = vector.broadcast %4 : f32 to vector<1x2xf32>
    %249 = arith.mulf %215, %248 : vector<1x2xf32>
    %250 = vector.broadcast %8 : f32 to vector<1x2xf32>
    %251 = arith.mulf %214, %250 : vector<1x2xf32>
    %252 = arith.addf %249, %251 : vector<1x2xf32>
    %253 = vector.broadcast %12 : f32 to vector<1x2xf32>
    %254 = arith.addf %252, %253 : vector<1x2xf32>
    %255 = arith.negf %254 : vector<1x2xf32>
    %256 = math.exp %255 : vector<1x2xf32>
    %cst_17 = arith.constant 1.000000e+00 : f32
    %257 = vector.broadcast %cst_17 : f32 to vector<1x2xf32>
    %258 = arith.addf %257, %256 : vector<1x2xf32>
    %259 = arith.divf %257, %258 : vector<1x2xf32>
    %260 = arith.mulf %239, %212 : vector<1x2xf32>
    %261 = arith.mulf %227, %247 : vector<1x2xf32>
    %262 = arith.addf %260, %261 : vector<1x2xf32>
    %263 = math.tanh %262 : vector<1x2xf32>
    %264 = arith.mulf %259, %263 : vector<1x2xf32>
    %265 = vector.extract_strided_slice %0 {offsets = [5, 0], sizes = [1, 2], strides = [1, 1]} : vector<8x2xf32> to vector<1x2xf32>
    %266 = vector.broadcast %1 : f32 to vector<1x2xf32>
    %267 = arith.mulf %265, %266 : vector<1x2xf32>
    %268 = vector.broadcast %5 : f32 to vector<1x2xf32>
    %269 = arith.mulf %264, %268 : vector<1x2xf32>
    %270 = arith.addf %267, %269 : vector<1x2xf32>
    %271 = vector.broadcast %9 : f32 to vector<1x2xf32>
    %272 = arith.addf %270, %271 : vector<1x2xf32>
    %273 = arith.negf %272 : vector<1x2xf32>
    %274 = math.exp %273 : vector<1x2xf32>
    %cst_18 = arith.constant 1.000000e+00 : f32
    %275 = vector.broadcast %cst_18 : f32 to vector<1x2xf32>
    %276 = arith.addf %275, %274 : vector<1x2xf32>
    %277 = arith.divf %275, %276 : vector<1x2xf32>
    %278 = vector.broadcast %2 : f32 to vector<1x2xf32>
    %279 = arith.mulf %265, %278 : vector<1x2xf32>
    %280 = vector.broadcast %6 : f32 to vector<1x2xf32>
    %281 = arith.mulf %264, %280 : vector<1x2xf32>
    %282 = arith.addf %279, %281 : vector<1x2xf32>
    %283 = vector.broadcast %10 : f32 to vector<1x2xf32>
    %284 = arith.addf %282, %283 : vector<1x2xf32>
    %285 = arith.negf %284 : vector<1x2xf32>
    %286 = math.exp %285 : vector<1x2xf32>
    %cst_19 = arith.constant 1.000000e+00 : f32
    %287 = vector.broadcast %cst_19 : f32 to vector<1x2xf32>
    %288 = arith.addf %287, %286 : vector<1x2xf32>
    %289 = arith.divf %287, %288 : vector<1x2xf32>
    %290 = vector.broadcast %3 : f32 to vector<1x2xf32>
    %291 = arith.mulf %265, %290 : vector<1x2xf32>
    %292 = vector.broadcast %7 : f32 to vector<1x2xf32>
    %293 = arith.mulf %264, %292 : vector<1x2xf32>
    %294 = arith.addf %291, %293 : vector<1x2xf32>
    %295 = vector.broadcast %11 : f32 to vector<1x2xf32>
    %296 = arith.addf %294, %295 : vector<1x2xf32>
    %297 = math.tanh %296 : vector<1x2xf32>
    %298 = vector.broadcast %4 : f32 to vector<1x2xf32>
    %299 = arith.mulf %265, %298 : vector<1x2xf32>
    %300 = vector.broadcast %8 : f32 to vector<1x2xf32>
    %301 = arith.mulf %264, %300 : vector<1x2xf32>
    %302 = arith.addf %299, %301 : vector<1x2xf32>
    %303 = vector.broadcast %12 : f32 to vector<1x2xf32>
    %304 = arith.addf %302, %303 : vector<1x2xf32>
    %305 = arith.negf %304 : vector<1x2xf32>
    %306 = math.exp %305 : vector<1x2xf32>
    %cst_20 = arith.constant 1.000000e+00 : f32
    %307 = vector.broadcast %cst_20 : f32 to vector<1x2xf32>
    %308 = arith.addf %307, %306 : vector<1x2xf32>
    %309 = arith.divf %307, %308 : vector<1x2xf32>
    %310 = arith.mulf %289, %262 : vector<1x2xf32>
    %311 = arith.mulf %277, %297 : vector<1x2xf32>
    %312 = arith.addf %310, %311 : vector<1x2xf32>
    %313 = math.tanh %312 : vector<1x2xf32>
    %314 = arith.mulf %309, %313 : vector<1x2xf32>
    %315 = vector.extract_strided_slice %0 {offsets = [6, 0], sizes = [1, 2], strides = [1, 1]} : vector<8x2xf32> to vector<1x2xf32>
    %316 = vector.broadcast %1 : f32 to vector<1x2xf32>
    %317 = arith.mulf %315, %316 : vector<1x2xf32>
    %318 = vector.broadcast %5 : f32 to vector<1x2xf32>
    %319 = arith.mulf %314, %318 : vector<1x2xf32>
    %320 = arith.addf %317, %319 : vector<1x2xf32>
    %321 = vector.broadcast %9 : f32 to vector<1x2xf32>
    %322 = arith.addf %320, %321 : vector<1x2xf32>
    %323 = arith.negf %322 : vector<1x2xf32>
    %324 = math.exp %323 : vector<1x2xf32>
    %cst_21 = arith.constant 1.000000e+00 : f32
    %325 = vector.broadcast %cst_21 : f32 to vector<1x2xf32>
    %326 = arith.addf %325, %324 : vector<1x2xf32>
    %327 = arith.divf %325, %326 : vector<1x2xf32>
    %328 = vector.broadcast %2 : f32 to vector<1x2xf32>
    %329 = arith.mulf %315, %328 : vector<1x2xf32>
    %330 = vector.broadcast %6 : f32 to vector<1x2xf32>
    %331 = arith.mulf %314, %330 : vector<1x2xf32>
    %332 = arith.addf %329, %331 : vector<1x2xf32>
    %333 = vector.broadcast %10 : f32 to vector<1x2xf32>
    %334 = arith.addf %332, %333 : vector<1x2xf32>
    %335 = arith.negf %334 : vector<1x2xf32>
    %336 = math.exp %335 : vector<1x2xf32>
    %cst_22 = arith.constant 1.000000e+00 : f32
    %337 = vector.broadcast %cst_22 : f32 to vector<1x2xf32>
    %338 = arith.addf %337, %336 : vector<1x2xf32>
    %339 = arith.divf %337, %338 : vector<1x2xf32>
    %340 = vector.broadcast %3 : f32 to vector<1x2xf32>
    %341 = arith.mulf %315, %340 : vector<1x2xf32>
    %342 = vector.broadcast %7 : f32 to vector<1x2xf32>
    %343 = arith.mulf %314, %342 : vector<1x2xf32>
    %344 = arith.addf %341, %343 : vector<1x2xf32>
    %345 = vector.broadcast %11 : f32 to vector<1x2xf32>
    %346 = arith.addf %344, %345 : vector<1x2xf32>
    %347 = math.tanh %346 : vector<1x2xf32>
    %348 = vector.broadcast %4 : f32 to vector<1x2xf32>
    %349 = arith.mulf %315, %348 : vector<1x2xf32>
    %350 = vector.broadcast %8 : f32 to vector<1x2xf32>
    %351 = arith.mulf %314, %350 : vector<1x2xf32>
    %352 = arith.addf %349, %351 : vector<1x2xf32>
    %353 = vector.broadcast %12 : f32 to vector<1x2xf32>
    %354 = arith.addf %352, %353 : vector<1x2xf32>
    %355 = arith.negf %354 : vector<1x2xf32>
    %356 = math.exp %355 : vector<1x2xf32>
    %cst_23 = arith.constant 1.000000e+00 : f32
    %357 = vector.broadcast %cst_23 : f32 to vector<1x2xf32>
    %358 = arith.addf %357, %356 : vector<1x2xf32>
    %359 = arith.divf %357, %358 : vector<1x2xf32>
    %360 = arith.mulf %339, %312 : vector<1x2xf32>
    %361 = arith.mulf %327, %347 : vector<1x2xf32>
    %362 = arith.addf %360, %361 : vector<1x2xf32>
    %363 = math.tanh %362 : vector<1x2xf32>
    %364 = arith.mulf %359, %363 : vector<1x2xf32>
    %365 = vector.extract_strided_slice %0 {offsets = [7, 0], sizes = [1, 2], strides = [1, 1]} : vector<8x2xf32> to vector<1x2xf32>
    %366 = vector.broadcast %1 : f32 to vector<1x2xf32>
    %367 = arith.mulf %365, %366 : vector<1x2xf32>
    %368 = vector.broadcast %5 : f32 to vector<1x2xf32>
    %369 = arith.mulf %364, %368 : vector<1x2xf32>
    %370 = arith.addf %367, %369 : vector<1x2xf32>
    %371 = vector.broadcast %9 : f32 to vector<1x2xf32>
    %372 = arith.addf %370, %371 : vector<1x2xf32>
    %373 = arith.negf %372 : vector<1x2xf32>
    %374 = math.exp %373 : vector<1x2xf32>
    %cst_24 = arith.constant 1.000000e+00 : f32
    %375 = vector.broadcast %cst_24 : f32 to vector<1x2xf32>
    %376 = arith.addf %375, %374 : vector<1x2xf32>
    %377 = arith.divf %375, %376 : vector<1x2xf32>
    %378 = vector.broadcast %2 : f32 to vector<1x2xf32>
    %379 = arith.mulf %365, %378 : vector<1x2xf32>
    %380 = vector.broadcast %6 : f32 to vector<1x2xf32>
    %381 = arith.mulf %364, %380 : vector<1x2xf32>
    %382 = arith.addf %379, %381 : vector<1x2xf32>
    %383 = vector.broadcast %10 : f32 to vector<1x2xf32>
    %384 = arith.addf %382, %383 : vector<1x2xf32>
    %385 = arith.negf %384 : vector<1x2xf32>
    %386 = math.exp %385 : vector<1x2xf32>
    %cst_25 = arith.constant 1.000000e+00 : f32
    %387 = vector.broadcast %cst_25 : f32 to vector<1x2xf32>
    %388 = arith.addf %387, %386 : vector<1x2xf32>
    %389 = arith.divf %387, %388 : vector<1x2xf32>
    %390 = vector.broadcast %3 : f32 to vector<1x2xf32>
    %391 = arith.mulf %365, %390 : vector<1x2xf32>
    %392 = vector.broadcast %7 : f32 to vector<1x2xf32>
    %393 = arith.mulf %364, %392 : vector<1x2xf32>
    %394 = arith.addf %391, %393 : vector<1x2xf32>
    %395 = vector.broadcast %11 : f32 to vector<1x2xf32>
    %396 = arith.addf %394, %395 : vector<1x2xf32>
    %397 = math.tanh %396 : vector<1x2xf32>
    %398 = vector.broadcast %4 : f32 to vector<1x2xf32>
    %399 = arith.mulf %365, %398 : vector<1x2xf32>
    %400 = vector.broadcast %8 : f32 to vector<1x2xf32>
    %401 = arith.mulf %364, %400 : vector<1x2xf32>
    %402 = arith.addf %399, %401 : vector<1x2xf32>
    %403 = vector.broadcast %12 : f32 to vector<1x2xf32>
    %404 = arith.addf %402, %403 : vector<1x2xf32>
    %405 = arith.negf %404 : vector<1x2xf32>
    %406 = math.exp %405 : vector<1x2xf32>
    %cst_26 = arith.constant 1.000000e+00 : f32
    %407 = vector.broadcast %cst_26 : f32 to vector<1x2xf32>
    %408 = arith.addf %407, %406 : vector<1x2xf32>
    %409 = arith.divf %407, %408 : vector<1x2xf32>
    %410 = arith.mulf %389, %362 : vector<1x2xf32>
    %411 = arith.mulf %377, %397 : vector<1x2xf32>
    %412 = arith.addf %410, %411 : vector<1x2xf32>
    %413 = math.tanh %412 : vector<1x2xf32>
    %414 = arith.mulf %409, %413 : vector<1x2xf32>
    %415 = tpu.concatenate %64, %114, %164, %214, %264, %314, %364, %414 in 0 : vector<1x2xf32>, vector<1x2xf32>, vector<1x2xf32>, vector<1x2xf32>, vector<1x2xf32>, vector<1x2xf32>, vector<1x2xf32>, vector<1x2xf32> -> vector<8x2xf32>
    %c12 = arith.constant 12 : index
    %416 = memref.load %arg1[%c12] : memref<36xf32, #tpu.memory_space<smem>>
    %c13 = arith.constant 13 : index
    %417 = memref.load %arg1[%c13] : memref<36xf32, #tpu.memory_space<smem>>
    %c14 = arith.constant 14 : index
    %418 = memref.load %arg1[%c14] : memref<36xf32, #tpu.memory_space<smem>>
    %c15 = arith.constant 15 : index
    %419 = memref.load %arg1[%c15] : memref<36xf32, #tpu.memory_space<smem>>
    %c16 = arith.constant 16 : index
    %420 = memref.load %arg1[%c16] : memref<36xf32, #tpu.memory_space<smem>>
    %c17 = arith.constant 17 : index
    %421 = memref.load %arg1[%c17] : memref<36xf32, #tpu.memory_space<smem>>
    %c18 = arith.constant 18 : index
    %422 = memref.load %arg1[%c18] : memref<36xf32, #tpu.memory_space<smem>>
    %c19 = arith.constant 19 : index
    %423 = memref.load %arg1[%c19] : memref<36xf32, #tpu.memory_space<smem>>
    %c20 = arith.constant 20 : index
    %424 = memref.load %arg1[%c20] : memref<36xf32, #tpu.memory_space<smem>>
    %c21 = arith.constant 21 : index
    %425 = memref.load %arg1[%c21] : memref<36xf32, #tpu.memory_space<smem>>
    %c22 = arith.constant 22 : index
    %426 = memref.load %arg1[%c22] : memref<36xf32, #tpu.memory_space<smem>>
    %c23 = arith.constant 23 : index
    %427 = memref.load %arg1[%c23] : memref<36xf32, #tpu.memory_space<smem>>
    %cst_27 = arith.constant 0.000000e+00 : f32
    %428 = vector.broadcast %cst_27 : f32 to vector<1x2xf32>
    %cst_28 = arith.constant 0.000000e+00 : f32
    %429 = vector.broadcast %cst_28 : f32 to vector<1x2xf32>
    %430 = vector.extract_strided_slice %415 {offsets = [0, 0], sizes = [1, 2], strides = [1, 1]} : vector<8x2xf32> to vector<1x2xf32>
    %431 = vector.broadcast %416 : f32 to vector<1x2xf32>
    %432 = arith.mulf %430, %431 : vector<1x2xf32>
    %433 = vector.broadcast %420 : f32 to vector<1x2xf32>
    %434 = arith.mulf %428, %433 : vector<1x2xf32>
    %435 = arith.addf %432, %434 : vector<1x2xf32>
    %436 = vector.broadcast %424 : f32 to vector<1x2xf32>
    %437 = arith.addf %435, %436 : vector<1x2xf32>
    %438 = arith.negf %437 : vector<1x2xf32>
    %439 = math.exp %438 : vector<1x2xf32>
    %cst_29 = arith.constant 1.000000e+00 : f32
    %440 = vector.broadcast %cst_29 : f32 to vector<1x2xf32>
    %441 = arith.addf %440, %439 : vector<1x2xf32>
    %442 = arith.divf %440, %441 : vector<1x2xf32>
    %443 = vector.broadcast %417 : f32 to vector<1x2xf32>
    %444 = arith.mulf %430, %443 : vector<1x2xf32>
    %445 = vector.broadcast %421 : f32 to vector<1x2xf32>
    %446 = arith.mulf %428, %445 : vector<1x2xf32>
    %447 = arith.addf %444, %446 : vector<1x2xf32>
    %448 = vector.broadcast %425 : f32 to vector<1x2xf32>
    %449 = arith.addf %447, %448 : vector<1x2xf32>
    %450 = arith.negf %449 : vector<1x2xf32>
    %451 = math.exp %450 : vector<1x2xf32>
    %cst_30 = arith.constant 1.000000e+00 : f32
    %452 = vector.broadcast %cst_30 : f32 to vector<1x2xf32>
    %453 = arith.addf %452, %451 : vector<1x2xf32>
    %454 = arith.divf %452, %453 : vector<1x2xf32>
    %455 = vector.broadcast %418 : f32 to vector<1x2xf32>
    %456 = arith.mulf %430, %455 : vector<1x2xf32>
    %457 = vector.broadcast %422 : f32 to vector<1x2xf32>
    %458 = arith.mulf %428, %457 : vector<1x2xf32>
    %459 = arith.addf %456, %458 : vector<1x2xf32>
    %460 = vector.broadcast %426 : f32 to vector<1x2xf32>
    %461 = arith.addf %459, %460 : vector<1x2xf32>
    %462 = math.tanh %461 : vector<1x2xf32>
    %463 = vector.broadcast %419 : f32 to vector<1x2xf32>
    %464 = arith.mulf %430, %463 : vector<1x2xf32>
    %465 = vector.broadcast %423 : f32 to vector<1x2xf32>
    %466 = arith.mulf %428, %465 : vector<1x2xf32>
    %467 = arith.addf %464, %466 : vector<1x2xf32>
    %468 = vector.broadcast %427 : f32 to vector<1x2xf32>
    %469 = arith.addf %467, %468 : vector<1x2xf32>
    %470 = arith.negf %469 : vector<1x2xf32>
    %471 = math.exp %470 : vector<1x2xf32>
    %cst_31 = arith.constant 1.000000e+00 : f32
    %472 = vector.broadcast %cst_31 : f32 to vector<1x2xf32>
    %473 = arith.addf %472, %471 : vector<1x2xf32>
    %474 = arith.divf %472, %473 : vector<1x2xf32>
    %475 = arith.mulf %454, %429 : vector<1x2xf32>
    %476 = arith.mulf %442, %462 : vector<1x2xf32>
    %477 = arith.addf %475, %476 : vector<1x2xf32>
    %478 = math.tanh %477 : vector<1x2xf32>
    %479 = arith.mulf %474, %478 : vector<1x2xf32>
    %480 = vector.extract_strided_slice %415 {offsets = [1, 0], sizes = [1, 2], strides = [1, 1]} : vector<8x2xf32> to vector<1x2xf32>
    %481 = vector.broadcast %416 : f32 to vector<1x2xf32>
    %482 = arith.mulf %480, %481 : vector<1x2xf32>
    %483 = vector.broadcast %420 : f32 to vector<1x2xf32>
    %484 = arith.mulf %479, %483 : vector<1x2xf32>
    %485 = arith.addf %482, %484 : vector<1x2xf32>
    %486 = vector.broadcast %424 : f32 to vector<1x2xf32>
    %487 = arith.addf %485, %486 : vector<1x2xf32>
    %488 = arith.negf %487 : vector<1x2xf32>
    %489 = math.exp %488 : vector<1x2xf32>
    %cst_32 = arith.constant 1.000000e+00 : f32
    %490 = vector.broadcast %cst_32 : f32 to vector<1x2xf32>
    %491 = arith.addf %490, %489 : vector<1x2xf32>
    %492 = arith.divf %490, %491 : vector<1x2xf32>
    %493 = vector.broadcast %417 : f32 to vector<1x2xf32>
    %494 = arith.mulf %480, %493 : vector<1x2xf32>
    %495 = vector.broadcast %421 : f32 to vector<1x2xf32>
    %496 = arith.mulf %479, %495 : vector<1x2xf32>
    %497 = arith.addf %494, %496 : vector<1x2xf32>
    %498 = vector.broadcast %425 : f32 to vector<1x2xf32>
    %499 = arith.addf %497, %498 : vector<1x2xf32>
    %500 = arith.negf %499 : vector<1x2xf32>
    %501 = math.exp %500 : vector<1x2xf32>
    %cst_33 = arith.constant 1.000000e+00 : f32
    %502 = vector.broadcast %cst_33 : f32 to vector<1x2xf32>
    %503 = arith.addf %502, %501 : vector<1x2xf32>
    %504 = arith.divf %502, %503 : vector<1x2xf32>
    %505 = vector.broadcast %418 : f32 to vector<1x2xf32>
    %506 = arith.mulf %480, %505 : vector<1x2xf32>
    %507 = vector.broadcast %422 : f32 to vector<1x2xf32>
    %508 = arith.mulf %479, %507 : vector<1x2xf32>
    %509 = arith.addf %506, %508 : vector<1x2xf32>
    %510 = vector.broadcast %426 : f32 to vector<1x2xf32>
    %511 = arith.addf %509, %510 : vector<1x2xf32>
    %512 = math.tanh %511 : vector<1x2xf32>
    %513 = vector.broadcast %419 : f32 to vector<1x2xf32>
    %514 = arith.mulf %480, %513 : vector<1x2xf32>
    %515 = vector.broadcast %423 : f32 to vector<1x2xf32>
    %516 = arith.mulf %479, %515 : vector<1x2xf32>
    %517 = arith.addf %514, %516 : vector<1x2xf32>
    %518 = vector.broadcast %427 : f32 to vector<1x2xf32>
    %519 = arith.addf %517, %518 : vector<1x2xf32>
    %520 = arith.negf %519 : vector<1x2xf32>
    %521 = math.exp %520 : vector<1x2xf32>
    %cst_34 = arith.constant 1.000000e+00 : f32
    %522 = vector.broadcast %cst_34 : f32 to vector<1x2xf32>
    %523 = arith.addf %522, %521 : vector<1x2xf32>
    %524 = arith.divf %522, %523 : vector<1x2xf32>
    %525 = arith.mulf %504, %477 : vector<1x2xf32>
    %526 = arith.mulf %492, %512 : vector<1x2xf32>
    %527 = arith.addf %525, %526 : vector<1x2xf32>
    %528 = math.tanh %527 : vector<1x2xf32>
    %529 = arith.mulf %524, %528 : vector<1x2xf32>
    %530 = vector.extract_strided_slice %415 {offsets = [2, 0], sizes = [1, 2], strides = [1, 1]} : vector<8x2xf32> to vector<1x2xf32>
    %531 = vector.broadcast %416 : f32 to vector<1x2xf32>
    %532 = arith.mulf %530, %531 : vector<1x2xf32>
    %533 = vector.broadcast %420 : f32 to vector<1x2xf32>
    %534 = arith.mulf %529, %533 : vector<1x2xf32>
    %535 = arith.addf %532, %534 : vector<1x2xf32>
    %536 = vector.broadcast %424 : f32 to vector<1x2xf32>
    %537 = arith.addf %535, %536 : vector<1x2xf32>
    %538 = arith.negf %537 : vector<1x2xf32>
    %539 = math.exp %538 : vector<1x2xf32>
    %cst_35 = arith.constant 1.000000e+00 : f32
    %540 = vector.broadcast %cst_35 : f32 to vector<1x2xf32>
    %541 = arith.addf %540, %539 : vector<1x2xf32>
    %542 = arith.divf %540, %541 : vector<1x2xf32>
    %543 = vector.broadcast %417 : f32 to vector<1x2xf32>
    %544 = arith.mulf %530, %543 : vector<1x2xf32>
    %545 = vector.broadcast %421 : f32 to vector<1x2xf32>
    %546 = arith.mulf %529, %545 : vector<1x2xf32>
    %547 = arith.addf %544, %546 : vector<1x2xf32>
    %548 = vector.broadcast %425 : f32 to vector<1x2xf32>
    %549 = arith.addf %547, %548 : vector<1x2xf32>
    %550 = arith.negf %549 : vector<1x2xf32>
    %551 = math.exp %550 : vector<1x2xf32>
    %cst_36 = arith.constant 1.000000e+00 : f32
    %552 = vector.broadcast %cst_36 : f32 to vector<1x2xf32>
    %553 = arith.addf %552, %551 : vector<1x2xf32>
    %554 = arith.divf %552, %553 : vector<1x2xf32>
    %555 = vector.broadcast %418 : f32 to vector<1x2xf32>
    %556 = arith.mulf %530, %555 : vector<1x2xf32>
    %557 = vector.broadcast %422 : f32 to vector<1x2xf32>
    %558 = arith.mulf %529, %557 : vector<1x2xf32>
    %559 = arith.addf %556, %558 : vector<1x2xf32>
    %560 = vector.broadcast %426 : f32 to vector<1x2xf32>
    %561 = arith.addf %559, %560 : vector<1x2xf32>
    %562 = math.tanh %561 : vector<1x2xf32>
    %563 = vector.broadcast %419 : f32 to vector<1x2xf32>
    %564 = arith.mulf %530, %563 : vector<1x2xf32>
    %565 = vector.broadcast %423 : f32 to vector<1x2xf32>
    %566 = arith.mulf %529, %565 : vector<1x2xf32>
    %567 = arith.addf %564, %566 : vector<1x2xf32>
    %568 = vector.broadcast %427 : f32 to vector<1x2xf32>
    %569 = arith.addf %567, %568 : vector<1x2xf32>
    %570 = arith.negf %569 : vector<1x2xf32>
    %571 = math.exp %570 : vector<1x2xf32>
    %cst_37 = arith.constant 1.000000e+00 : f32
    %572 = vector.broadcast %cst_37 : f32 to vector<1x2xf32>
    %573 = arith.addf %572, %571 : vector<1x2xf32>
    %574 = arith.divf %572, %573 : vector<1x2xf32>
    %575 = arith.mulf %554, %527 : vector<1x2xf32>
    %576 = arith.mulf %542, %562 : vector<1x2xf32>
    %577 = arith.addf %575, %576 : vector<1x2xf32>
    %578 = math.tanh %577 : vector<1x2xf32>
    %579 = arith.mulf %574, %578 : vector<1x2xf32>
    %580 = vector.extract_strided_slice %415 {offsets = [3, 0], sizes = [1, 2], strides = [1, 1]} : vector<8x2xf32> to vector<1x2xf32>
    %581 = vector.broadcast %416 : f32 to vector<1x2xf32>
    %582 = arith.mulf %580, %581 : vector<1x2xf32>
    %583 = vector.broadcast %420 : f32 to vector<1x2xf32>
    %584 = arith.mulf %579, %583 : vector<1x2xf32>
    %585 = arith.addf %582, %584 : vector<1x2xf32>
    %586 = vector.broadcast %424 : f32 to vector<1x2xf32>
    %587 = arith.addf %585, %586 : vector<1x2xf32>
    %588 = arith.negf %587 : vector<1x2xf32>
    %589 = math.exp %588 : vector<1x2xf32>
    %cst_38 = arith.constant 1.000000e+00 : f32
    %590 = vector.broadcast %cst_38 : f32 to vector<1x2xf32>
    %591 = arith.addf %590, %589 : vector<1x2xf32>
    %592 = arith.divf %590, %591 : vector<1x2xf32>
    %593 = vector.broadcast %417 : f32 to vector<1x2xf32>
    %594 = arith.mulf %580, %593 : vector<1x2xf32>
    %595 = vector.broadcast %421 : f32 to vector<1x2xf32>
    %596 = arith.mulf %579, %595 : vector<1x2xf32>
    %597 = arith.addf %594, %596 : vector<1x2xf32>
    %598 = vector.broadcast %425 : f32 to vector<1x2xf32>
    %599 = arith.addf %597, %598 : vector<1x2xf32>
    %600 = arith.negf %599 : vector<1x2xf32>
    %601 = math.exp %600 : vector<1x2xf32>
    %cst_39 = arith.constant 1.000000e+00 : f32
    %602 = vector.broadcast %cst_39 : f32 to vector<1x2xf32>
    %603 = arith.addf %602, %601 : vector<1x2xf32>
    %604 = arith.divf %602, %603 : vector<1x2xf32>
    %605 = vector.broadcast %418 : f32 to vector<1x2xf32>
    %606 = arith.mulf %580, %605 : vector<1x2xf32>
    %607 = vector.broadcast %422 : f32 to vector<1x2xf32>
    %608 = arith.mulf %579, %607 : vector<1x2xf32>
    %609 = arith.addf %606, %608 : vector<1x2xf32>
    %610 = vector.broadcast %426 : f32 to vector<1x2xf32>
    %611 = arith.addf %609, %610 : vector<1x2xf32>
    %612 = math.tanh %611 : vector<1x2xf32>
    %613 = vector.broadcast %419 : f32 to vector<1x2xf32>
    %614 = arith.mulf %580, %613 : vector<1x2xf32>
    %615 = vector.broadcast %423 : f32 to vector<1x2xf32>
    %616 = arith.mulf %579, %615 : vector<1x2xf32>
    %617 = arith.addf %614, %616 : vector<1x2xf32>
    %618 = vector.broadcast %427 : f32 to vector<1x2xf32>
    %619 = arith.addf %617, %618 : vector<1x2xf32>
    %620 = arith.negf %619 : vector<1x2xf32>
    %621 = math.exp %620 : vector<1x2xf32>
    %cst_40 = arith.constant 1.000000e+00 : f32
    %622 = vector.broadcast %cst_40 : f32 to vector<1x2xf32>
    %623 = arith.addf %622, %621 : vector<1x2xf32>
    %624 = arith.divf %622, %623 : vector<1x2xf32>
    %625 = arith.mulf %604, %577 : vector<1x2xf32>
    %626 = arith.mulf %592, %612 : vector<1x2xf32>
    %627 = arith.addf %625, %626 : vector<1x2xf32>
    %628 = math.tanh %627 : vector<1x2xf32>
    %629 = arith.mulf %624, %628 : vector<1x2xf32>
    %630 = vector.extract_strided_slice %415 {offsets = [4, 0], sizes = [1, 2], strides = [1, 1]} : vector<8x2xf32> to vector<1x2xf32>
    %631 = vector.broadcast %416 : f32 to vector<1x2xf32>
    %632 = arith.mulf %630, %631 : vector<1x2xf32>
    %633 = vector.broadcast %420 : f32 to vector<1x2xf32>
    %634 = arith.mulf %629, %633 : vector<1x2xf32>
    %635 = arith.addf %632, %634 : vector<1x2xf32>
    %636 = vector.broadcast %424 : f32 to vector<1x2xf32>
    %637 = arith.addf %635, %636 : vector<1x2xf32>
    %638 = arith.negf %637 : vector<1x2xf32>
    %639 = math.exp %638 : vector<1x2xf32>
    %cst_41 = arith.constant 1.000000e+00 : f32
    %640 = vector.broadcast %cst_41 : f32 to vector<1x2xf32>
    %641 = arith.addf %640, %639 : vector<1x2xf32>
    %642 = arith.divf %640, %641 : vector<1x2xf32>
    %643 = vector.broadcast %417 : f32 to vector<1x2xf32>
    %644 = arith.mulf %630, %643 : vector<1x2xf32>
    %645 = vector.broadcast %421 : f32 to vector<1x2xf32>
    %646 = arith.mulf %629, %645 : vector<1x2xf32>
    %647 = arith.addf %644, %646 : vector<1x2xf32>
    %648 = vector.broadcast %425 : f32 to vector<1x2xf32>
    %649 = arith.addf %647, %648 : vector<1x2xf32>
    %650 = arith.negf %649 : vector<1x2xf32>
    %651 = math.exp %650 : vector<1x2xf32>
    %cst_42 = arith.constant 1.000000e+00 : f32
    %652 = vector.broadcast %cst_42 : f32 to vector<1x2xf32>
    %653 = arith.addf %652, %651 : vector<1x2xf32>
    %654 = arith.divf %652, %653 : vector<1x2xf32>
    %655 = vector.broadcast %418 : f32 to vector<1x2xf32>
    %656 = arith.mulf %630, %655 : vector<1x2xf32>
    %657 = vector.broadcast %422 : f32 to vector<1x2xf32>
    %658 = arith.mulf %629, %657 : vector<1x2xf32>
    %659 = arith.addf %656, %658 : vector<1x2xf32>
    %660 = vector.broadcast %426 : f32 to vector<1x2xf32>
    %661 = arith.addf %659, %660 : vector<1x2xf32>
    %662 = math.tanh %661 : vector<1x2xf32>
    %663 = vector.broadcast %419 : f32 to vector<1x2xf32>
    %664 = arith.mulf %630, %663 : vector<1x2xf32>
    %665 = vector.broadcast %423 : f32 to vector<1x2xf32>
    %666 = arith.mulf %629, %665 : vector<1x2xf32>
    %667 = arith.addf %664, %666 : vector<1x2xf32>
    %668 = vector.broadcast %427 : f32 to vector<1x2xf32>
    %669 = arith.addf %667, %668 : vector<1x2xf32>
    %670 = arith.negf %669 : vector<1x2xf32>
    %671 = math.exp %670 : vector<1x2xf32>
    %cst_43 = arith.constant 1.000000e+00 : f32
    %672 = vector.broadcast %cst_43 : f32 to vector<1x2xf32>
    %673 = arith.addf %672, %671 : vector<1x2xf32>
    %674 = arith.divf %672, %673 : vector<1x2xf32>
    %675 = arith.mulf %654, %627 : vector<1x2xf32>
    %676 = arith.mulf %642, %662 : vector<1x2xf32>
    %677 = arith.addf %675, %676 : vector<1x2xf32>
    %678 = math.tanh %677 : vector<1x2xf32>
    %679 = arith.mulf %674, %678 : vector<1x2xf32>
    %680 = vector.extract_strided_slice %415 {offsets = [5, 0], sizes = [1, 2], strides = [1, 1]} : vector<8x2xf32> to vector<1x2xf32>
    %681 = vector.broadcast %416 : f32 to vector<1x2xf32>
    %682 = arith.mulf %680, %681 : vector<1x2xf32>
    %683 = vector.broadcast %420 : f32 to vector<1x2xf32>
    %684 = arith.mulf %679, %683 : vector<1x2xf32>
    %685 = arith.addf %682, %684 : vector<1x2xf32>
    %686 = vector.broadcast %424 : f32 to vector<1x2xf32>
    %687 = arith.addf %685, %686 : vector<1x2xf32>
    %688 = arith.negf %687 : vector<1x2xf32>
    %689 = math.exp %688 : vector<1x2xf32>
    %cst_44 = arith.constant 1.000000e+00 : f32
    %690 = vector.broadcast %cst_44 : f32 to vector<1x2xf32>
    %691 = arith.addf %690, %689 : vector<1x2xf32>
    %692 = arith.divf %690, %691 : vector<1x2xf32>
    %693 = vector.broadcast %417 : f32 to vector<1x2xf32>
    %694 = arith.mulf %680, %693 : vector<1x2xf32>
    %695 = vector.broadcast %421 : f32 to vector<1x2xf32>
    %696 = arith.mulf %679, %695 : vector<1x2xf32>
    %697 = arith.addf %694, %696 : vector<1x2xf32>
    %698 = vector.broadcast %425 : f32 to vector<1x2xf32>
    %699 = arith.addf %697, %698 : vector<1x2xf32>
    %700 = arith.negf %699 : vector<1x2xf32>
    %701 = math.exp %700 : vector<1x2xf32>
    %cst_45 = arith.constant 1.000000e+00 : f32
    %702 = vector.broadcast %cst_45 : f32 to vector<1x2xf32>
    %703 = arith.addf %702, %701 : vector<1x2xf32>
    %704 = arith.divf %702, %703 : vector<1x2xf32>
    %705 = vector.broadcast %418 : f32 to vector<1x2xf32>
    %706 = arith.mulf %680, %705 : vector<1x2xf32>
    %707 = vector.broadcast %422 : f32 to vector<1x2xf32>
    %708 = arith.mulf %679, %707 : vector<1x2xf32>
    %709 = arith.addf %706, %708 : vector<1x2xf32>
    %710 = vector.broadcast %426 : f32 to vector<1x2xf32>
    %711 = arith.addf %709, %710 : vector<1x2xf32>
    %712 = math.tanh %711 : vector<1x2xf32>
    %713 = vector.broadcast %419 : f32 to vector<1x2xf32>
    %714 = arith.mulf %680, %713 : vector<1x2xf32>
    %715 = vector.broadcast %423 : f32 to vector<1x2xf32>
    %716 = arith.mulf %679, %715 : vector<1x2xf32>
    %717 = arith.addf %714, %716 : vector<1x2xf32>
    %718 = vector.broadcast %427 : f32 to vector<1x2xf32>
    %719 = arith.addf %717, %718 : vector<1x2xf32>
    %720 = arith.negf %719 : vector<1x2xf32>
    %721 = math.exp %720 : vector<1x2xf32>
    %cst_46 = arith.constant 1.000000e+00 : f32
    %722 = vector.broadcast %cst_46 : f32 to vector<1x2xf32>
    %723 = arith.addf %722, %721 : vector<1x2xf32>
    %724 = arith.divf %722, %723 : vector<1x2xf32>
    %725 = arith.mulf %704, %677 : vector<1x2xf32>
    %726 = arith.mulf %692, %712 : vector<1x2xf32>
    %727 = arith.addf %725, %726 : vector<1x2xf32>
    %728 = math.tanh %727 : vector<1x2xf32>
    %729 = arith.mulf %724, %728 : vector<1x2xf32>
    %730 = vector.extract_strided_slice %415 {offsets = [6, 0], sizes = [1, 2], strides = [1, 1]} : vector<8x2xf32> to vector<1x2xf32>
    %731 = vector.broadcast %416 : f32 to vector<1x2xf32>
    %732 = arith.mulf %730, %731 : vector<1x2xf32>
    %733 = vector.broadcast %420 : f32 to vector<1x2xf32>
    %734 = arith.mulf %729, %733 : vector<1x2xf32>
    %735 = arith.addf %732, %734 : vector<1x2xf32>
    %736 = vector.broadcast %424 : f32 to vector<1x2xf32>
    %737 = arith.addf %735, %736 : vector<1x2xf32>
    %738 = arith.negf %737 : vector<1x2xf32>
    %739 = math.exp %738 : vector<1x2xf32>
    %cst_47 = arith.constant 1.000000e+00 : f32
    %740 = vector.broadcast %cst_47 : f32 to vector<1x2xf32>
    %741 = arith.addf %740, %739 : vector<1x2xf32>
    %742 = arith.divf %740, %741 : vector<1x2xf32>
    %743 = vector.broadcast %417 : f32 to vector<1x2xf32>
    %744 = arith.mulf %730, %743 : vector<1x2xf32>
    %745 = vector.broadcast %421 : f32 to vector<1x2xf32>
    %746 = arith.mulf %729, %745 : vector<1x2xf32>
    %747 = arith.addf %744, %746 : vector<1x2xf32>
    %748 = vector.broadcast %425 : f32 to vector<1x2xf32>
    %749 = arith.addf %747, %748 : vector<1x2xf32>
    %750 = arith.negf %749 : vector<1x2xf32>
    %751 = math.exp %750 : vector<1x2xf32>
    %cst_48 = arith.constant 1.000000e+00 : f32
    %752 = vector.broadcast %cst_48 : f32 to vector<1x2xf32>
    %753 = arith.addf %752, %751 : vector<1x2xf32>
    %754 = arith.divf %752, %753 : vector<1x2xf32>
    %755 = vector.broadcast %418 : f32 to vector<1x2xf32>
    %756 = arith.mulf %730, %755 : vector<1x2xf32>
    %757 = vector.broadcast %422 : f32 to vector<1x2xf32>
    %758 = arith.mulf %729, %757 : vector<1x2xf32>
    %759 = arith.addf %756, %758 : vector<1x2xf32>
    %760 = vector.broadcast %426 : f32 to vector<1x2xf32>
    %761 = arith.addf %759, %760 : vector<1x2xf32>
    %762 = math.tanh %761 : vector<1x2xf32>
    %763 = vector.broadcast %419 : f32 to vector<1x2xf32>
    %764 = arith.mulf %730, %763 : vector<1x2xf32>
    %765 = vector.broadcast %423 : f32 to vector<1x2xf32>
    %766 = arith.mulf %729, %765 : vector<1x2xf32>
    %767 = arith.addf %764, %766 : vector<1x2xf32>
    %768 = vector.broadcast %427 : f32 to vector<1x2xf32>
    %769 = arith.addf %767, %768 : vector<1x2xf32>
    %770 = arith.negf %769 : vector<1x2xf32>
    %771 = math.exp %770 : vector<1x2xf32>
    %cst_49 = arith.constant 1.000000e+00 : f32
    %772 = vector.broadcast %cst_49 : f32 to vector<1x2xf32>
    %773 = arith.addf %772, %771 : vector<1x2xf32>
    %774 = arith.divf %772, %773 : vector<1x2xf32>
    %775 = arith.mulf %754, %727 : vector<1x2xf32>
    %776 = arith.mulf %742, %762 : vector<1x2xf32>
    %777 = arith.addf %775, %776 : vector<1x2xf32>
    %778 = math.tanh %777 : vector<1x2xf32>
    %779 = arith.mulf %774, %778 : vector<1x2xf32>
    %780 = vector.extract_strided_slice %415 {offsets = [7, 0], sizes = [1, 2], strides = [1, 1]} : vector<8x2xf32> to vector<1x2xf32>
    %781 = vector.broadcast %416 : f32 to vector<1x2xf32>
    %782 = arith.mulf %780, %781 : vector<1x2xf32>
    %783 = vector.broadcast %420 : f32 to vector<1x2xf32>
    %784 = arith.mulf %779, %783 : vector<1x2xf32>
    %785 = arith.addf %782, %784 : vector<1x2xf32>
    %786 = vector.broadcast %424 : f32 to vector<1x2xf32>
    %787 = arith.addf %785, %786 : vector<1x2xf32>
    %788 = arith.negf %787 : vector<1x2xf32>
    %789 = math.exp %788 : vector<1x2xf32>
    %cst_50 = arith.constant 1.000000e+00 : f32
    %790 = vector.broadcast %cst_50 : f32 to vector<1x2xf32>
    %791 = arith.addf %790, %789 : vector<1x2xf32>
    %792 = arith.divf %790, %791 : vector<1x2xf32>
    %793 = vector.broadcast %417 : f32 to vector<1x2xf32>
    %794 = arith.mulf %780, %793 : vector<1x2xf32>
    %795 = vector.broadcast %421 : f32 to vector<1x2xf32>
    %796 = arith.mulf %779, %795 : vector<1x2xf32>
    %797 = arith.addf %794, %796 : vector<1x2xf32>
    %798 = vector.broadcast %425 : f32 to vector<1x2xf32>
    %799 = arith.addf %797, %798 : vector<1x2xf32>
    %800 = arith.negf %799 : vector<1x2xf32>
    %801 = math.exp %800 : vector<1x2xf32>
    %cst_51 = arith.constant 1.000000e+00 : f32
    %802 = vector.broadcast %cst_51 : f32 to vector<1x2xf32>
    %803 = arith.addf %802, %801 : vector<1x2xf32>
    %804 = arith.divf %802, %803 : vector<1x2xf32>
    %805 = vector.broadcast %418 : f32 to vector<1x2xf32>
    %806 = arith.mulf %780, %805 : vector<1x2xf32>
    %807 = vector.broadcast %422 : f32 to vector<1x2xf32>
    %808 = arith.mulf %779, %807 : vector<1x2xf32>
    %809 = arith.addf %806, %808 : vector<1x2xf32>
    %810 = vector.broadcast %426 : f32 to vector<1x2xf32>
    %811 = arith.addf %809, %810 : vector<1x2xf32>
    %812 = math.tanh %811 : vector<1x2xf32>
    %813 = vector.broadcast %419 : f32 to vector<1x2xf32>
    %814 = arith.mulf %780, %813 : vector<1x2xf32>
    %815 = vector.broadcast %423 : f32 to vector<1x2xf32>
    %816 = arith.mulf %779, %815 : vector<1x2xf32>
    %817 = arith.addf %814, %816 : vector<1x2xf32>
    %818 = vector.broadcast %427 : f32 to vector<1x2xf32>
    %819 = arith.addf %817, %818 : vector<1x2xf32>
    %820 = arith.negf %819 : vector<1x2xf32>
    %821 = math.exp %820 : vector<1x2xf32>
    %cst_52 = arith.constant 1.000000e+00 : f32
    %822 = vector.broadcast %cst_52 : f32 to vector<1x2xf32>
    %823 = arith.addf %822, %821 : vector<1x2xf32>
    %824 = arith.divf %822, %823 : vector<1x2xf32>
    %825 = arith.mulf %804, %777 : vector<1x2xf32>
    %826 = arith.mulf %792, %812 : vector<1x2xf32>
    %827 = arith.addf %825, %826 : vector<1x2xf32>
    %828 = math.tanh %827 : vector<1x2xf32>
    %829 = arith.mulf %824, %828 : vector<1x2xf32>
    %830 = tpu.concatenate %479, %529, %579, %629, %679, %729, %779, %829 in 0 : vector<1x2xf32>, vector<1x2xf32>, vector<1x2xf32>, vector<1x2xf32>, vector<1x2xf32>, vector<1x2xf32>, vector<1x2xf32>, vector<1x2xf32> -> vector<8x2xf32>
    %c24 = arith.constant 24 : index
    %831 = memref.load %arg1[%c24] : memref<36xf32, #tpu.memory_space<smem>>
    %c25 = arith.constant 25 : index
    %832 = memref.load %arg1[%c25] : memref<36xf32, #tpu.memory_space<smem>>
    %c26 = arith.constant 26 : index
    %833 = memref.load %arg1[%c26] : memref<36xf32, #tpu.memory_space<smem>>
    %c27 = arith.constant 27 : index
    %834 = memref.load %arg1[%c27] : memref<36xf32, #tpu.memory_space<smem>>
    %c28 = arith.constant 28 : index
    %835 = memref.load %arg1[%c28] : memref<36xf32, #tpu.memory_space<smem>>
    %c29 = arith.constant 29 : index
    %836 = memref.load %arg1[%c29] : memref<36xf32, #tpu.memory_space<smem>>
    %c30 = arith.constant 30 : index
    %837 = memref.load %arg1[%c30] : memref<36xf32, #tpu.memory_space<smem>>
    %c31 = arith.constant 31 : index
    %838 = memref.load %arg1[%c31] : memref<36xf32, #tpu.memory_space<smem>>
    %c32 = arith.constant 32 : index
    %839 = memref.load %arg1[%c32] : memref<36xf32, #tpu.memory_space<smem>>
    %c33 = arith.constant 33 : index
    %840 = memref.load %arg1[%c33] : memref<36xf32, #tpu.memory_space<smem>>
    %c34 = arith.constant 34 : index
    %841 = memref.load %arg1[%c34] : memref<36xf32, #tpu.memory_space<smem>>
    %c35 = arith.constant 35 : index
    %842 = memref.load %arg1[%c35] : memref<36xf32, #tpu.memory_space<smem>>
    %cst_53 = arith.constant 0.000000e+00 : f32
    %843 = vector.broadcast %cst_53 : f32 to vector<1x2xf32>
    %cst_54 = arith.constant 0.000000e+00 : f32
    %844 = vector.broadcast %cst_54 : f32 to vector<1x2xf32>
    %845 = vector.extract_strided_slice %830 {offsets = [0, 0], sizes = [1, 2], strides = [1, 1]} : vector<8x2xf32> to vector<1x2xf32>
    %846 = vector.broadcast %831 : f32 to vector<1x2xf32>
    %847 = arith.mulf %845, %846 : vector<1x2xf32>
    %848 = vector.broadcast %835 : f32 to vector<1x2xf32>
    %849 = arith.mulf %843, %848 : vector<1x2xf32>
    %850 = arith.addf %847, %849 : vector<1x2xf32>
    %851 = vector.broadcast %839 : f32 to vector<1x2xf32>
    %852 = arith.addf %850, %851 : vector<1x2xf32>
    %853 = arith.negf %852 : vector<1x2xf32>
    %854 = math.exp %853 : vector<1x2xf32>
    %cst_55 = arith.constant 1.000000e+00 : f32
    %855 = vector.broadcast %cst_55 : f32 to vector<1x2xf32>
    %856 = arith.addf %855, %854 : vector<1x2xf32>
    %857 = arith.divf %855, %856 : vector<1x2xf32>
    %858 = vector.broadcast %832 : f32 to vector<1x2xf32>
    %859 = arith.mulf %845, %858 : vector<1x2xf32>
    %860 = vector.broadcast %836 : f32 to vector<1x2xf32>
    %861 = arith.mulf %843, %860 : vector<1x2xf32>
    %862 = arith.addf %859, %861 : vector<1x2xf32>
    %863 = vector.broadcast %840 : f32 to vector<1x2xf32>
    %864 = arith.addf %862, %863 : vector<1x2xf32>
    %865 = arith.negf %864 : vector<1x2xf32>
    %866 = math.exp %865 : vector<1x2xf32>
    %cst_56 = arith.constant 1.000000e+00 : f32
    %867 = vector.broadcast %cst_56 : f32 to vector<1x2xf32>
    %868 = arith.addf %867, %866 : vector<1x2xf32>
    %869 = arith.divf %867, %868 : vector<1x2xf32>
    %870 = vector.broadcast %833 : f32 to vector<1x2xf32>
    %871 = arith.mulf %845, %870 : vector<1x2xf32>
    %872 = vector.broadcast %837 : f32 to vector<1x2xf32>
    %873 = arith.mulf %843, %872 : vector<1x2xf32>
    %874 = arith.addf %871, %873 : vector<1x2xf32>
    %875 = vector.broadcast %841 : f32 to vector<1x2xf32>
    %876 = arith.addf %874, %875 : vector<1x2xf32>
    %877 = math.tanh %876 : vector<1x2xf32>
    %878 = vector.broadcast %834 : f32 to vector<1x2xf32>
    %879 = arith.mulf %845, %878 : vector<1x2xf32>
    %880 = vector.broadcast %838 : f32 to vector<1x2xf32>
    %881 = arith.mulf %843, %880 : vector<1x2xf32>
    %882 = arith.addf %879, %881 : vector<1x2xf32>
    %883 = vector.broadcast %842 : f32 to vector<1x2xf32>
    %884 = arith.addf %882, %883 : vector<1x2xf32>
    %885 = arith.negf %884 : vector<1x2xf32>
    %886 = math.exp %885 : vector<1x2xf32>
    %cst_57 = arith.constant 1.000000e+00 : f32
    %887 = vector.broadcast %cst_57 : f32 to vector<1x2xf32>
    %888 = arith.addf %887, %886 : vector<1x2xf32>
    %889 = arith.divf %887, %888 : vector<1x2xf32>
    %890 = arith.mulf %869, %844 : vector<1x2xf32>
    %891 = arith.mulf %857, %877 : vector<1x2xf32>
    %892 = arith.addf %890, %891 : vector<1x2xf32>
    %893 = math.tanh %892 : vector<1x2xf32>
    %894 = arith.mulf %889, %893 : vector<1x2xf32>
    %895 = vector.extract_strided_slice %830 {offsets = [1, 0], sizes = [1, 2], strides = [1, 1]} : vector<8x2xf32> to vector<1x2xf32>
    %896 = vector.broadcast %831 : f32 to vector<1x2xf32>
    %897 = arith.mulf %895, %896 : vector<1x2xf32>
    %898 = vector.broadcast %835 : f32 to vector<1x2xf32>
    %899 = arith.mulf %894, %898 : vector<1x2xf32>
    %900 = arith.addf %897, %899 : vector<1x2xf32>
    %901 = vector.broadcast %839 : f32 to vector<1x2xf32>
    %902 = arith.addf %900, %901 : vector<1x2xf32>
    %903 = arith.negf %902 : vector<1x2xf32>
    %904 = math.exp %903 : vector<1x2xf32>
    %cst_58 = arith.constant 1.000000e+00 : f32
    %905 = vector.broadcast %cst_58 : f32 to vector<1x2xf32>
    %906 = arith.addf %905, %904 : vector<1x2xf32>
    %907 = arith.divf %905, %906 : vector<1x2xf32>
    %908 = vector.broadcast %832 : f32 to vector<1x2xf32>
    %909 = arith.mulf %895, %908 : vector<1x2xf32>
    %910 = vector.broadcast %836 : f32 to vector<1x2xf32>
    %911 = arith.mulf %894, %910 : vector<1x2xf32>
    %912 = arith.addf %909, %911 : vector<1x2xf32>
    %913 = vector.broadcast %840 : f32 to vector<1x2xf32>
    %914 = arith.addf %912, %913 : vector<1x2xf32>
    %915 = arith.negf %914 : vector<1x2xf32>
    %916 = math.exp %915 : vector<1x2xf32>
    %cst_59 = arith.constant 1.000000e+00 : f32
    %917 = vector.broadcast %cst_59 : f32 to vector<1x2xf32>
    %918 = arith.addf %917, %916 : vector<1x2xf32>
    %919 = arith.divf %917, %918 : vector<1x2xf32>
    %920 = vector.broadcast %833 : f32 to vector<1x2xf32>
    %921 = arith.mulf %895, %920 : vector<1x2xf32>
    %922 = vector.broadcast %837 : f32 to vector<1x2xf32>
    %923 = arith.mulf %894, %922 : vector<1x2xf32>
    %924 = arith.addf %921, %923 : vector<1x2xf32>
    %925 = vector.broadcast %841 : f32 to vector<1x2xf32>
    %926 = arith.addf %924, %925 : vector<1x2xf32>
    %927 = math.tanh %926 : vector<1x2xf32>
    %928 = vector.broadcast %834 : f32 to vector<1x2xf32>
    %929 = arith.mulf %895, %928 : vector<1x2xf32>
    %930 = vector.broadcast %838 : f32 to vector<1x2xf32>
    %931 = arith.mulf %894, %930 : vector<1x2xf32>
    %932 = arith.addf %929, %931 : vector<1x2xf32>
    %933 = vector.broadcast %842 : f32 to vector<1x2xf32>
    %934 = arith.addf %932, %933 : vector<1x2xf32>
    %935 = arith.negf %934 : vector<1x2xf32>
    %936 = math.exp %935 : vector<1x2xf32>
    %cst_60 = arith.constant 1.000000e+00 : f32
    %937 = vector.broadcast %cst_60 : f32 to vector<1x2xf32>
    %938 = arith.addf %937, %936 : vector<1x2xf32>
    %939 = arith.divf %937, %938 : vector<1x2xf32>
    %940 = arith.mulf %919, %892 : vector<1x2xf32>
    %941 = arith.mulf %907, %927 : vector<1x2xf32>
    %942 = arith.addf %940, %941 : vector<1x2xf32>
    %943 = math.tanh %942 : vector<1x2xf32>
    %944 = arith.mulf %939, %943 : vector<1x2xf32>
    %945 = vector.extract_strided_slice %830 {offsets = [2, 0], sizes = [1, 2], strides = [1, 1]} : vector<8x2xf32> to vector<1x2xf32>
    %946 = vector.broadcast %831 : f32 to vector<1x2xf32>
    %947 = arith.mulf %945, %946 : vector<1x2xf32>
    %948 = vector.broadcast %835 : f32 to vector<1x2xf32>
    %949 = arith.mulf %944, %948 : vector<1x2xf32>
    %950 = arith.addf %947, %949 : vector<1x2xf32>
    %951 = vector.broadcast %839 : f32 to vector<1x2xf32>
    %952 = arith.addf %950, %951 : vector<1x2xf32>
    %953 = arith.negf %952 : vector<1x2xf32>
    %954 = math.exp %953 : vector<1x2xf32>
    %cst_61 = arith.constant 1.000000e+00 : f32
    %955 = vector.broadcast %cst_61 : f32 to vector<1x2xf32>
    %956 = arith.addf %955, %954 : vector<1x2xf32>
    %957 = arith.divf %955, %956 : vector<1x2xf32>
    %958 = vector.broadcast %832 : f32 to vector<1x2xf32>
    %959 = arith.mulf %945, %958 : vector<1x2xf32>
    %960 = vector.broadcast %836 : f32 to vector<1x2xf32>
    %961 = arith.mulf %944, %960 : vector<1x2xf32>
    %962 = arith.addf %959, %961 : vector<1x2xf32>
    %963 = vector.broadcast %840 : f32 to vector<1x2xf32>
    %964 = arith.addf %962, %963 : vector<1x2xf32>
    %965 = arith.negf %964 : vector<1x2xf32>
    %966 = math.exp %965 : vector<1x2xf32>
    %cst_62 = arith.constant 1.000000e+00 : f32
    %967 = vector.broadcast %cst_62 : f32 to vector<1x2xf32>
    %968 = arith.addf %967, %966 : vector<1x2xf32>
    %969 = arith.divf %967, %968 : vector<1x2xf32>
    %970 = vector.broadcast %833 : f32 to vector<1x2xf32>
    %971 = arith.mulf %945, %970 : vector<1x2xf32>
    %972 = vector.broadcast %837 : f32 to vector<1x2xf32>
    %973 = arith.mulf %944, %972 : vector<1x2xf32>
    %974 = arith.addf %971, %973 : vector<1x2xf32>
    %975 = vector.broadcast %841 : f32 to vector<1x2xf32>
    %976 = arith.addf %974, %975 : vector<1x2xf32>
    %977 = math.tanh %976 : vector<1x2xf32>
    %978 = vector.broadcast %834 : f32 to vector<1x2xf32>
    %979 = arith.mulf %945, %978 : vector<1x2xf32>
    %980 = vector.broadcast %838 : f32 to vector<1x2xf32>
    %981 = arith.mulf %944, %980 : vector<1x2xf32>
    %982 = arith.addf %979, %981 : vector<1x2xf32>
    %983 = vector.broadcast %842 : f32 to vector<1x2xf32>
    %984 = arith.addf %982, %983 : vector<1x2xf32>
    %985 = arith.negf %984 : vector<1x2xf32>
    %986 = math.exp %985 : vector<1x2xf32>
    %cst_63 = arith.constant 1.000000e+00 : f32
    %987 = vector.broadcast %cst_63 : f32 to vector<1x2xf32>
    %988 = arith.addf %987, %986 : vector<1x2xf32>
    %989 = arith.divf %987, %988 : vector<1x2xf32>
    %990 = arith.mulf %969, %942 : vector<1x2xf32>
    %991 = arith.mulf %957, %977 : vector<1x2xf32>
    %992 = arith.addf %990, %991 : vector<1x2xf32>
    %993 = math.tanh %992 : vector<1x2xf32>
    %994 = arith.mulf %989, %993 : vector<1x2xf32>
    %995 = vector.extract_strided_slice %830 {offsets = [3, 0], sizes = [1, 2], strides = [1, 1]} : vector<8x2xf32> to vector<1x2xf32>
    %996 = vector.broadcast %831 : f32 to vector<1x2xf32>
    %997 = arith.mulf %995, %996 : vector<1x2xf32>
    %998 = vector.broadcast %835 : f32 to vector<1x2xf32>
    %999 = arith.mulf %994, %998 : vector<1x2xf32>
    %1000 = arith.addf %997, %999 : vector<1x2xf32>
    %1001 = vector.broadcast %839 : f32 to vector<1x2xf32>
    %1002 = arith.addf %1000, %1001 : vector<1x2xf32>
    %1003 = arith.negf %1002 : vector<1x2xf32>
    %1004 = math.exp %1003 : vector<1x2xf32>
    %cst_64 = arith.constant 1.000000e+00 : f32
    %1005 = vector.broadcast %cst_64 : f32 to vector<1x2xf32>
    %1006 = arith.addf %1005, %1004 : vector<1x2xf32>
    %1007 = arith.divf %1005, %1006 : vector<1x2xf32>
    %1008 = vector.broadcast %832 : f32 to vector<1x2xf32>
    %1009 = arith.mulf %995, %1008 : vector<1x2xf32>
    %1010 = vector.broadcast %836 : f32 to vector<1x2xf32>
    %1011 = arith.mulf %994, %1010 : vector<1x2xf32>
    %1012 = arith.addf %1009, %1011 : vector<1x2xf32>
    %1013 = vector.broadcast %840 : f32 to vector<1x2xf32>
    %1014 = arith.addf %1012, %1013 : vector<1x2xf32>
    %1015 = arith.negf %1014 : vector<1x2xf32>
    %1016 = math.exp %1015 : vector<1x2xf32>
    %cst_65 = arith.constant 1.000000e+00 : f32
    %1017 = vector.broadcast %cst_65 : f32 to vector<1x2xf32>
    %1018 = arith.addf %1017, %1016 : vector<1x2xf32>
    %1019 = arith.divf %1017, %1018 : vector<1x2xf32>
    %1020 = vector.broadcast %833 : f32 to vector<1x2xf32>
    %1021 = arith.mulf %995, %1020 : vector<1x2xf32>
    %1022 = vector.broadcast %837 : f32 to vector<1x2xf32>
    %1023 = arith.mulf %994, %1022 : vector<1x2xf32>
    %1024 = arith.addf %1021, %1023 : vector<1x2xf32>
    %1025 = vector.broadcast %841 : f32 to vector<1x2xf32>
    %1026 = arith.addf %1024, %1025 : vector<1x2xf32>
    %1027 = math.tanh %1026 : vector<1x2xf32>
    %1028 = vector.broadcast %834 : f32 to vector<1x2xf32>
    %1029 = arith.mulf %995, %1028 : vector<1x2xf32>
    %1030 = vector.broadcast %838 : f32 to vector<1x2xf32>
    %1031 = arith.mulf %994, %1030 : vector<1x2xf32>
    %1032 = arith.addf %1029, %1031 : vector<1x2xf32>
    %1033 = vector.broadcast %842 : f32 to vector<1x2xf32>
    %1034 = arith.addf %1032, %1033 : vector<1x2xf32>
    %1035 = arith.negf %1034 : vector<1x2xf32>
    %1036 = math.exp %1035 : vector<1x2xf32>
    %cst_66 = arith.constant 1.000000e+00 : f32
    %1037 = vector.broadcast %cst_66 : f32 to vector<1x2xf32>
    %1038 = arith.addf %1037, %1036 : vector<1x2xf32>
    %1039 = arith.divf %1037, %1038 : vector<1x2xf32>
    %1040 = arith.mulf %1019, %992 : vector<1x2xf32>
    %1041 = arith.mulf %1007, %1027 : vector<1x2xf32>
    %1042 = arith.addf %1040, %1041 : vector<1x2xf32>
    %1043 = math.tanh %1042 : vector<1x2xf32>
    %1044 = arith.mulf %1039, %1043 : vector<1x2xf32>
    %1045 = vector.extract_strided_slice %830 {offsets = [4, 0], sizes = [1, 2], strides = [1, 1]} : vector<8x2xf32> to vector<1x2xf32>
    %1046 = vector.broadcast %831 : f32 to vector<1x2xf32>
    %1047 = arith.mulf %1045, %1046 : vector<1x2xf32>
    %1048 = vector.broadcast %835 : f32 to vector<1x2xf32>
    %1049 = arith.mulf %1044, %1048 : vector<1x2xf32>
    %1050 = arith.addf %1047, %1049 : vector<1x2xf32>
    %1051 = vector.broadcast %839 : f32 to vector<1x2xf32>
    %1052 = arith.addf %1050, %1051 : vector<1x2xf32>
    %1053 = arith.negf %1052 : vector<1x2xf32>
    %1054 = math.exp %1053 : vector<1x2xf32>
    %cst_67 = arith.constant 1.000000e+00 : f32
    %1055 = vector.broadcast %cst_67 : f32 to vector<1x2xf32>
    %1056 = arith.addf %1055, %1054 : vector<1x2xf32>
    %1057 = arith.divf %1055, %1056 : vector<1x2xf32>
    %1058 = vector.broadcast %832 : f32 to vector<1x2xf32>
    %1059 = arith.mulf %1045, %1058 : vector<1x2xf32>
    %1060 = vector.broadcast %836 : f32 to vector<1x2xf32>
    %1061 = arith.mulf %1044, %1060 : vector<1x2xf32>
    %1062 = arith.addf %1059, %1061 : vector<1x2xf32>
    %1063 = vector.broadcast %840 : f32 to vector<1x2xf32>
    %1064 = arith.addf %1062, %1063 : vector<1x2xf32>
    %1065 = arith.negf %1064 : vector<1x2xf32>
    %1066 = math.exp %1065 : vector<1x2xf32>
    %cst_68 = arith.constant 1.000000e+00 : f32
    %1067 = vector.broadcast %cst_68 : f32 to vector<1x2xf32>
    %1068 = arith.addf %1067, %1066 : vector<1x2xf32>
    %1069 = arith.divf %1067, %1068 : vector<1x2xf32>
    %1070 = vector.broadcast %833 : f32 to vector<1x2xf32>
    %1071 = arith.mulf %1045, %1070 : vector<1x2xf32>
    %1072 = vector.broadcast %837 : f32 to vector<1x2xf32>
    %1073 = arith.mulf %1044, %1072 : vector<1x2xf32>
    %1074 = arith.addf %1071, %1073 : vector<1x2xf32>
    %1075 = vector.broadcast %841 : f32 to vector<1x2xf32>
    %1076 = arith.addf %1074, %1075 : vector<1x2xf32>
    %1077 = math.tanh %1076 : vector<1x2xf32>
    %1078 = vector.broadcast %834 : f32 to vector<1x2xf32>
    %1079 = arith.mulf %1045, %1078 : vector<1x2xf32>
    %1080 = vector.broadcast %838 : f32 to vector<1x2xf32>
    %1081 = arith.mulf %1044, %1080 : vector<1x2xf32>
    %1082 = arith.addf %1079, %1081 : vector<1x2xf32>
    %1083 = vector.broadcast %842 : f32 to vector<1x2xf32>
    %1084 = arith.addf %1082, %1083 : vector<1x2xf32>
    %1085 = arith.negf %1084 : vector<1x2xf32>
    %1086 = math.exp %1085 : vector<1x2xf32>
    %cst_69 = arith.constant 1.000000e+00 : f32
    %1087 = vector.broadcast %cst_69 : f32 to vector<1x2xf32>
    %1088 = arith.addf %1087, %1086 : vector<1x2xf32>
    %1089 = arith.divf %1087, %1088 : vector<1x2xf32>
    %1090 = arith.mulf %1069, %1042 : vector<1x2xf32>
    %1091 = arith.mulf %1057, %1077 : vector<1x2xf32>
    %1092 = arith.addf %1090, %1091 : vector<1x2xf32>
    %1093 = math.tanh %1092 : vector<1x2xf32>
    %1094 = arith.mulf %1089, %1093 : vector<1x2xf32>
    %1095 = vector.extract_strided_slice %830 {offsets = [5, 0], sizes = [1, 2], strides = [1, 1]} : vector<8x2xf32> to vector<1x2xf32>
    %1096 = vector.broadcast %831 : f32 to vector<1x2xf32>
    %1097 = arith.mulf %1095, %1096 : vector<1x2xf32>
    %1098 = vector.broadcast %835 : f32 to vector<1x2xf32>
    %1099 = arith.mulf %1094, %1098 : vector<1x2xf32>
    %1100 = arith.addf %1097, %1099 : vector<1x2xf32>
    %1101 = vector.broadcast %839 : f32 to vector<1x2xf32>
    %1102 = arith.addf %1100, %1101 : vector<1x2xf32>
    %1103 = arith.negf %1102 : vector<1x2xf32>
    %1104 = math.exp %1103 : vector<1x2xf32>
    %cst_70 = arith.constant 1.000000e+00 : f32
    %1105 = vector.broadcast %cst_70 : f32 to vector<1x2xf32>
    %1106 = arith.addf %1105, %1104 : vector<1x2xf32>
    %1107 = arith.divf %1105, %1106 : vector<1x2xf32>
    %1108 = vector.broadcast %832 : f32 to vector<1x2xf32>
    %1109 = arith.mulf %1095, %1108 : vector<1x2xf32>
    %1110 = vector.broadcast %836 : f32 to vector<1x2xf32>
    %1111 = arith.mulf %1094, %1110 : vector<1x2xf32>
    %1112 = arith.addf %1109, %1111 : vector<1x2xf32>
    %1113 = vector.broadcast %840 : f32 to vector<1x2xf32>
    %1114 = arith.addf %1112, %1113 : vector<1x2xf32>
    %1115 = arith.negf %1114 : vector<1x2xf32>
    %1116 = math.exp %1115 : vector<1x2xf32>
    %cst_71 = arith.constant 1.000000e+00 : f32
    %1117 = vector.broadcast %cst_71 : f32 to vector<1x2xf32>
    %1118 = arith.addf %1117, %1116 : vector<1x2xf32>
    %1119 = arith.divf %1117, %1118 : vector<1x2xf32>
    %1120 = vector.broadcast %833 : f32 to vector<1x2xf32>
    %1121 = arith.mulf %1095, %1120 : vector<1x2xf32>
    %1122 = vector.broadcast %837 : f32 to vector<1x2xf32>
    %1123 = arith.mulf %1094, %1122 : vector<1x2xf32>
    %1124 = arith.addf %1121, %1123 : vector<1x2xf32>
    %1125 = vector.broadcast %841 : f32 to vector<1x2xf32>
    %1126 = arith.addf %1124, %1125 : vector<1x2xf32>
    %1127 = math.tanh %1126 : vector<1x2xf32>
    %1128 = vector.broadcast %834 : f32 to vector<1x2xf32>
    %1129 = arith.mulf %1095, %1128 : vector<1x2xf32>
    %1130 = vector.broadcast %838 : f32 to vector<1x2xf32>
    %1131 = arith.mulf %1094, %1130 : vector<1x2xf32>
    %1132 = arith.addf %1129, %1131 : vector<1x2xf32>
    %1133 = vector.broadcast %842 : f32 to vector<1x2xf32>
    %1134 = arith.addf %1132, %1133 : vector<1x2xf32>
    %1135 = arith.negf %1134 : vector<1x2xf32>
    %1136 = math.exp %1135 : vector<1x2xf32>
    %cst_72 = arith.constant 1.000000e+00 : f32
    %1137 = vector.broadcast %cst_72 : f32 to vector<1x2xf32>
    %1138 = arith.addf %1137, %1136 : vector<1x2xf32>
    %1139 = arith.divf %1137, %1138 : vector<1x2xf32>
    %1140 = arith.mulf %1119, %1092 : vector<1x2xf32>
    %1141 = arith.mulf %1107, %1127 : vector<1x2xf32>
    %1142 = arith.addf %1140, %1141 : vector<1x2xf32>
    %1143 = math.tanh %1142 : vector<1x2xf32>
    %1144 = arith.mulf %1139, %1143 : vector<1x2xf32>
    %1145 = vector.extract_strided_slice %830 {offsets = [6, 0], sizes = [1, 2], strides = [1, 1]} : vector<8x2xf32> to vector<1x2xf32>
    %1146 = vector.broadcast %831 : f32 to vector<1x2xf32>
    %1147 = arith.mulf %1145, %1146 : vector<1x2xf32>
    %1148 = vector.broadcast %835 : f32 to vector<1x2xf32>
    %1149 = arith.mulf %1144, %1148 : vector<1x2xf32>
    %1150 = arith.addf %1147, %1149 : vector<1x2xf32>
    %1151 = vector.broadcast %839 : f32 to vector<1x2xf32>
    %1152 = arith.addf %1150, %1151 : vector<1x2xf32>
    %1153 = arith.negf %1152 : vector<1x2xf32>
    %1154 = math.exp %1153 : vector<1x2xf32>
    %cst_73 = arith.constant 1.000000e+00 : f32
    %1155 = vector.broadcast %cst_73 : f32 to vector<1x2xf32>
    %1156 = arith.addf %1155, %1154 : vector<1x2xf32>
    %1157 = arith.divf %1155, %1156 : vector<1x2xf32>
    %1158 = vector.broadcast %832 : f32 to vector<1x2xf32>
    %1159 = arith.mulf %1145, %1158 : vector<1x2xf32>
    %1160 = vector.broadcast %836 : f32 to vector<1x2xf32>
    %1161 = arith.mulf %1144, %1160 : vector<1x2xf32>
    %1162 = arith.addf %1159, %1161 : vector<1x2xf32>
    %1163 = vector.broadcast %840 : f32 to vector<1x2xf32>
    %1164 = arith.addf %1162, %1163 : vector<1x2xf32>
    %1165 = arith.negf %1164 : vector<1x2xf32>
    %1166 = math.exp %1165 : vector<1x2xf32>
    %cst_74 = arith.constant 1.000000e+00 : f32
    %1167 = vector.broadcast %cst_74 : f32 to vector<1x2xf32>
    %1168 = arith.addf %1167, %1166 : vector<1x2xf32>
    %1169 = arith.divf %1167, %1168 : vector<1x2xf32>
    %1170 = vector.broadcast %833 : f32 to vector<1x2xf32>
    %1171 = arith.mulf %1145, %1170 : vector<1x2xf32>
    %1172 = vector.broadcast %837 : f32 to vector<1x2xf32>
    %1173 = arith.mulf %1144, %1172 : vector<1x2xf32>
    %1174 = arith.addf %1171, %1173 : vector<1x2xf32>
    %1175 = vector.broadcast %841 : f32 to vector<1x2xf32>
    %1176 = arith.addf %1174, %1175 : vector<1x2xf32>
    %1177 = math.tanh %1176 : vector<1x2xf32>
    %1178 = vector.broadcast %834 : f32 to vector<1x2xf32>
    %1179 = arith.mulf %1145, %1178 : vector<1x2xf32>
    %1180 = vector.broadcast %838 : f32 to vector<1x2xf32>
    %1181 = arith.mulf %1144, %1180 : vector<1x2xf32>
    %1182 = arith.addf %1179, %1181 : vector<1x2xf32>
    %1183 = vector.broadcast %842 : f32 to vector<1x2xf32>
    %1184 = arith.addf %1182, %1183 : vector<1x2xf32>
    %1185 = arith.negf %1184 : vector<1x2xf32>
    %1186 = math.exp %1185 : vector<1x2xf32>
    %cst_75 = arith.constant 1.000000e+00 : f32
    %1187 = vector.broadcast %cst_75 : f32 to vector<1x2xf32>
    %1188 = arith.addf %1187, %1186 : vector<1x2xf32>
    %1189 = arith.divf %1187, %1188 : vector<1x2xf32>
    %1190 = arith.mulf %1169, %1142 : vector<1x2xf32>
    %1191 = arith.mulf %1157, %1177 : vector<1x2xf32>
    %1192 = arith.addf %1190, %1191 : vector<1x2xf32>
    %1193 = math.tanh %1192 : vector<1x2xf32>
    %1194 = arith.mulf %1189, %1193 : vector<1x2xf32>
    %1195 = vector.extract_strided_slice %830 {offsets = [7, 0], sizes = [1, 2], strides = [1, 1]} : vector<8x2xf32> to vector<1x2xf32>
    %1196 = vector.broadcast %831 : f32 to vector<1x2xf32>
    %1197 = arith.mulf %1195, %1196 : vector<1x2xf32>
    %1198 = vector.broadcast %835 : f32 to vector<1x2xf32>
    %1199 = arith.mulf %1194, %1198 : vector<1x2xf32>
    %1200 = arith.addf %1197, %1199 : vector<1x2xf32>
    %1201 = vector.broadcast %839 : f32 to vector<1x2xf32>
    %1202 = arith.addf %1200, %1201 : vector<1x2xf32>
    %1203 = arith.negf %1202 : vector<1x2xf32>
    %1204 = math.exp %1203 : vector<1x2xf32>
    %cst_76 = arith.constant 1.000000e+00 : f32
    %1205 = vector.broadcast %cst_76 : f32 to vector<1x2xf32>
    %1206 = arith.addf %1205, %1204 : vector<1x2xf32>
    %1207 = arith.divf %1205, %1206 : vector<1x2xf32>
    %1208 = vector.broadcast %832 : f32 to vector<1x2xf32>
    %1209 = arith.mulf %1195, %1208 : vector<1x2xf32>
    %1210 = vector.broadcast %836 : f32 to vector<1x2xf32>
    %1211 = arith.mulf %1194, %1210 : vector<1x2xf32>
    %1212 = arith.addf %1209, %1211 : vector<1x2xf32>
    %1213 = vector.broadcast %840 : f32 to vector<1x2xf32>
    %1214 = arith.addf %1212, %1213 : vector<1x2xf32>
    %1215 = arith.negf %1214 : vector<1x2xf32>
    %1216 = math.exp %1215 : vector<1x2xf32>
    %cst_77 = arith.constant 1.000000e+00 : f32
    %1217 = vector.broadcast %cst_77 : f32 to vector<1x2xf32>
    %1218 = arith.addf %1217, %1216 : vector<1x2xf32>
    %1219 = arith.divf %1217, %1218 : vector<1x2xf32>
    %1220 = vector.broadcast %833 : f32 to vector<1x2xf32>
    %1221 = arith.mulf %1195, %1220 : vector<1x2xf32>
    %1222 = vector.broadcast %837 : f32 to vector<1x2xf32>
    %1223 = arith.mulf %1194, %1222 : vector<1x2xf32>
    %1224 = arith.addf %1221, %1223 : vector<1x2xf32>
    %1225 = vector.broadcast %841 : f32 to vector<1x2xf32>
    %1226 = arith.addf %1224, %1225 : vector<1x2xf32>
    %1227 = math.tanh %1226 : vector<1x2xf32>
    %1228 = vector.broadcast %834 : f32 to vector<1x2xf32>
    %1229 = arith.mulf %1195, %1228 : vector<1x2xf32>
    %1230 = vector.broadcast %838 : f32 to vector<1x2xf32>
    %1231 = arith.mulf %1194, %1230 : vector<1x2xf32>
    %1232 = arith.addf %1229, %1231 : vector<1x2xf32>
    %1233 = vector.broadcast %842 : f32 to vector<1x2xf32>
    %1234 = arith.addf %1232, %1233 : vector<1x2xf32>
    %1235 = arith.negf %1234 : vector<1x2xf32>
    %1236 = math.exp %1235 : vector<1x2xf32>
    %cst_78 = arith.constant 1.000000e+00 : f32
    %1237 = vector.broadcast %cst_78 : f32 to vector<1x2xf32>
    %1238 = arith.addf %1237, %1236 : vector<1x2xf32>
    %1239 = arith.divf %1237, %1238 : vector<1x2xf32>
    %1240 = arith.mulf %1219, %1192 : vector<1x2xf32>
    %1241 = arith.mulf %1207, %1227 : vector<1x2xf32>
    %1242 = arith.addf %1240, %1241 : vector<1x2xf32>
    %1243 = math.tanh %1242 : vector<1x2xf32>
    %1244 = arith.mulf %1239, %1243 : vector<1x2xf32>
    %1245 = tpu.concatenate %894, %944, %994, %1044, %1094, %1144, %1194, %1244 in 0 : vector<1x2xf32>, vector<1x2xf32>, vector<1x2xf32>, vector<1x2xf32>, vector<1x2xf32>, vector<1x2xf32>, vector<1x2xf32>, vector<1x2xf32> -> vector<8x2xf32>
    %c0_79 = arith.constant 0 : index
    %c0_80 = arith.constant 0 : index
    %1246 = vector.load %arg3[%c0_79, %c0_80] : memref<8x2xf32, #tpu.memory_space<vmem>>, vector<8x2xf32>
    tpu.vector_store %arg3[%c0_79, %c0_80], %1245 {strides = array<i32>} : memref<8x2xf32, #tpu.memory_space<vmem>>, vector<8x2xf32>,
    %c0_81 = arith.constant 0 : index
    %c0_82 = arith.constant 0 : index
    %1247 = vector.load %arg2[%c0_81, %c0_82] : memref<1x2xi32, #tpu.memory_space<vmem>>, vector<1x2xi32>
    %1248 = arith.sitofp %1247 : vector<1x2xi32> to vector<1x2xf32>
    %cst_83 = arith.constant 5.96046448E-8 : f32
    %1249 = vector.broadcast %cst_83 : f32 to vector<1x2xf32>
    %1250 = arith.mulf %1248, %1249 : vector<1x2xf32>
    %c0_84 = arith.constant 0 : index
    %c0_85 = arith.constant 0 : index
    %1251 = vector.load %arg4[%c0_84, %c0_85] : memref<1x2xf32, #tpu.memory_space<vmem>>, vector<1x2xf32>
    tpu.vector_store %arg4[%c0_84, %c0_85], %1250 {strides = array<i32>} : memref<1x2xf32, #tpu.memory_space<vmem>>, vector<1x2xf32>,
    return
  }
}

</mosaic_0001>

<bundles_post_ra>
// kernel: model_forward.1
= control target key start
LH: loop header
LB: loop body
LE: loop exit
PB: predicated region body
PF: predicated region fallthrough
CT: control target
= control target key end

     0   :  { %10 = vsyncpa [#allocation4], 0  ;;  %s3575_s0 = inlined_call_operand.vmem [shape: f32[8,2], index: 0, kind: input, shape index: {}]   ;;  %s3576_s1 = inlined_call_operand.vmem [shape: f32[36], index: 1, kind: input, shape index: {}]   ;;  %s3577_s2 = inlined_call_operand.vmem [shape: s32[1,2], index: 2, kind: input, shape index: {}]   ;;  %s3578_s3 = inlined_call_operand.hbm [shape: f32[8,2], index: 3, kind: output, shape index: {0}]   ;;  %s3579_s4 = inlined_call_operand.hbm [shape: f32[1,2], index: 4, kind: output, shape index: {1}]  }
   0x1   :  { %11 = vsyncpa [#allocation3], 0 }
   0x2   :  { %12 = vsyncpa [#allocation7], 0  ;;  %s20_s17 = sshll.u32 %s3576_s1, 4  ;;  %s2859_s18 = smov [#allocation2]   ;;  %s21_s17 = int_to_ptr.vmem [resolvable:$true] %s20_s17 }
   0x3   :  { %23 = dma.vmem_to_smem %s21_s17, 16, %s2859_s18, [#allocation4]  }
   0x4   :  { %2853 = dma.done.wait [#allocation4], 16  }
   0x5   :  { %2854 = vsyncadd [#allocation4], 4294967280 }
   0x6   :  { %30 = sfence }
   0x7   :  { %s32_s19 = sld [smem:[#allocation2]]  ;;  %v31_v0 = vld [vmem:[%s3575_s0] sm:$0xff] }
   0x8   :  { %s2299_s20 = sld [smem:[#allocation2 + $0x1]] }
   0x9   :  { %s2301_s21 = sld [smem:[#allocation2 + $0x3]] }
   0xa   :  { %s2302_s22 = sld [smem:[#allocation2 + $0x4]] }
   0xb   :  { %s2303_s23 = sld [smem:[#allocation2 + $0x5]] }
   0xc   :  { %s2305_s26 = sld [smem:[#allocation2 + $0x7]] }
   0xd   :  { %v44_v1 = vstv %s32_s19  ;;  %s2306_s27 = sld [smem:[#allocation2 + $0x8]] }
   0xe   :  { %v70_v2 = vstv %s2299_s20  ;;  %s2307_s1 = sld [smem:[#allocation2 + $0x9]]  ;;  %v2893_v3 = vmul.f32 %v44_v1, %v31_v0 }
   0xf   :  { %v104_v4 = vstv %s2301_s21  ;;  %v2897_v6 = vmul.f32 %v70_v2, %v31_v0  ;;  %s2309_s28 = sld [smem:[#allocation2 + $0xb]] }
  0x10   :  { %v2895_v5 = vstv %s2302_s22  ;;  %s2300_s29 = sld [smem:[#allocation2 + $0x2]]  ;;  %v2903_v10 = vmul.f32 %v104_v4, %v31_v0 }
  0x11   :  { %v47_v7 = vmul.f32 0.0, %v2895_v5  ;;  %v2900_v8 = vstv %s2303_s23  ;;  %s2304_s0 = sld [smem:[#allocation2 + $0x6]] }
  0x12   :  { %v73_v9 = vmul.f32 0.0, %v2900_v8  ;;  %v2906_v12 = vstv %s2305_s26  ;;  %s2308_s30 = sld [smem:[#allocation2 + $0xa]] }
  0x13   :  { %v48_v11 = vadd.f32 %v47_v7, %v2893_v3  ;;  %v2908_v13 = vstv %s2306_s27  ;;  %v107_v15 = vmul.f32 0.0, %v2906_v12  ;;  %s3106_s5 = sld [smem:[#allocation2 + $0xc]] }
  0x14   :  { %v74_v14 = vadd.f32 %v73_v9, %v2897_v6  ;;  %v2913_v17 = vstv %s2307_s1  ;;  %s2338_s6 = sld [smem:[#allocation2 + $0x10]] }
  0x15   :  { %v50_v16 = vadd.f32 %v2908_v13, %v48_v11  ;;  %v108_v19 = vadd.f32 %v107_v15, %v2903_v10  ;;  %v2917_v21 = vstv %s2309_s28  ;;  %s2339_s7 = sld [smem:[#allocation2 + $0x11]] }
  0x16   :  { %v76_v18 = vadd.f32 %v2913_v17, %v74_v14  ;;  %v96_v25 = vstv %s2300_s29  ;;  %s2341_s8 = sld [smem:[#allocation2 + $0x13]] }
  0x17   :  { %v2310_v20 = vmul.f32 -1.442695, %v50_v16  ;;  %v110_v23 = vadd.f32 %v2917_v21, %v108_v19  ;;  %v2920_v26 = vstv %s2304_s0  ;;  %v2922_v27 = vmul.f32 %v96_v25, %v31_v0  ;;  %s2335_s9 = sld [smem:[#allocation2 + $0xd]]  ;;  %s2860_s0 = smov [#allocation6]  }
  0x18   :  { %v2311_v22 = vmul.f32 -1.442695, %v76_v18  ;;  %v99_v28 = vmul.f32 0.0, %v2920_v26  ;;  %v2926_v35 = vstv %s2308_s30  ;;  %s2337_s10 = sld [smem:[#allocation2 + $0xf]]  ;;  %s2282_s30 = sshll.u32 %s2860_s0, 4  ;;  %s2283_s30 = int_to_ptr.vmem [resolvable:$true] %s2282_s30 }
  0x19   :  { %2409 = vpow2.f32 %v2310_v20  ;;  %v2312_v24 = vmul.f32 -1.442695, %v110_v23  ;;  %s2342_s11 = sld [smem:[#allocation2 + $0x14]] }
  0x1a   :  { %2411 = vpow2.f32 %v2311_v22  ;;  %v100_v34 = vadd.f32 %v99_v28, %v2922_v27  ;;  %s2343_s12 = sld [smem:[#allocation2 + $0x15]] }
  0x1b   :  { %2413 = vpow2.f32 %v2312_v24  ;;  %s2345_s13 = sld [smem:[#allocation2 + $0x17]] }
  0x1c   :  { %v102_v37 = vadd.f32 %v2926_v35, %v100_v34  ;;  %s2336_s14 = sld [smem:[#allocation2 + $0xe]] }
  0x1d   :  { %s2340_s15 = sld [smem:[#allocation2 + $0x12]] }
  0x1e   :  { %s2344_s16 = sld [smem:[#allocation2 + $0x16]] }
  0x1f   :  { %v2410_v29 = vpop.eup %2409  ;;  %s3336_s17 = sld [smem:[#allocation2 + $0x18]] }
  0x20   :  { %v2412_v30 = vpop.eup %2411  ;;  %v54_v31 = vadd.f32 1.0, %v2410_v29  ;;  %s2374_s18 = sld [smem:[#allocation2 + $0x1c]] }
  0x21   :  { %v80_v32 = vadd.f32 1.0, %v2412_v30  ;;  %v2414_v33 = vpop.eup %2413  ;;  %s2375_s19 = sld [smem:[#allocation2 + $0x1d]] }
  0x22   :  { %2415 = vrcp.f32 %v54_v31  ;;  %v114_v36 = vadd.f32 1.0, %v2414_v33  ;;  %vm60_vm0 = vweird.f32 %v54_v31  ;;  %v66_v41 = vand.u32 2147483648, %v54_v31  ;;  %s2377_s20 = sld [smem:[#allocation2 + $0x1f]] }
  0x23   :  { %2417 = vrcp.f32 %v80_v32  ;;  %v64_v44 = vand.u32 2147483647, %v54_v31  ;;  %v92_v45 = vand.u32 2147483648, %v80_v32  ;;  %vm86_vm2 = vweird.f32 %v80_v32  ;;  %s2371_s21 = sld [smem:[#allocation2 + $0x19]] }
  0x24   :  { %2419 = vrcp.f32 %v114_v36  ;;  %v90_v48 = vand.u32 2147483647, %v80_v32  ;;  %v67_v51 = vor.u32 1.1754944e-38, %v66_v41  ;;  %vm120_vm8 = vweird.f32 %v114_v36  ;;  %s2373_s22 = sld [smem:[#allocation2 + $0x1b]] }
  0x25   :  { %2421 = vtanh.f32 %v102_v37  ;;  %vm65_vm5 = vcmp.eq.f32.partialorder %v64_v44, 8.507059e+37  ;;  %v93_v54 = vor.u32 1.1754944e-38, %v92_v45  ;;  %v126_v0 = vand.u32 2147483648, %v114_v36  ;;  %s2378_s23 = sld [smem:[#allocation2 + $0x20]] }
  0x26   :  { %vm91_vm7 = vcmp.eq.f32.partialorder %v90_v48, 8.507059e+37  ;;  %v124_v4 = vand.u32 2147483647, %v114_v36  ;;  %s2379_s24 = sld [smem:[#allocation2 + $0x21]] }
  0x27   :  { %v127_v9 = vor.u32 1.1754944e-38, %v126_v0  ;;  %s2381_s25 = sld [smem:[#allocation2 + $0x23]] }
  0x28   :  { %v2416_v38 = vpop.eup %2415  ;;  %vm125_vm11 = vcmp.eq.f32.partialorder %v124_v4, 8.507059e+37  ;;  %s2372_s26 = sld [smem:[#allocation2 + $0x1a]] }
  0x29   :  { %v2418_v39 = vpop.eup %2417  ;;  %v56_v40 = vmul.f32 %v2416_v38, %v54_v31  ;;  %vm61_vm1 = vweird.f32 %v2416_v38  ;;  %s2376_s27 = sld [smem:[#allocation2 + $0x1e]] }
  0x2a   :  { %v82_v42 = vmul.f32 %v2418_v39, %v80_v32  ;;  %v2420_v46 = vpop.eup %2419  ;;  %vm87_vm3 = vweird.f32 %v2418_v39  ;;  %vm62_vm4 = vmor %vm60_vm0, %vm61_vm1  ;;  %s2380_s1 = sld [smem:[#allocation2 + $0x22]] }
  0x2b   :  { %v57_v43 = vsub.f32 1.0, %v56_v40  ;;  %v116_v50 = vmul.f32 %v2420_v46, %v114_v36  ;;  %vm88_vm6 = vmor %vm86_vm2, %vm87_vm3  ;;  %v2422_v56 = vpop.eup %2421  ;;  %vm121_vm9 = vweird.f32 %v2420_v46 }
  0x2c   :  { %v83_v47 = vsub.f32 1.0, %v82_v42  ;;  %vm122_vm10 = vmor %vm120_vm8, %vm121_vm9 }
  0x2d   :  { %v58_v49 = vmul.f32 %v2416_v38, %v57_v43  ;;  %v117_v55 = vsub.f32 1.0, %v116_v50 }
  0x2e   :  { %v84_v52 = vmul.f32 %v2418_v39, %v83_v47 }
  0x2f   :  { %v59_v53 = vadd.f32 %v2416_v38, %v58_v49  ;;  %v118_v59 = vmul.f32 %v2420_v46, %v117_v55 }
  0x30   :  { %v85_v57 = vadd.f32 %v2418_v39, %v84_v52 }
  0x31   :  { %v63_v58 = vsel %vm62_vm4, %v2416_v38, %v59_v53  ;;  %v119_v2 = vadd.f32 %v2420_v46, %v118_v59 }
  0x32   :  { %v68_v60 = vsel %vm65_vm5, %v67_v51, %v63_v58  ;;  %v89_v61 = vsel %vm88_vm6, %v2418_v39, %v85_v57 }
  0x33   :  { %v94_v62 = vsel %vm91_vm7, %v93_v54, %v89_v61  ;;  %v131_v63 = vmul.f32 %v2422_v56, %v68_v60  ;;  %v123_v11 = vsel %vm122_vm10, %v2420_v46, %v119_v2 }
  0x34   :  { %v130_v1 = vmul.f32 0.0, %v94_v62  ;;  %v128_v14 = vsel %vm125_vm11, %v127_v9, %v123_v11 }
  0x36   :  { %v2930_v7 = vadd.f32 %v131_v63, %v130_v1 }
  0x38   :  { %2423 = vtanh.f32 %v2930_v7  ;;  %v218_v4 = vrot.slane %v2930_v7, 7 }
  0x3e   :  { %v2424_v15 = vpop.eup %2423 }
  0x3f   :  { %v2933_v16 = vmul.f32 %v2424_v15, %v128_v14 }
  0x41   :  { %v135_v18 = vmul.f32 %v2933_v16, %v2895_v5  ;;  %v160_v19 = vmul.f32 %v2933_v16, %v2900_v8  ;;  %v192_v20 = vmul.f32 %v2933_v16, %v2906_v12  ;;  %v185_v37 = vmul.f32 %v2933_v16, %v2920_v26 }
  0x43   :  { %v137_v22 = vrot.slane %v135_v18, 7  ;;  %v162_v23 = vrot.slane %v160_v19, 7  ;;  %v194_v24 = vrot.slane %v192_v20, 7  ;;  %v187_v38 = vrot.slane %v185_v37, 7 }
  0x45   :  { %v139_v25 = vadd.f32 %v137_v22, %v2893_v3  ;;  %v164_v28 = vadd.f32 %v162_v23, %v2897_v6  ;;  %v196_v29 = vadd.f32 %v194_v24, %v2903_v10  ;;  %v189_v44 = vadd.f32 %v187_v38, %v2922_v27 }
  0x47   :  { %v140_v30 = vadd.f32 %v139_v25, %v2908_v13  ;;  %v165_v31 = vadd.f32 %v164_v28, %v2913_v17  ;;  %v197_v32 = vadd.f32 %v196_v29, %v2917_v21  ;;  %v190_v46 = vadd.f32 %v189_v44, %v2926_v35 }
  0x49   :  { %v2313_v33 = vmul.f32 -1.442695, %v140_v30  ;;  %v2314_v34 = vmul.f32 -1.442695, %v165_v31  ;;  %v2315_v36 = vmul.f32 -1.442695, %v197_v32 }
  0x4b   :  { %2425 = vpow2.f32 %v2313_v33 }
  0x4c   :  { %2427 = vpow2.f32 %v2314_v34 }
  0x4d   :  { %2429 = vpow2.f32 %v2315_v36 }
  0x51   :  { %v2426_v39 = vpop.eup %2425 }
  0x52   :  { %v2428_v40 = vpop.eup %2427  ;;  %v144_v41 = vadd.f32 1.0, %v2426_v39 }
  0x53   :  { %v2430_v42 = vpop.eup %2429  ;;  %v169_v43 = vadd.f32 1.0, %v2428_v40 }
  0x54   :  { %2431 = vrcp.f32 %v144_v41  ;;  %v201_v45 = vadd.f32 1.0, %v2430_v42  ;;  %vm150_vm12 = vweird.f32 %v144_v41  ;;  %v156_v50 = vand.u32 2147483648, %v144_v41 }
  0x55   :  { %2433 = vrcp.f32 %v169_v43  ;;  %v154_v53 = vand.u32 2147483647, %v144_v41  ;;  %v181_v54 = vand.u32 2147483648, %v169_v43  ;;  %vm175_vm14 = vweird.f32 %v169_v43 }
  0x56   :  { %2435 = vrcp.f32 %v201_v45  ;;  %v179_v57 = vand.u32 2147483647, %v169_v43  ;;  %v157_v60 = vor.u32 1.1754944e-38, %v156_v50  ;;  %vm207_vm4 = vweird.f32 %v201_v45 }
  0x57   :  { %2437 = vtanh.f32 %v190_v46  ;;  %vm155_vm1 = vcmp.eq.f32.partialorder %v154_v53, 8.507059e+37  ;;  %v182_v63 = vor.u32 1.1754944e-38, %v181_v54  ;;  %v213_v20 = vand.u32 2147483648, %v201_v45 }
  0x58   :  { %vm180_vm3 = vcmp.eq.f32.partialorder %v179_v57, 8.507059e+37  ;;  %v211_v24 = vand.u32 2147483647, %v201_v45 }
  0x59   :  { %v214_v28 = vor.u32 1.1754944e-38, %v213_v20 }
  0x5a   :  { %v2432_v47 = vpop.eup %2431  ;;  %vm212_vm7 = vcmp.eq.f32.partialorder %v211_v24, 8.507059e+37 }
  0x5b   :  { %v2434_v48 = vpop.eup %2433  ;;  %v146_v49 = vmul.f32 %v2432_v47, %v144_v41  ;;  %vm151_vm13 = vweird.f32 %v2432_v47 }
  0x5c   :  { %v171_v51 = vmul.f32 %v2434_v48, %v169_v43  ;;  %v2436_v55 = vpop.eup %2435  ;;  %vm176_vm15 = vweird.f32 %v2434_v48  ;;  %vm152_vm0 = vmor %vm150_vm12, %vm151_vm13 }
  0x5d   :  { %v147_v52 = vsub.f32 1.0, %v146_v49  ;;  %v203_v59 = vmul.f32 %v2436_v55, %v201_v45  ;;  %vm177_vm2 = vmor %vm175_vm14, %vm176_vm15  ;;  %v2438_v1 = vpop.eup %2437  ;;  %vm208_vm5 = vweird.f32 %v2436_v55 }
  0x5e   :  { %v172_v56 = vsub.f32 1.0, %v171_v51  ;;  %vm209_vm6 = vmor %vm207_vm4, %vm208_vm5 }
  0x5f   :  { %v148_v58 = vmul.f32 %v2432_v47, %v147_v52  ;;  %v204_v0 = vsub.f32 1.0, %v203_v59 }
  0x60   :  { %v173_v61 = vmul.f32 %v2434_v48, %v172_v56 }
  0x61   :  { %v149_v62 = vadd.f32 %v2432_v47, %v148_v58  ;;  %v205_v11 = vmul.f32 %v2436_v55, %v204_v0 }
  0x62   :  { %v174_v2 = vadd.f32 %v2434_v48, %v173_v61 }
  0x63   :  { %v153_v9 = vsel %vm152_vm0, %v2432_v47, %v149_v62  ;;  %v206_v23 = vadd.f32 %v2436_v55, %v205_v11 }
  0x64   :  { %v158_v14 = vsel %vm155_vm1, %v157_v60, %v153_v9  ;;  %v178_v15 = vsel %vm177_vm2, %v2434_v48, %v174_v2 }
  0x65   :  { %v183_v18 = vsel %vm180_vm3, %v182_v63, %v178_v15  ;;  %v221_v19 = vmul.f32 %v2438_v1, %v158_v14  ;;  %v210_v29 = vsel %vm209_vm6, %v2436_v55, %v206_v23 }
  0x66   :  { %v220_v22 = vmul.f32 %v218_v4, %v183_v18  ;;  %v215_v7 = vsel %vm212_vm7, %v214_v28, %v210_v29 }
  0x68   :  { %v2953_v25 = vadd.f32 %v221_v19, %v220_v22 }
  0x6a   :  { %2439 = vtanh.f32 %v2953_v25  ;;  %v308_v28 = vrot.slane %v2953_v25, 7 }
  0x70   :  { %v2440_v30 = vpop.eup %2439 }
  0x71   :  { %v2956_v31 = vmul.f32 %v2440_v30, %v215_v7 }
  0x73   :  { %v225_v32 = vmul.f32 %v2956_v31, %v2895_v5  ;;  %v250_v33 = vmul.f32 %v2956_v31, %v2900_v8  ;;  %v282_v34 = vmul.f32 %v2956_v31, %v2906_v12  ;;  %v275_v48 = vmul.f32 %v2956_v31, %v2920_v26 }
  0x75   :  { %v227_v36 = vrot.slane %v225_v32, 7  ;;  %v252_v37 = vrot.slane %v250_v33, 7  ;;  %v284_v38 = vrot.slane %v282_v34, 7  ;;  %v277_v49 = vrot.slane %v275_v48, 7 }
  0x77   :  { %v229_v39 = vadd.f32 %v227_v36, %v2893_v3  ;;  %v254_v40 = vadd.f32 %v252_v37, %v2897_v6  ;;  %v286_v41 = vadd.f32 %v284_v38, %v2903_v10  ;;  %v279_v55 = vadd.f32 %v277_v49, %v2922_v27 }
  0x79   :  { %v230_v42 = vadd.f32 %v229_v39, %v2908_v13  ;;  %v255_v43 = vadd.f32 %v254_v40, %v2913_v17  ;;  %v287_v44 = vadd.f32 %v286_v41, %v2917_v21  ;;  %v280_v57 = vadd.f32 %v279_v55, %v2926_v35 }
  0x7b   :  { %v2316_v45 = vmul.f32 -1.442695, %v230_v42  ;;  %v2317_v46 = vmul.f32 -1.442695, %v255_v43  ;;  %v2318_v47 = vmul.f32 -1.442695, %v287_v44 }
  0x7d   :  { %2441 = vpow2.f32 %v2316_v45 }
  0x7e   :  { %2443 = vpow2.f32 %v2317_v46 }
  0x7f   :  { %2445 = vpow2.f32 %v2318_v47 }
  0x83   :  { %v2442_v50 = vpop.eup %2441 }
  0x84   :  { %v2444_v51 = vpop.eup %2443  ;;  %v234_v52 = vadd.f32 1.0, %v2442_v50 }
  0x85   :  { %v2446_v53 = vpop.eup %2445  ;;  %v259_v54 = vadd.f32 1.0, %v2444_v51 }
  0x86   :  { %2447 = vrcp.f32 %v234_v52  ;;  %v291_v56 = vadd.f32 1.0, %v2446_v53  ;;  %vm240_vm8 = vweird.f32 %v234_v52  ;;  %v246_v61 = vand.u32 2147483648, %v234_v52 }
  0x87   :  { %2449 = vrcp.f32 %v259_v54  ;;  %v244_v0 = vand.u32 2147483647, %v234_v52  ;;  %v271_v1 = vand.u32 2147483648, %v259_v54  ;;  %vm265_vm10 = vweird.f32 %v259_v54 }
  0x88   :  { %2451 = vrcp.f32 %v291_v56  ;;  %v269_v9 = vand.u32 2147483647, %v259_v54  ;;  %v247_v15 = vor.u32 1.1754944e-38, %v246_v61  ;;  %vm297_vm0 = vweird.f32 %v291_v56 }
  0x89   :  { %2453 = vtanh.f32 %v280_v57  ;;  %vm245_vm13 = vcmp.eq.f32.partialorder %v244_v0, 8.507059e+37  ;;  %v272_v20 = vor.u32 1.1754944e-38, %v271_v1  ;;  %v303_v36 = vand.u32 2147483648, %v291_v56 }
  0x8a   :  { %vm270_vm15 = vcmp.eq.f32.partialorder %v269_v9, 8.507059e+37  ;;  %v301_v39 = vand.u32 2147483647, %v291_v56 }
  0x8b   :  { %v304_v41 = vor.u32 1.1754944e-38, %v303_v36 }
  0x8c   :  { %v2448_v58 = vpop.eup %2447  ;;  %vm302_vm3 = vcmp.eq.f32.partialorder %v301_v39, 8.507059e+37 }
  0x8d   :  { %v2450_v59 = vpop.eup %2449  ;;  %v236_v60 = vmul.f32 %v2448_v58, %v234_v52  ;;  %vm241_vm9 = vweird.f32 %v2448_v58 }
  0x8e   :  { %v261_v62 = vmul.f32 %v2450_v59, %v259_v54  ;;  %v2452_v2 = vpop.eup %2451  ;;  %vm266_vm11 = vweird.f32 %v2450_v59  ;;  %vm242_vm12 = vmor %vm240_vm8, %vm241_vm9 }
  0x8f   :  { %v237_v63 = vsub.f32 1.0, %v236_v60  ;;  %v293_v14 = vmul.f32 %v2452_v2, %v291_v56  ;;  %vm267_vm14 = vmor %vm265_vm10, %vm266_vm11  ;;  %v2454_v23 = vpop.eup %2453  ;;  %vm298_vm1 = vweird.f32 %v2452_v2 }
  0x90   :  { %v262_v4 = vsub.f32 1.0, %v261_v62  ;;  %vm299_vm2 = vmor %vm297_vm0, %vm298_vm1 }
  0x91   :  { %v238_v11 = vmul.f32 %v2448_v58, %v237_v63  ;;  %v294_v22 = vsub.f32 1.0, %v293_v14 }
  0x92   :  { %v263_v18 = vmul.f32 %v2450_v59, %v262_v4 }
  0x93   :  { %v239_v19 = vadd.f32 %v2448_v58, %v238_v11  ;;  %v295_v7 = vmul.f32 %v2452_v2, %v294_v22 }
  0x94   :  { %v264_v24 = vadd.f32 %v2450_v59, %v263_v18 }
  0x95   :  { %v243_v29 = vsel %vm242_vm12, %v2448_v58, %v239_v19  ;;  %v296_v38 = vadd.f32 %v2452_v2, %v295_v7 }
  0x96   :  { %v248_v30 = vsel %vm245_vm13, %v247_v15, %v243_v29  ;;  %v268_v32 = vsel %vm267_vm14, %v2450_v59, %v264_v24 }
  0x97   :  { %v273_v33 = vsel %vm270_vm15, %v272_v20, %v268_v32  ;;  %v311_v34 = vmul.f32 %v2454_v23, %v248_v30  ;;  %v300_v42 = vsel %vm299_vm2, %v2452_v2, %v296_v38 }
  0x98   :  { %v310_v37 = vmul.f32 %v308_v28, %v273_v33  ;;  %v305_v25 = vsel %vm302_vm3, %v304_v41, %v300_v42 }
  0x9a   :  { %v2976_v40 = vadd.f32 %v311_v34, %v310_v37 }
  0x9c   :  { %2455 = vtanh.f32 %v2976_v40  ;;  %v398_v42 = vrot.slane %v2976_v40, 7 }
  0xa2   :  { %v2456_v43 = vpop.eup %2455 }
  0xa3   :  { %v2979_v44 = vmul.f32 %v2456_v43, %v305_v25 }
  0xa5   :  { %v315_v45 = vmul.f32 %v2979_v44, %v2895_v5  ;;  %v340_v46 = vmul.f32 %v2979_v44, %v2900_v8  ;;  %v372_v47 = vmul.f32 %v2979_v44, %v2906_v12  ;;  %v365_v60 = vmul.f32 %v2979_v44, %v2920_v26 }
  0xa7   :  { %v317_v48 = vrot.slane %v315_v45, 7  ;;  %v342_v49 = vrot.slane %v340_v46, 7  ;;  %v374_v50 = vrot.slane %v372_v47, 7  ;;  %v367_v61 = vrot.slane %v365_v60, 7 }
  0xa9   :  { %v319_v51 = vadd.f32 %v317_v48, %v2893_v3  ;;  %v344_v52 = vadd.f32 %v342_v49, %v2897_v6  ;;  %v376_v53 = vadd.f32 %v374_v50, %v2903_v10  ;;  %v369_v4 = vadd.f32 %v367_v61, %v2922_v27 }
  0xab   :  { %v320_v54 = vadd.f32 %v319_v51, %v2908_v13  ;;  %v345_v55 = vadd.f32 %v344_v52, %v2913_v17  ;;  %v377_v56 = vadd.f32 %v376_v53, %v2917_v21  ;;  %v370_v11 = vadd.f32 %v369_v4, %v2926_v35 }
  0xad   :  { %v2319_v57 = vmul.f32 -1.442695, %v320_v54  ;;  %v2320_v58 = vmul.f32 -1.442695, %v345_v55  ;;  %v2321_v59 = vmul.f32 -1.442695, %v377_v56 }
  0xaf   :  { %2457 = vpow2.f32 %v2319_v57 }
  0xb0   :  { %2459 = vpow2.f32 %v2320_v58 }
  0xb1   :  { %2461 = vpow2.f32 %v2321_v59 }
  0xb5   :  { %v2458_v62 = vpop.eup %2457 }
  0xb6   :  { %v2460_v63 = vpop.eup %2459  ;;  %v324_v0 = vadd.f32 1.0, %v2458_v62 }
  0xb7   :  { %v2462_v1 = vpop.eup %2461  ;;  %v349_v2 = vadd.f32 1.0, %v2460_v63 }
  0xb8   :  { %2463 = vrcp.f32 %v324_v0  ;;  %v381_v9 = vadd.f32 1.0, %v2462_v1  ;;  %vm330_vm4 = vweird.f32 %v324_v0  ;;  %v336_v19 = vand.u32 2147483648, %v324_v0 }
  0xb9   :  { %2465 = vrcp.f32 %v349_v2  ;;  %v334_v23 = vand.u32 2147483647, %v324_v0  ;;  %v361_v24 = vand.u32 2147483648, %v349_v2  ;;  %vm355_vm6 = vweird.f32 %v349_v2 }
  0xba   :  { %2467 = vrcp.f32 %v381_v9  ;;  %v359_v7 = vand.u32 2147483647, %v349_v2  ;;  %v337_v33 = vor.u32 1.1754944e-38, %v336_v19  ;;  %vm387_vm12 = vweird.f32 %v381_v9 }
  0xbb   :  { %2469 = vtanh.f32 %v370_v11  ;;  %vm335_vm9 = vcmp.eq.f32.partialorder %v334_v23, 8.507059e+37  ;;  %v362_v37 = vor.u32 1.1754944e-38, %v361_v24  ;;  %v393_v49 = vand.u32 2147483648, %v381_v9 }
  0xbc   :  { %vm360_vm11 = vcmp.eq.f32.partialorder %v359_v7, 8.507059e+37  ;;  %v391_v52 = vand.u32 2147483647, %v381_v9 }
  0xbd   :  { %v394_v54 = vor.u32 1.1754944e-38, %v393_v49 }
  0xbe   :  { %v2464_v14 = vpop.eup %2463  ;;  %vm392_vm15 = vcmp.eq.f32.partialorder %v391_v52, 8.507059e+37 }
  0xbf   :  { %v2466_v15 = vpop.eup %2465  ;;  %v326_v18 = vmul.f32 %v2464_v14, %v324_v0  ;;  %vm331_vm5 = vweird.f32 %v2464_v14 }
  0xc0   :  { %v351_v20 = vmul.f32 %v2466_v15, %v349_v2  ;;  %v2468_v28 = vpop.eup %2467  ;;  %vm356_vm7 = vweird.f32 %v2466_v15  ;;  %vm332_vm8 = vmor %vm330_vm4, %vm331_vm5 }
  0xc1   :  { %v327_v22 = vsub.f32 1.0, %v326_v18  ;;  %v383_v32 = vmul.f32 %v2468_v28, %v381_v9  ;;  %vm357_vm10 = vmor %vm355_vm6, %vm356_vm7  ;;  %v2470_v39 = vpop.eup %2469  ;;  %vm388_vm13 = vweird.f32 %v2468_v28 }
  0xc2   :  { %v352_v29 = vsub.f32 1.0, %v351_v20  ;;  %vm389_vm14 = vmor %vm387_vm12, %vm388_vm13 }
  0xc3   :  { %v328_v30 = vmul.f32 %v2464_v14, %v327_v22  ;;  %v384_v38 = vsub.f32 1.0, %v383_v32 }
  0xc4   :  { %v353_v34 = vmul.f32 %v2466_v15, %v352_v29 }
  0xc5   :  { %v329_v36 = vadd.f32 %v2464_v14, %v328_v30  ;;  %v385_v43 = vmul.f32 %v2468_v28, %v384_v38 }
  0xc6   :  { %v354_v41 = vadd.f32 %v2466_v15, %v353_v34 }
  0xc7   :  { %v333_v25 = vsel %vm332_vm8, %v2464_v14, %v329_v36  ;;  %v386_v51 = vadd.f32 %v2468_v28, %v385_v43 }
  0xc8   :  { %v338_v45 = vsel %vm335_vm9, %v337_v33, %v333_v25  ;;  %v358_v46 = vsel %vm357_vm10, %v2466_v15, %v354_v41 }
  0xc9   :  { %v363_v47 = vsel %vm360_vm11, %v362_v37, %v358_v46  ;;  %v401_v48 = vmul.f32 %v2470_v39, %v338_v45  ;;  %v390_v55 = vsel %vm389_vm14, %v2468_v28, %v386_v51 }
  0xca   :  { %v400_v50 = vmul.f32 %v398_v42, %v363_v47  ;;  %v395_v40 = vsel %vm392_vm15, %v394_v54, %v390_v55 }
  0xcc   :  { %v2999_v53 = vadd.f32 %v401_v48, %v400_v50 }
  0xce   :  { %2471 = vtanh.f32 %v2999_v53 }
  0xd4   :  { %v2472_v56 = vpop.eup %2471 }
  0xd5   :  { %v3002_v57 = vmul.f32 %v2472_v56, %v395_v40  ;;  %v488_v40 = vrot.slane %v2999_v53, 7 }
  0xd7   :  { %v405_v58 = vmul.f32 %v3002_v57, %v2895_v5  ;;  %v430_v59 = vmul.f32 %v3002_v57, %v2900_v8  ;;  %v462_v60 = vmul.f32 %v3002_v57, %v2906_v12  ;;  %v455_v19 = vmul.f32 %v3002_v57, %v2920_v26 }
  0xd9   :  { %v407_v61 = vrot.slane %v405_v58, 7  ;;  %v432_v62 = vrot.slane %v430_v59, 7  ;;  %v464_v63 = vrot.slane %v462_v60, 7  ;;  %v457_v20 = vrot.slane %v455_v19, 7 }
  0xdb   :  { %v409_v0 = vadd.f32 %v407_v61, %v2893_v3  ;;  %v434_v1 = vadd.f32 %v432_v62, %v2897_v6  ;;  %v466_v2 = vadd.f32 %v464_v63, %v2903_v10  ;;  %v459_v7 = vadd.f32 %v457_v20, %v2922_v27 }
  0xdd   :  { %v410_v4 = vadd.f32 %v409_v0, %v2908_v13  ;;  %v435_v9 = vadd.f32 %v434_v1, %v2913_v17  ;;  %v467_v11 = vadd.f32 %v466_v2, %v2917_v21  ;;  %v460_v32 = vadd.f32 %v459_v7, %v2926_v35 }
  0xdf   :  { %v2322_v14 = vmul.f32 -1.442695, %v410_v4  ;;  %v2323_v15 = vmul.f32 -1.442695, %v435_v9  ;;  %v2324_v18 = vmul.f32 -1.442695, %v467_v11 }
  0xe1   :  { %2473 = vpow2.f32 %v2322_v14 }
  0xe2   :  { %2475 = vpow2.f32 %v2323_v15 }
  0xe3   :  { %2477 = vpow2.f32 %v2324_v18 }
  0xe7   :  { %v2474_v22 = vpop.eup %2473 }
  0xe8   :  { %v2476_v23 = vpop.eup %2475  ;;  %v414_v24 = vadd.f32 1.0, %v2474_v22 }
  0xe9   :  { %v2478_v28 = vpop.eup %2477  ;;  %v439_v29 = vadd.f32 1.0, %v2476_v23 }
  0xea   :  { %2479 = vrcp.f32 %v414_v24  ;;  %v471_v30 = vadd.f32 1.0, %v2478_v28  ;;  %vm420_vm0 = vweird.f32 %v414_v24  ;;  %v426_v37 = vand.u32 2147483648, %v414_v24 }
  0xeb   :  { %2481 = vrcp.f32 %v439_v29  ;;  %v424_v41 = vand.u32 2147483647, %v414_v24  ;;  %v451_v42 = vand.u32 2147483648, %v439_v29  ;;  %vm445_vm2 = vweird.f32 %v439_v29 }
  0xec   :  { %2483 = vrcp.f32 %v471_v30  ;;  %v449_v45 = vand.u32 2147483647, %v439_v29  ;;  %v427_v48 = vor.u32 1.1754944e-38, %v426_v37  ;;  %vm477_vm8 = vweird.f32 %v471_v30 }
  0xed   :  { %2485 = vtanh.f32 %v460_v32  ;;  %vm425_vm5 = vcmp.eq.f32.partialorder %v424_v41, 8.507059e+37  ;;  %v452_v51 = vor.u32 1.1754944e-38, %v451_v42  ;;  %v483_v63 = vand.u32 2147483648, %v471_v30 }
  0xee   :  { %vm450_vm7 = vcmp.eq.f32.partialorder %v449_v45, 8.507059e+37  ;;  %v481_v2 = vand.u32 2147483647, %v471_v30 }
  0xef   :  { %v484_v9 = vor.u32 1.1754944e-38, %v483_v63 }
  0xf0   :  { %v2480_v33 = vpop.eup %2479  ;;  %vm482_vm11 = vcmp.eq.f32.partialorder %v481_v2, 8.507059e+37 }
  0xf1   :  { %v2482_v34 = vpop.eup %2481  ;;  %v416_v36 = vmul.f32 %v2480_v33, %v414_v24  ;;  %vm421_vm1 = vweird.f32 %v2480_v33 }
  0xf2   :  { %v441_v38 = vmul.f32 %v2482_v34, %v439_v29  ;;  %v2484_v25 = vpop.eup %2483  ;;  %vm446_vm3 = vweird.f32 %v2482_v34  ;;  %vm422_vm4 = vmor %vm420_vm0, %vm421_vm1 }
  0xf3   :  { %v417_v39 = vsub.f32 1.0, %v416_v36  ;;  %v473_v47 = vmul.f32 %v2484_v25, %v471_v30  ;;  %vm447_vm6 = vmor %vm445_vm2, %vm446_vm3  ;;  %v2486_v54 = vpop.eup %2485  ;;  %vm478_vm9 = vweird.f32 %v2484_v25 }
  0xf4   :  { %v442_v43 = vsub.f32 1.0, %v441_v38  ;;  %vm479_vm10 = vmor %vm477_vm8, %vm478_vm9 }
  0xf5   :  { %v418_v46 = vmul.f32 %v2480_v33, %v417_v39  ;;  %v474_v52 = vsub.f32 1.0, %v473_v47 }
  0xf6   :  { %v443_v49 = vmul.f32 %v2482_v34, %v442_v43 }
  0xf7   :  { %v419_v50 = vadd.f32 %v2480_v33, %v418_v46  ;;  %v475_v58 = vmul.f32 %v2484_v25, %v474_v52 }
  0xf8   :  { %v444_v55 = vadd.f32 %v2482_v34, %v443_v49 }
  0xf9   :  { %v423_v56 = vsel %vm422_vm4, %v2480_v33, %v419_v50  ;;  %v476_v1 = vadd.f32 %v2484_v25, %v475_v58 }
  0xfa   :  { %v428_v59 = vsel %vm425_vm5, %v427_v48, %v423_v56  ;;  %v448_v60 = vsel %vm447_vm6, %v2482_v34, %v444_v55 }
  0xfb   :  { %v453_v61 = vsel %vm450_vm7, %v452_v51, %v448_v60  ;;  %v491_v62 = vmul.f32 %v2486_v54, %v428_v59  ;;  %v480_v11 = vsel %vm479_vm10, %v2484_v25, %v476_v1 }
  0xfc   :  { %v490_v0 = vmul.f32 %v488_v40, %v453_v61  ;;  %v485_v53 = vsel %vm482_vm11, %v484_v9, %v480_v11 }
  0xfe   :  { %v3022_v4 = vadd.f32 %v491_v62, %v490_v0 }
 0x100   :  { %2487 = vtanh.f32 %v3022_v4 }
 0x106   :  { %v2488_v14 = vpop.eup %2487 }
 0x107   :  { %v3025_v15 = vmul.f32 %v2488_v14, %v485_v53  ;;  %v578_v14 = vrot.slane %v3022_v4, 7 }
 0x109   :  { %v495_v18 = vmul.f32 %v3025_v15, %v2895_v5  ;;  %v520_v19 = vmul.f32 %v3025_v15, %v2900_v8  ;;  %v552_v20 = vmul.f32 %v3025_v15, %v2906_v12  ;;  %v545_v38 = vmul.f32 %v3025_v15, %v2920_v26 }
 0x10b   :  { %v497_v22 = vrot.slane %v495_v18, 7  ;;  %v522_v23 = vrot.slane %v520_v19, 7  ;;  %v554_v24 = vrot.slane %v552_v20, 7  ;;  %v547_v39 = vrot.slane %v545_v38, 7 }
 0x10d   :  { %v499_v28 = vadd.f32 %v497_v22, %v2893_v3  ;;  %v524_v29 = vadd.f32 %v522_v23, %v2897_v6  ;;  %v556_v7 = vadd.f32 %v554_v24, %v2903_v10  ;;  %v549_v46 = vadd.f32 %v547_v39, %v2922_v27 }
 0x10f   :  { %v500_v30 = vadd.f32 %v499_v28, %v2908_v13  ;;  %v525_v32 = vadd.f32 %v524_v29, %v2913_v17  ;;  %v557_v33 = vadd.f32 %v556_v7, %v2917_v21  ;;  %v550_v48 = vadd.f32 %v549_v46, %v2926_v35 }
 0x111   :  { %v2325_v34 = vmul.f32 -1.442695, %v500_v30  ;;  %v2326_v36 = vmul.f32 -1.442695, %v525_v32  ;;  %v2327_v37 = vmul.f32 -1.442695, %v557_v33 }
 0x113   :  { %2489 = vpow2.f32 %v2325_v34 }
 0x114   :  { %2491 = vpow2.f32 %v2326_v36 }
 0x115   :  { %2493 = vpow2.f32 %v2327_v37 }
 0x119   :  { %v2490_v41 = vpop.eup %2489 }
 0x11a   :  { %v2492_v42 = vpop.eup %2491  ;;  %v504_v25 = vadd.f32 1.0, %v2490_v41 }
 0x11b   :  { %v2494_v43 = vpop.eup %2493  ;;  %v529_v45 = vadd.f32 1.0, %v2492_v42 }
 0x11c   :  { %2495 = vrcp.f32 %v504_v25  ;;  %v561_v47 = vadd.f32 1.0, %v2494_v43  ;;  %vm510_vm12 = vweird.f32 %v504_v25  ;;  %v516_v52 = vand.u32 2147483648, %v504_v25 }
 0x11d   :  { %2497 = vrcp.f32 %v529_v45  ;;  %v514_v40 = vand.u32 2147483647, %v504_v25  ;;  %v541_v56 = vand.u32 2147483648, %v529_v45  ;;  %vm535_vm14 = vweird.f32 %v529_v45 }
 0x11e   :  { %2499 = vrcp.f32 %v561_v47  ;;  %v539_v60 = vand.u32 2147483647, %v529_v45  ;;  %v517_v63 = vor.u32 1.1754944e-38, %v516_v52  ;;  %vm567_vm4 = vweird.f32 %v561_v47 }
 0x11f   :  { %2501 = vtanh.f32 %v550_v48  ;;  %vm515_vm1 = vcmp.eq.f32.partialorder %v514_v40, 8.507059e+37  ;;  %v542_v2 = vor.u32 1.1754944e-38, %v541_v56  ;;  %v573_v28 = vand.u32 2147483648, %v561_v47 }
 0x120   :  { %vm540_vm3 = vcmp.eq.f32.partialorder %v539_v60, 8.507059e+37  ;;  %v571_v30 = vand.u32 2147483647, %v561_v47 }
 0x121   :  { %v574_v33 = vor.u32 1.1754944e-38, %v573_v28 }
 0x122   :  { %v2496_v49 = vpop.eup %2495  ;;  %vm572_vm7 = vcmp.eq.f32.partialorder %v571_v30, 8.507059e+37 }
 0x123   :  { %v2498_v50 = vpop.eup %2497  ;;  %v506_v51 = vmul.f32 %v2496_v49, %v504_v25  ;;  %vm511_vm13 = vweird.f32 %v2496_v49 }
 0x124   :  { %v531_v54 = vmul.f32 %v2498_v50, %v529_v45  ;;  %v2500_v58 = vpop.eup %2499  ;;  %vm536_vm15 = vweird.f32 %v2498_v50  ;;  %vm512_vm0 = vmor %vm510_vm12, %vm511_vm13 }
 0x125   :  { %v507_v55 = vsub.f32 1.0, %v506_v51  ;;  %v563_v62 = vmul.f32 %v2500_v58, %v561_v47  ;;  %vm537_vm2 = vmor %vm535_vm14, %vm536_vm15  ;;  %v2502_v11 = vpop.eup %2501  ;;  %vm568_vm5 = vweird.f32 %v2500_v58 }
 0x126   :  { %v532_v59 = vsub.f32 1.0, %v531_v54  ;;  %vm569_vm6 = vmor %vm567_vm4, %vm568_vm5  ;;  %vm765_vm5 = vcmask 1040384  }
 0x127   :  { %v508_v61 = vmul.f32 %v2496_v49, %v507_v55  ;;  %v564_v9 = vsub.f32 1.0, %v563_v62 }
 0x128   :  { %v533_v0 = vmul.f32 %v2498_v50, %v532_v59 }
 0x129   :  { %v509_v1 = vadd.f32 %v2496_v49, %v508_v61  ;;  %v565_v19 = vmul.f32 %v2500_v58, %v564_v9 }
 0x12a   :  { %v534_v53 = vadd.f32 %v2498_v50, %v533_v0 }
 0x12b   :  { %v513_v18 = vsel %vm512_vm0, %v2496_v49, %v509_v1  ;;  %v566_v7 = vadd.f32 %v2500_v58, %v565_v19 }
 0x12c   :  { %v518_v20 = vsel %vm515_vm1, %v517_v63, %v513_v18  ;;  %v538_v22 = vsel %vm537_vm2, %v2498_v50, %v534_v53 }
 0x12d   :  { %v543_v23 = vsel %vm540_vm3, %v542_v2, %v538_v22  ;;  %v581_v24 = vmul.f32 %v2502_v11, %v518_v20  ;;  %v570_v34 = vsel %vm569_vm6, %v2500_v58, %v566_v7 }
 0x12e   :  { %v580_v29 = vmul.f32 %v578_v14, %v543_v23  ;;  %v575_v4 = vsel %vm572_vm7, %v574_v33, %v570_v34 }
 0x130   :  { %v3045_v32 = vadd.f32 %v581_v24, %v580_v29 }
 0x132   :  { %2503 = vtanh.f32 %v3045_v32 }
 0x138   :  { %v2504_v36 = vpop.eup %2503 }
 0x139   :  { %v3048_v37 = vmul.f32 %v2504_v36, %v575_v4 }
 0x13b   :  { %v585_v38 = vmul.f32 %v3048_v37, %v2895_v5  ;;  %v610_v39 = vmul.f32 %v3048_v37, %v2900_v8  ;;  %v642_v41 = vmul.f32 %v3048_v37, %v2906_v12  ;;  %v635_v55 = vmul.f32 %v3048_v37, %v2920_v26 }
 0x13d   :  { %v587_v42 = vrot.slane %v585_v38, 7  ;;  %v612_v25 = vrot.slane %v610_v39, 7  ;;  %v644_v43 = vrot.slane %v642_v41, 7  ;;  %v637_v40 = vrot.slane %v635_v55, 7 }
 0x13e   :  { %v668_v38 = vrot.slane %v3045_v32, 7 }
 0x13f   :  { %v589_v45 = vadd.f32 %v587_v42, %v2893_v3  ;;  %v614_v46 = vadd.f32 %v612_v25, %v2897_v6  ;;  %v646_v47 = vadd.f32 %v644_v43, %v2903_v10  ;;  %v639_v62 = vadd.f32 %v637_v40, %v2922_v27 }
 0x141   :  { %v590_v48 = vadd.f32 %v589_v45, %v2908_v13  ;;  %v615_v49 = vadd.f32 %v614_v46, %v2913_v17  ;;  %v647_v50 = vadd.f32 %v646_v47, %v2917_v21  ;;  %v640_v0 = vadd.f32 %v639_v62, %v2926_v35 }
 0x143   :  { %v2328_v51 = vmul.f32 -1.442695, %v590_v48  ;;  %v2329_v52 = vmul.f32 -1.442695, %v615_v49  ;;  %v2330_v54 = vmul.f32 -1.442695, %v647_v50 }
 0x145   :  { %2505 = vpow2.f32 %v2328_v51 }
 0x146   :  { %2507 = vpow2.f32 %v2329_v52 }
 0x147   :  { %2509 = vpow2.f32 %v2330_v54 }
 0x14b   :  { %v2506_v56 = vpop.eup %2505 }
 0x14c   :  { %v2508_v58 = vpop.eup %2507  ;;  %v594_v59 = vadd.f32 1.0, %v2506_v56 }
 0x14d   :  { %v2510_v60 = vpop.eup %2509  ;;  %v619_v61 = vadd.f32 1.0, %v2508_v58 }
 0x14e   :  { %2511 = vrcp.f32 %v594_v59  ;;  %v651_v63 = vadd.f32 1.0, %v2510_v60  ;;  %vm600_vm8 = vweird.f32 %v594_v59  ;;  %v606_v11 = vand.u32 2147483648, %v594_v59 }
 0x14f   :  { %2513 = vrcp.f32 %v619_v61  ;;  %v604_v18 = vand.u32 2147483647, %v594_v59  ;;  %v631_v19 = vand.u32 2147483648, %v619_v61  ;;  %vm625_vm10 = vweird.f32 %v619_v61 }
 0x150   :  { %2515 = vrcp.f32 %v651_v63  ;;  %v629_v23 = vand.u32 2147483647, %v619_v61  ;;  %v607_v29 = vor.u32 1.1754944e-38, %v606_v11  ;;  %vm657_vm0 = vweird.f32 %v651_v63 }
 0x151   :  { %2517 = vtanh.f32 %v640_v0  ;;  %vm605_vm13 = vcmp.eq.f32.partialorder %v604_v18, 8.507059e+37  ;;  %v632_v33 = vor.u32 1.1754944e-38, %v631_v19  ;;  %v663_v46 = vand.u32 2147483648, %v651_v63 }
 0x152   :  { %vm630_vm15 = vcmp.eq.f32.partialorder %v629_v23, 8.507059e+37  ;;  %v661_v49 = vand.u32 2147483647, %v651_v63 }
 0x153   :  { %v664_v51 = vor.u32 1.1754944e-38, %v663_v46 }
 0x154   :  { %v2512_v1 = vpop.eup %2511  ;;  %vm662_vm3 = vcmp.eq.f32.partialorder %v661_v49, 8.507059e+37 }
 0x155   :  { %v2514_v2 = vpop.eup %2513  ;;  %v596_v9 = vmul.f32 %v2512_v1, %v594_v59  ;;  %vm601_vm9 = vweird.f32 %v2512_v1 }
 0x156   :  { %v621_v53 = vmul.f32 %v2514_v2, %v619_v61  ;;  %v2516_v20 = vpop.eup %2515  ;;  %vm626_vm11 = vweird.f32 %v2514_v2  ;;  %vm602_vm12 = vmor %vm600_vm8, %vm601_vm9 }
 0x157   :  { %v597_v14 = vsub.f32 1.0, %v596_v9  ;;  %v653_v28 = vmul.f32 %v2516_v20, %v651_v63  ;;  %vm627_vm14 = vmor %vm625_vm10, %vm626_vm11  ;;  %v2518_v4 = vpop.eup %2517  ;;  %vm658_vm1 = vweird.f32 %v2516_v20  ;;  %vm767_vm10 = vcmask 1041408  }
 0x158   :  { %v622_v22 = vsub.f32 1.0, %v621_v53  ;;  %vm659_vm2 = vmor %vm657_vm0, %vm658_vm1  ;;  %vm771_vm1 = vcmask 1043456  }
 0x159   :  { %v598_v24 = vmul.f32 %v2512_v1, %v597_v14  ;;  %v654_v34 = vsub.f32 1.0, %v653_v28 }
 0x15a   :  { %v623_v7 = vmul.f32 %v2514_v2, %v622_v22 }
 0x15b   :  { %v599_v30 = vadd.f32 %v2512_v1, %v598_v24  ;;  %v655_v41 = vmul.f32 %v2516_v20, %v654_v34 }
 0x15c   :  { %v624_v36 = vadd.f32 %v2514_v2, %v623_v7 }
 0x15d   :  { %v603_v39 = vsel %vm602_vm12, %v2512_v1, %v599_v30  ;;  %v656_v48 = vadd.f32 %v2516_v20, %v655_v41 }
 0x15e   :  { %v608_v42 = vsel %vm605_vm13, %v607_v29, %v603_v39  ;;  %v628_v25 = vsel %vm627_vm14, %v2514_v2, %v624_v36  ;;  %vm769_vm14 = vcmask 1042432  }
 0x15f   :  { %v633_v43 = vsel %vm630_vm15, %v632_v33, %v628_v25  ;;  %v671_v45 = vmul.f32 %v2518_v4, %v608_v42  ;;  %v660_v52 = vsel %vm659_vm2, %v2516_v20, %v656_v48 }
 0x160   :  { %v670_v47 = vmul.f32 %v668_v38, %v633_v43  ;;  %v665_v32 = vsel %vm662_vm3, %v664_v51, %v660_v52  ;;  %v766_v38 = vsel %vm765_vm5, %v2933_v16, %v2956_v31  ;;  %vm773_vm3 = vcmask 1044480  }
 0x161   :  { %v768_v16 = vsel %vm767_vm10, %v766_v38, %v2979_v44  ;;  %v3160_v38 = vstv %s2344_s16 }
 0x162   :  { %v3068_v50 = vadd.f32 %v671_v45, %v670_v47 }
 0x164   :  { %2519 = vtanh.f32 %v3068_v50  ;;  %v758_v45 = vrot.slane %v3068_v50, 7 }
 0x16a   :  { %v2520_v54 = vpop.eup %2519 }
 0x16b   :  { %v3071_v55 = vmul.f32 %v2520_v54, %v665_v32 }
 0x16d   :  { %v675_v40 = vmul.f32 %v3071_v55, %v2895_v5  ;;  %v700_v56 = vmul.f32 %v3071_v55, %v2900_v8  ;;  %v732_v58 = vmul.f32 %v3071_v55, %v2906_v12  ;;  %v725_v12 = vmul.f32 %v3071_v55, %v2920_v26 }
 0x16f   :  { %v677_v59 = vrot.slane %v675_v40, 7  ;;  %v702_v60 = vrot.slane %v700_v56, 7  ;;  %v734_v61 = vrot.slane %v732_v58, 7  ;;  %v770_v40 = vsel %vm769_vm14, %v768_v16, %v3002_v57 }
 0x171   :  { %v679_v62 = vadd.f32 %v677_v59, %v2893_v3  ;;  %v704_v63 = vadd.f32 %v702_v60, %v2897_v6  ;;  %v736_v0 = vadd.f32 %v734_v61, %v2903_v10  ;;  %v727_v3 = vrot.slane %v725_v12, 7 }
 0x172   :  { %v772_v59 = vsel %vm771_vm1, %v770_v40, %v3025_v15 }
 0x173   :  { %v680_v1 = vadd.f32 %v679_v62, %v2908_v13  ;;  %v705_v2 = vadd.f32 %v704_v63, %v2913_v17  ;;  %v737_v5 = vadd.f32 %v736_v0, %v2917_v21  ;;  %v729_v13 = vadd.f32 %v727_v3, %v2922_v27 }
 0x174   :  { %v774_v57 = vsel %vm773_vm3, %v772_v59, %v3048_v37  ;;  %v3123_v62 = vstv %s2338_s6  ;;  %v3125_v63 = vstv %s2339_s7  ;;  %v3127_v0 = vstv %s2341_s8  ;;  %s2284_s7 = sshll.u32 %s3579_s4, 4  ;;  %s2285_s7 = int_to_ptr.hbm [resolvable:$true] %s2284_s7 }
 0x175   :  { %v2331_v9 = vmul.f32 -1.442695, %v680_v1  ;;  %v2332_v8 = vmul.f32 -1.442695, %v705_v2  ;;  %v2333_v11 = vmul.f32 -1.442695, %v737_v5  ;;  %v730_v21 = vadd.f32 %v729_v13, %v2926_v35 }
 0x176   :  { %v791_v5 = vstv %s3106_s5  ;;  %v794_v37 = vmul.f32 0.0, %v3123_v62  ;;  %v854_v12 = vmul.f32 0.0, %v3127_v0 }
 0x177   :  { %2521 = vpow2.f32 %v2331_v9  ;;  %v817_v9 = vstv %s2335_s9 }
 0x178   :  { %2523 = vpow2.f32 %v2332_v8  ;;  %v851_v8 = vstv %s2337_s10  ;;  %s2273_s10 = sshll.u32 %s3578_s3, 4  ;;  %s2274_s10 = int_to_ptr.hbm [resolvable:$true] %s2273_s10 }
 0x179   :  { %2525 = vpow2.f32 %v2333_v11  ;;  %v820_v11 = vmul.f32 0.0, %v3125_v63 }
 0x17d   :  { %v2522_v53 = vpop.eup %2521 }
 0x17e   :  { %v2524_v6 = vpop.eup %2523  ;;  %v684_v14 = vadd.f32 1.0, %v2522_v53 }
 0x17f   :  { %v2526_v10 = vpop.eup %2525  ;;  %v709_v18 = vadd.f32 1.0, %v2524_v6 }
 0x180   :  { %2527 = vrcp.f32 %v684_v14  ;;  %v3088_v17 = vadd.f32 1.0, %v2526_v10  ;;  %vm690_vm4 = vweird.f32 %v684_v14  ;;  %v696_v22 = vand.u32 2147483648, %v684_v14 }
 0x181   :  { %2529 = vrcp.f32 %v709_v18  ;;  %v694_v28 = vand.u32 2147483647, %v684_v14  ;;  %v721_v27 = vand.u32 2147483648, %v709_v18  ;;  %vm715_vm7 = vweird.f32 %v709_v18 }
 0x182   :  { %2531 = vrcp.f32 %v3088_v17  ;;  %v719_v30 = vand.u32 2147483647, %v709_v18  ;;  %v697_v4 = vor.u32 1.1754944e-38, %v696_v22  ;;  %vm747_vm15 = vweird.f32 %v3088_v17 }
 0x183   :  { %2533 = vtanh.f32 %v730_v21  ;;  %vm695_vm11 = vcmp.eq.f32.partialorder %v694_v28, 8.507059e+37  ;;  %v722_v42 = vor.u32 1.1754944e-38, %v721_v27  ;;  %v753_v50 = vand.u32 2147483648, %v3088_v17 }
 0x184   :  { %vm720_vm13 = vcmp.eq.f32.partialorder %v719_v30, 8.507059e+37  ;;  %v751_v54 = vand.u32 2147483647, %v3088_v17  ;;  %v3144_v10 = vstv %s2343_s12  ;;  %v843_v28 = vstv %s2336_s14 }
 0x185   :  { %v754_v58 = vor.u32 1.1754944e-38, %v753_v50  ;;  %v3154_v27 = vstv %s2340_s15 }
 0x186   :  { %v2528_v19 = vpop.eup %2527 }
 0x187   :  { %v2530_v26 = vpop.eup %2529  ;;  %v686_v20 = vmul.f32 %v2528_v19, %v684_v14  ;;  %vm691_vm6 = vweird.f32 %v2528_v19 }
 0x188   :  { %v711_v23 = vmul.f32 %v2530_v26, %v709_v18  ;;  %v2532_v29 = vpop.eup %2531  ;;  %vm716_vm8 = vweird.f32 %v2530_v26  ;;  %vm3094_vm9 = vmor %vm690_vm4, %vm691_vm6  ;;  %vm752_vm4 = vcmp.eq.f32.partialorder %v751_v54, 8.507059e+37  ;;  %vm775_vm6 = vcmask 1045504  }
 0x189   :  { %v687_v24 = vsub.f32 1.0, %v686_v20  ;;  %v743_v33 = vmul.f32 %v2532_v29, %v3088_v17  ;;  %v2534_v39 = vpop.eup %2533  ;;  %vm717_vm12 = vmor %vm715_vm7, %vm716_vm8  ;;  %vm748_vm0 = vweird.f32 %v2532_v29  ;;  %v776_v1 = vsel %vm775_vm6, %v774_v57, %v3071_v55 }
 0x18a   :  { %v712_v7 = vsub.f32 1.0, %v711_v23  ;;  %vm3113_vm2 = vmor %vm747_vm15, %vm748_vm0  ;;  %vm3580_vm7 = vcmask 1046528   ;;  %v3142_v55 = vstv %s2342_s11  ;;  %v3146_v18 = vstv %s2345_s13 }
 0x18b   :  { %v688_v35 = vmul.f32 %v2528_v19, %v687_v24  ;;  %v744_v25 = vsub.f32 1.0, %v743_v33 }
 0x18c   :  { %v713_v36 = vmul.f32 %v2530_v26, %v712_v7  ;;  %v846_v7 = vmul.f32 0.0, %v3154_v27 }
 0x18d   :  { %v689_v41 = vadd.f32 %v2528_v19, %v688_v35  ;;  %v745_v47 = vmul.f32 %v2532_v29, %v744_v25 }
 0x18e   :  { %v714_v43 = vadd.f32 %v2530_v26, %v713_v36 }
 0x18f   :  { %v693_v46 = vsel %vm3094_vm9, %v2528_v19, %v689_v41  ;;  %v746_v32 = vadd.f32 %v2532_v29, %v745_v47 }
 0x190   :  { %v698_v48 = vsel %vm695_vm11, %v697_v4, %v693_v46  ;;  %v718_v49 = vsel %vm717_vm12, %v2530_v26, %v714_v43 }
 0x191   :  { %v723_v31 = vsel %vm720_vm13, %v722_v42, %v718_v49  ;;  %v761_v51 = vmul.f32 %v2534_v39, %v698_v48  ;;  %v750_v60 = vsel %vm3113_vm2, %v2532_v29, %v746_v32 }
 0x192   :  { %v760_v52 = vmul.f32 %v758_v45, %v723_v31  ;;  %v755_v61 = vsel %vm752_vm4, %v754_v58, %v750_v60 }
 0x194   :  { %v762_v56 = vadd.f32 %v761_v51, %v760_v52 }
 0x196   :  { %2535 = vtanh.f32 %v762_v56 }
 0x19c   :  { %v2536_v15 = vpop.eup %2535 }
 0x19d   :  { %v764_v2 = vmul.f32 %v2536_v15, %v755_v61 }
 0x19f   :  { %v778_v3 = vsel %vm3580_vm7, %v776_v1, %v764_v2 }
 0x1a0   :  { %v3136_v53 = vmul.f32 %v791_v5, %v778_v3  ;;  %v3138_v6 = vmul.f32 %v817_v9, %v778_v3  ;;  %v3140_v14 = vmul.f32 %v851_v8, %v778_v3  ;;  %v3156_v29 = vmul.f32 %v843_v28, %v778_v3 }
 0x1a2   :  { %v795_v13 = vadd.f32 %v794_v37, %v3136_v53  ;;  %v821_v17 = vadd.f32 %v820_v11, %v3138_v6  ;;  %v855_v21 = vadd.f32 %v854_v12, %v3140_v14  ;;  %v847_v36 = vadd.f32 %v846_v7, %v3156_v29 }
 0x1a4   :  { %v797_v19 = vadd.f32 %v3142_v55, %v795_v13  ;;  %v823_v26 = vadd.f32 %v3144_v10, %v821_v17  ;;  %v857_v20 = vadd.f32 %v3146_v18, %v855_v21  ;;  %v849_v41 = vadd.f32 %v3160_v38, %v847_v36 }
 0x1a6   :  { %v2346_v22 = vmul.f32 -1.442695, %v797_v19  ;;  %v2347_v23 = vmul.f32 -1.442695, %v823_v26  ;;  %v2348_v24 = vmul.f32 -1.442695, %v857_v20 }
 0x1a8   :  { %2537 = vpow2.f32 %v2346_v22 }
 0x1a9   :  { %2539 = vpow2.f32 %v2347_v23 }
 0x1aa   :  { %2541 = vpow2.f32 %v2348_v24 }
 0x1ae   :  { %v2538_v30 = vpop.eup %2537 }
 0x1af   :  { %v2540_v35 = vpop.eup %2539  ;;  %v801_v33 = vadd.f32 1.0, %v2538_v30 }
 0x1b0   :  { %v2542_v34 = vpop.eup %2541  ;;  %v827_v4 = vadd.f32 1.0, %v2540_v35 }
 0x1b1   :  { %2543 = vrcp.f32 %v801_v33  ;;  %v861_v39 = vadd.f32 1.0, %v2542_v34  ;;  %vm807_vm8 = vweird.f32 %v801_v33  ;;  %v813_v45 = vand.u32 2147483648, %v801_v33 }
 0x1b2   :  { %2545 = vrcp.f32 %v827_v4  ;;  %v811_v48 = vand.u32 2147483647, %v801_v33  ;;  %v839_v49 = vand.u32 2147483648, %v827_v4  ;;  %vm833_vm11 = vweird.f32 %v827_v4 }
 0x1b3   :  { %2547 = vrcp.f32 %v861_v39  ;;  %v837_v51 = vand.u32 2147483647, %v827_v4  ;;  %v814_v32 = vor.u32 1.1754944e-38, %v813_v45  ;;  %vm867_vm4 = vweird.f32 %v861_v39 }
 0x1b4   :  { %2549 = vtanh.f32 %v849_v41  ;;  %vm812_vm15 = vcmp.eq.f32.partialorder %v811_v48, 8.507059e+37  ;;  %v840_v44 = vor.u32 1.1754944e-38, %v839_v49  ;;  %v873_v5 = vand.u32 2147483648, %v861_v39 }
 0x1b5   :  { %vm838_vm2 = vcmp.eq.f32.partialorder %v837_v51, 8.507059e+37  ;;  %v871_v37 = vand.u32 2147483647, %v861_v39 }
 0x1b6   :  { %v874_v12 = vor.u32 1.1754944e-38, %v873_v5 }
 0x1b7   :  { %v2544_v42 = vpop.eup %2543 }
 0x1b8   :  { %v2546_v25 = vpop.eup %2545  ;;  %v803_v43 = vmul.f32 %v2544_v42, %v801_v33  ;;  %vm808_vm9 = vweird.f32 %v2544_v42 }
 0x1b9   :  { %v829_v46 = vmul.f32 %v2546_v25, %v827_v4  ;;  %v2548_v16 = vpop.eup %2547  ;;  %vm834_vm12 = vweird.f32 %v2546_v25  ;;  %vm809_vm13 = vmor %vm807_vm8, %vm808_vm9  ;;  %vm872_vm9 = vcmp.eq.f32.partialorder %v871_v37, 8.507059e+37 }
 0x1ba   :  { %v804_v47 = vsub.f32 1.0, %v803_v43  ;;  %v863_v52 = vmul.f32 %v2548_v16, %v861_v39  ;;  %vm835_vm0 = vmor %vm833_vm11, %vm834_vm12  ;;  %v2550_v58 = vpop.eup %2549  ;;  %vm868_vm7 = vweird.f32 %v2548_v16 }
 0x1bb   :  { %v830_v31 = vsub.f32 1.0, %v829_v46  ;;  %vm869_vm8 = vmor %vm867_vm4, %vm868_vm7 }
 0x1bc   :  { %v805_v50 = vmul.f32 %v2544_v42, %v804_v47  ;;  %v864_v56 = vsub.f32 1.0, %v863_v52 }
 0x1bd   :  { %v831_v54 = vmul.f32 %v2546_v25, %v830_v31 }
 0x1be   :  { %v806_v40 = vadd.f32 %v2544_v42, %v805_v50  ;;  %v865_v57 = vmul.f32 %v2548_v16, %v864_v56 }
 0x1bf   :  { %v832_v59 = vadd.f32 %v2546_v25, %v831_v54 }
 0x1c0   :  { %v810_v60 = vsel %vm809_vm13, %v2544_v42, %v806_v40  ;;  %v866_v8 = vadd.f32 %v2548_v16, %v865_v57 }
 0x1c1   :  { %v815_v61 = vsel %vm812_vm15, %v814_v32, %v810_v60  ;;  %v836_v15 = vsel %vm835_vm0, %v2546_v25, %v832_v59 }
 0x1c2   :  { %v841_v1 = vsel %vm838_vm2, %v840_v44, %v836_v15  ;;  %v878_v2 = vmul.f32 %v2550_v58, %v815_v61  ;;  %v870_v3 = vsel %vm869_vm8, %v2548_v16, %v866_v8 }
 0x1c3   :  { %v877_v9 = vmul.f32 0.0, %v841_v1  ;;  %v875_v13 = vsel %vm872_vm9, %v874_v12, %v870_v3 }
 0x1c5   :  { %v3164_v11 = vadd.f32 %v878_v2, %v877_v9 }
 0x1c7   :  { %2551 = vtanh.f32 %v3164_v11  ;;  %v965_v37 = vrot.slane %v3164_v11, 7 }
 0x1cd   :  { %v2552_v17 = vpop.eup %2551 }
 0x1ce   :  { %v3167_v21 = vmul.f32 %v2552_v17, %v875_v13 }
 0x1d0   :  { %v882_v19 = vmul.f32 %v3167_v21, %v3123_v62  ;;  %v907_v26 = vmul.f32 %v3167_v21, %v3125_v63  ;;  %v939_v20 = vmul.f32 %v3167_v21, %v3127_v0  ;;  %v932_v41 = vmul.f32 %v3167_v21, %v3154_v27 }
 0x1d2   :  { %v884_v22 = vrot.slane %v882_v19, 7  ;;  %v909_v23 = vrot.slane %v907_v26, 7  ;;  %v941_v24 = vrot.slane %v939_v20, 7  ;;  %v934_v42 = vrot.slane %v932_v41, 7 }
 0x1d4   :  { %v886_v28 = vadd.f32 %v884_v22, %v3136_v53  ;;  %v911_v7 = vadd.f32 %v909_v23, %v3138_v6  ;;  %v943_v30 = vadd.f32 %v941_v24, %v3140_v14  ;;  %v936_v48 = vadd.f32 %v934_v42, %v3156_v29 }
 0x1d6   :  { %v887_v35 = vadd.f32 %v886_v28, %v3142_v55  ;;  %v912_v33 = vadd.f32 %v911_v7, %v3144_v10  ;;  %v944_v34 = vadd.f32 %v943_v30, %v3146_v18  ;;  %v937_v16 = vadd.f32 %v936_v48, %v3160_v38 }
 0x1d8   :  { %v2349_v4 = vmul.f32 -1.442695, %v887_v35  ;;  %v2350_v36 = vmul.f32 -1.442695, %v912_v33  ;;  %v2351_v39 = vmul.f32 -1.442695, %v944_v34 }
 0x1da   :  { %2553 = vpow2.f32 %v2349_v4 }
 0x1db   :  { %2555 = vpow2.f32 %v2350_v36 }
 0x1dc   :  { %2557 = vpow2.f32 %v2351_v39 }
 0x1e0   :  { %v2554_v25 = vpop.eup %2553 }
 0x1e1   :  { %v2556_v43 = vpop.eup %2555  ;;  %v891_v45 = vadd.f32 1.0, %v2554_v25 }
 0x1e2   :  { %v2558_v46 = vpop.eup %2557  ;;  %v916_v47 = vadd.f32 1.0, %v2556_v43 }
 0x1e3   :  { %2559 = vrcp.f32 %v891_v45  ;;  %v948_v49 = vadd.f32 1.0, %v2558_v46  ;;  %vm897_vm7 = vweird.f32 %v891_v45  ;;  %v903_v52 = vand.u32 2147483648, %v891_v45 }
 0x1e4   :  { %2561 = vrcp.f32 %v916_v47  ;;  %v901_v40 = vand.u32 2147483647, %v891_v45  ;;  %v928_v44 = vand.u32 2147483648, %v916_v47  ;;  %vm922_vm12 = vweird.f32 %v916_v47 }
 0x1e5   :  { %2563 = vrcp.f32 %v948_v49  ;;  %v926_v59 = vand.u32 2147483647, %v916_v47  ;;  %v904_v61 = vor.u32 1.1754944e-38, %v903_v52  ;;  %vm954_vm8 = vweird.f32 %v948_v49 }
 0x1e6   :  { %2565 = vtanh.f32 %v937_v16  ;;  %vm902_vm0 = vcmp.eq.f32.partialorder %v901_v40, 8.507059e+37  ;;  %v929_v2 = vor.u32 1.1754944e-38, %v928_v44  ;;  %v960_v20 = vand.u32 2147483648, %v948_v49 }
 0x1e7   :  { %vm927_vm4 = vcmp.eq.f32.partialorder %v926_v59, 8.507059e+37  ;;  %v958_v24 = vand.u32 2147483647, %v948_v49 }
 0x1e8   :  { %v961_v7 = vor.u32 1.1754944e-38, %v960_v20 }
 0x1e9   :  { %v2560_v31 = vpop.eup %2559 }
 0x1ea   :  { %v2562_v51 = vpop.eup %2561  ;;  %v893_v50 = vmul.f32 %v2560_v31, %v891_v45  ;;  %vm898_vm11 = vweird.f32 %v2560_v31 }
 0x1eb   :  { %v918_v32 = vmul.f32 %v2562_v51, %v916_v47  ;;  %v2564_v56 = vpop.eup %2563  ;;  %vm923_vm13 = vweird.f32 %v2562_v51  ;;  %vm899_vm15 = vmor %vm897_vm7, %vm898_vm11  ;;  %vm959_vm11 = vcmp.eq.f32.partialorder %v958_v24, 8.507059e+37 }
 0x1ec   :  { %v894_v54 = vsub.f32 1.0, %v893_v50  ;;  %v950_v57 = vmul.f32 %v2564_v56, %v948_v49  ;;  %vm924_vm2 = vmor %vm922_vm12, %vm923_vm13  ;;  %v2566_v9 = vpop.eup %2565  ;;  %vm955_vm9 = vweird.f32 %v2564_v56 }
 0x1ed   :  { %v919_v58 = vsub.f32 1.0, %v918_v32  ;;  %vm956_vm7 = vmor %vm954_vm8, %vm955_vm9 }
 0x1ee   :  { %v895_v60 = vmul.f32 %v2560_v31, %v894_v54  ;;  %v951_v5 = vsub.f32 1.0, %v950_v57 }
 0x1ef   :  { %v920_v15 = vmul.f32 %v2562_v51, %v919_v58 }
 0x1f0   :  { %v896_v1 = vadd.f32 %v2560_v31, %v895_v60  ;;  %v952_v3 = vmul.f32 %v2564_v56, %v951_v5 }
 0x1f1   :  { %v921_v8 = vadd.f32 %v2562_v51, %v920_v15 }
 0x1f2   :  { %v900_v12 = vsel %vm899_vm15, %v2560_v31, %v896_v1  ;;  %v953_v23 = vadd.f32 %v2564_v56, %v952_v3 }
 0x1f3   :  { %v905_v13 = vsel %vm902_vm0, %v904_v61, %v900_v12  ;;  %v925_v17 = vsel %vm924_vm2, %v2562_v51, %v921_v8 }
 0x1f4   :  { %v930_v19 = vsel %vm927_vm4, %v929_v2, %v925_v17  ;;  %v968_v26 = vmul.f32 %v2566_v9, %v905_v13  ;;  %v957_v30 = vsel %vm956_vm7, %v2564_v56, %v953_v23 }
 0x1f5   :  { %v967_v22 = vmul.f32 %v965_v37, %v930_v19  ;;  %v962_v11 = vsel %vm959_vm11, %v961_v7, %v957_v30 }
 0x1f7   :  { %v3187_v28 = vadd.f32 %v968_v26, %v967_v22 }
 0x1f9   :  { %2567 = vtanh.f32 %v3187_v28  ;;  %v1055_v7 = vrot.slane %v3187_v28, 7 }
 0x1ff   :  { %v2568_v35 = vpop.eup %2567 }
 0x200   :  { %v3190_v33 = vmul.f32 %v2568_v35, %v962_v11 }
 0x202   :  { %v972_v34 = vmul.f32 %v3190_v33, %v3123_v62  ;;  %v997_v4 = vmul.f32 %v3190_v33, %v3125_v63  ;;  %v1029_v36 = vmul.f32 %v3190_v33, %v3127_v0  ;;  %v1022_v51 = vmul.f32 %v3190_v33, %v3154_v27 }
 0x204   :  { %v974_v39 = vrot.slane %v972_v34, 7  ;;  %v999_v41 = vrot.slane %v997_v4, 7  ;;  %v1031_v42 = vrot.slane %v1029_v36, 7  ;;  %v1024_v50 = vrot.slane %v1022_v51, 7 }
 0x206   :  { %v976_v25 = vadd.f32 %v974_v39, %v3136_v53  ;;  %v1001_v43 = vadd.f32 %v999_v41, %v3138_v6  ;;  %v1033_v45 = vadd.f32 %v1031_v42, %v3140_v14  ;;  %v1026_v56 = vadd.f32 %v1024_v50, %v3156_v29 }
 0x208   :  { %v977_v46 = vadd.f32 %v976_v25, %v3142_v55  ;;  %v1002_v47 = vadd.f32 %v1001_v43, %v3144_v10  ;;  %v1034_v48 = vadd.f32 %v1033_v45, %v3146_v18  ;;  %v1027_v59 = vadd.f32 %v1026_v56, %v3160_v38 }
 0x20a   :  { %v2352_v49 = vmul.f32 -1.442695, %v977_v46  ;;  %v2353_v16 = vmul.f32 -1.442695, %v1002_v47  ;;  %v2354_v31 = vmul.f32 -1.442695, %v1034_v48 }
 0x20c   :  { %2569 = vpow2.f32 %v2352_v49 }
 0x20d   :  { %2571 = vpow2.f32 %v2353_v16 }
 0x20e   :  { %2573 = vpow2.f32 %v2354_v31 }
 0x212   :  { %v2570_v52 = vpop.eup %2569 }
 0x213   :  { %v2572_v32 = vpop.eup %2571  ;;  %v981_v54 = vadd.f32 1.0, %v2570_v52 }
 0x214   :  { %v2574_v40 = vpop.eup %2573  ;;  %v1006_v44 = vadd.f32 1.0, %v2572_v32 }
 0x215   :  { %2575 = vrcp.f32 %v981_v54  ;;  %v1038_v58 = vadd.f32 1.0, %v2574_v40  ;;  %vm987_vm12 = vweird.f32 %v981_v54  ;;  %v993_v15 = vand.u32 2147483648, %v981_v54 }
 0x216   :  { %2577 = vrcp.f32 %v1006_v44  ;;  %v991_v5 = vand.u32 2147483647, %v981_v54  ;;  %v1018_v9 = vand.u32 2147483648, %v1006_v44  ;;  %vm1012_vm15 = vweird.f32 %v1006_v44 }
 0x217   :  { %2579 = vrcp.f32 %v1038_v58  ;;  %v1016_v12 = vand.u32 2147483647, %v1006_v44  ;;  %v994_v17 = vor.u32 1.1754944e-38, %v993_v15  ;;  %vm1044_vm7 = vweird.f32 %v1038_v58 }
 0x218   :  { %2581 = vtanh.f32 %v1027_v59  ;;  %vm992_vm4 = vcmp.eq.f32.partialorder %v991_v5, 8.507059e+37  ;;  %v1019_v20 = vor.u32 1.1754944e-38, %v1018_v9  ;;  %v1050_v39 = vand.u32 2147483648, %v1038_v58 }
 0x219   :  { %vm1017_vm9 = vcmp.eq.f32.partialorder %v1016_v12, 8.507059e+37  ;;  %v1048_v25 = vand.u32 2147483647, %v1038_v58 }
 0x21a   :  { %v1051_v45 = vor.u32 1.1754944e-38, %v1050_v39 }
 0x21b   :  { %v2576_v60 = vpop.eup %2575 }
 0x21c   :  { %v2578_v57 = vpop.eup %2577  ;;  %v983_v61 = vmul.f32 %v2576_v60, %v981_v54  ;;  %vm988_vm13 = vweird.f32 %v2576_v60 }
 0x21d   :  { %v1008_v1 = vmul.f32 %v2578_v57, %v1006_v44  ;;  %v2580_v8 = vpop.eup %2579  ;;  %vm1013_vm0 = vweird.f32 %v2578_v57  ;;  %vm989_vm2 = vmor %vm987_vm12, %vm988_vm13  ;;  %vm1049_vm13 = vcmp.eq.f32.partialorder %v1048_v25, 8.507059e+37 }
 0x21e   :  { %v984_v2 = vsub.f32 1.0, %v983_v61  ;;  %v1040_v13 = vmul.f32 %v2580_v8, %v1038_v58  ;;  %vm1014_vm8 = vmor %vm1012_vm15, %vm1013_vm0  ;;  %v2582_v23 = vpop.eup %2581  ;;  %vm1045_vm11 = vweird.f32 %v2580_v8 }
 0x21f   :  { %v1009_v37 = vsub.f32 1.0, %v1008_v1  ;;  %vm1046_vm12 = vmor %vm1044_vm7, %vm1045_vm11 }
 0x220   :  { %v985_v3 = vmul.f32 %v2576_v60, %v984_v2  ;;  %v1041_v22 = vsub.f32 1.0, %v1040_v13 }
 0x221   :  { %v1010_v19 = vmul.f32 %v2578_v57, %v1009_v37 }
 0x222   :  { %v986_v26 = vadd.f32 %v2576_v60, %v985_v3  ;;  %v1042_v11 = vmul.f32 %v2580_v8, %v1041_v22 }
 0x223   :  { %v1011_v24 = vadd.f32 %v2578_v57, %v1010_v19 }
 0x224   :  { %v990_v30 = vsel %vm989_vm2, %v2576_v60, %v986_v26  ;;  %v1043_v42 = vadd.f32 %v2580_v8, %v1042_v11 }
 0x225   :  { %v995_v35 = vsel %vm992_vm4, %v994_v17, %v990_v30  ;;  %v1015_v34 = vsel %vm1014_vm8, %v2578_v57, %v1011_v24 }
 0x226   :  { %v1020_v4 = vsel %vm1017_vm9, %v1019_v20, %v1015_v34  ;;  %v1058_v36 = vmul.f32 %v2582_v23, %v995_v35  ;;  %v1047_v46 = vsel %vm1046_vm12, %v2580_v8, %v1043_v42 }
 0x227   :  { %v1057_v41 = vmul.f32 %v1055_v7, %v1020_v4  ;;  %v1052_v28 = vsel %vm1049_vm13, %v1051_v45, %v1047_v46 }
 0x229   :  { %v3210_v43 = vadd.f32 %v1058_v36, %v1057_v41 }
 0x22b   :  { %2583 = vtanh.f32 %v3210_v43  ;;  %v1145_v46 = vrot.slane %v3210_v43, 7 }
 0x231   :  { %v2584_v47 = vpop.eup %2583 }
 0x232   :  { %v3213_v48 = vmul.f32 %v2584_v47, %v1052_v28 }
 0x234   :  { %v1062_v49 = vmul.f32 %v3213_v48, %v3123_v62  ;;  %v1087_v16 = vmul.f32 %v3213_v48, %v3125_v63  ;;  %v1119_v31 = vmul.f32 %v3213_v48, %v3127_v0  ;;  %v1112_v61 = vmul.f32 %v3213_v48, %v3154_v27 }
 0x236   :  { %v1064_v51 = vrot.slane %v1062_v49, 7  ;;  %v1089_v50 = vrot.slane %v1087_v16, 7  ;;  %v1121_v52 = vrot.slane %v1119_v31, 7  ;;  %v1114_v15 = vrot.slane %v1112_v61, 7 }
 0x238   :  { %v1066_v32 = vadd.f32 %v1064_v51, %v3136_v53  ;;  %v1091_v54 = vadd.f32 %v1089_v50, %v3138_v6  ;;  %v1123_v40 = vadd.f32 %v1121_v52, %v3140_v14  ;;  %v1116_v37 = vadd.f32 %v1114_v15, %v3156_v29 }
 0x23a   :  { %v1067_v44 = vadd.f32 %v1066_v32, %v3142_v55  ;;  %v1092_v56 = vadd.f32 %v1091_v54, %v3144_v10  ;;  %v1124_v58 = vadd.f32 %v1123_v40, %v3146_v18  ;;  %v1117_v3 = vadd.f32 %v1116_v37, %v3160_v38 }
 0x23c   :  { %v2355_v59 = vmul.f32 -1.442695, %v1067_v44  ;;  %v2356_v60 = vmul.f32 -1.442695, %v1092_v56  ;;  %v2357_v57 = vmul.f32 -1.442695, %v1124_v58 }
 0x23e   :  { %2585 = vpow2.f32 %v2355_v59 }
 0x23f   :  { %2587 = vpow2.f32 %v2356_v60 }
 0x240   :  { %2589 = vpow2.f32 %v2357_v57 }
 0x244   :  { %v2586_v1 = vpop.eup %2585 }
 0x245   :  { %v2588_v2 = vpop.eup %2587  ;;  %v1071_v5 = vadd.f32 1.0, %v2586_v1 }
 0x246   :  { %v2590_v9 = vpop.eup %2589  ;;  %v1096_v8 = vadd.f32 1.0, %v2588_v2 }
 0x247   :  { %2591 = vrcp.f32 %v1071_v5  ;;  %v1128_v12 = vadd.f32 1.0, %v2590_v9  ;;  %vm1077_vm15 = vweird.f32 %v1071_v5  ;;  %v1083_v26 = vand.u32 2147483648, %v1071_v5 }
 0x248   :  { %2593 = vrcp.f32 %v1096_v8  ;;  %v1081_v23 = vand.u32 2147483647, %v1071_v5  ;;  %v1108_v24 = vand.u32 2147483648, %v1096_v8  ;;  %vm1102_vm2 = vweird.f32 %v1096_v8 }
 0x249   :  { %2595 = vrcp.f32 %v1128_v12  ;;  %v1106_v11 = vand.u32 2147483647, %v1096_v8  ;;  %v1084_v4 = vor.u32 1.1754944e-38, %v1083_v26  ;;  %vm1134_vm12 = vweird.f32 %v1128_v12 }
 0x24a   :  { %2597 = vtanh.f32 %v1117_v3  ;;  %vm1082_vm9 = vcmp.eq.f32.partialorder %v1081_v23, 8.507059e+37  ;;  %v1109_v41 = vor.u32 1.1754944e-38, %v1108_v24  ;;  %v1140_v50 = vand.u32 2147483648, %v1128_v12 }
 0x24b   :  { %vm1107_vm11 = vcmp.eq.f32.partialorder %v1106_v11, 8.507059e+37  ;;  %v1138_v54 = vand.u32 2147483647, %v1128_v12 }
 0x24c   :  { %v1141_v44 = vor.u32 1.1754944e-38, %v1140_v50 }
 0x24d   :  { %v2592_v13 = vpop.eup %2591 }
 0x24e   :  { %v2594_v17 = vpop.eup %2593  ;;  %v1073_v19 = vmul.f32 %v2592_v13, %v1071_v5  ;;  %vm1078_vm0 = vweird.f32 %v2592_v13 }
 0x24f   :  { %v1098_v20 = vmul.f32 %v2594_v17, %v1096_v8  ;;  %v2596_v7 = vpop.eup %2595  ;;  %vm1103_vm4 = vweird.f32 %v2594_v17  ;;  %vm1079_vm8 = vmor %vm1077_vm15, %vm1078_vm0  ;;  %vm1139_vm0 = vcmp.eq.f32.partialorder %v1138_v54, 8.507059e+37 }
 0x250   :  { %v1074_v22 = vsub.f32 1.0, %v1073_v19  ;;  %v1130_v34 = vmul.f32 %v2596_v7, %v1128_v12  ;;  %vm1104_vm7 = vmor %vm1102_vm2, %vm1103_vm4  ;;  %v2598_v25 = vpop.eup %2597  ;;  %vm1135_vm13 = vweird.f32 %v2596_v7 }
 0x251   :  { %v1099_v30 = vsub.f32 1.0, %v1098_v20  ;;  %vm1136_vm15 = vmor %vm1134_vm12, %vm1135_vm13 }
 0x252   :  { %v1075_v35 = vmul.f32 %v2592_v13, %v1074_v22  ;;  %v1131_v42 = vsub.f32 1.0, %v1130_v34 }
 0x253   :  { %v1100_v36 = vmul.f32 %v2594_v17, %v1099_v30 }
 0x254   :  { %v1076_v39 = vadd.f32 %v2592_v13, %v1075_v35  ;;  %v1132_v47 = vmul.f32 %v2596_v7, %v1131_v42 }
 0x255   :  { %v1101_v45 = vadd.f32 %v2594_v17, %v1100_v36 }
 0x256   :  { %v1080_v28 = vsel %vm1079_vm8, %v2592_v13, %v1076_v39  ;;  %v1133_v32 = vadd.f32 %v2596_v7, %v1132_v47 }
 0x257   :  { %v1085_v49 = vsel %vm1082_vm9, %v1084_v4, %v1080_v28  ;;  %v1105_v16 = vsel %vm1104_vm7, %v2594_v17, %v1101_v45 }
 0x258   :  { %v1110_v31 = vsel %vm1107_vm11, %v1109_v41, %v1105_v16  ;;  %v1148_v51 = vmul.f32 %v2598_v25, %v1085_v49  ;;  %v1137_v56 = vsel %vm1136_vm15, %v2596_v7, %v1133_v32 }
 0x259   :  { %v1147_v52 = vmul.f32 %v1145_v46, %v1110_v31  ;;  %v1142_v43 = vsel %vm1139_vm0, %v1141_v44, %v1137_v56 }
 0x25b   :  { %v3233_v40 = vadd.f32 %v1148_v51, %v1147_v52 }
 0x25d   :  { %2599 = vtanh.f32 %v3233_v40 }
 0x263   :  { %v2600_v58 = vpop.eup %2599 }
 0x264   :  { %v3236_v59 = vmul.f32 %v2600_v58, %v1142_v43  ;;  %v1235_v43 = vrot.slane %v3233_v40, 7 }
 0x266   :  { %v1152_v60 = vmul.f32 %v3236_v59, %v3123_v62  ;;  %v1177_v57 = vmul.f32 %v3236_v59, %v3125_v63  ;;  %v1209_v61 = vmul.f32 %v3236_v59, %v3127_v0  ;;  %v1202_v26 = vmul.f32 %v3236_v59, %v3154_v27 }
 0x268   :  { %v1154_v15 = vrot.slane %v1152_v60, 7  ;;  %v1179_v1 = vrot.slane %v1177_v57, 7  ;;  %v1211_v2 = vrot.slane %v1209_v61, 7  ;;  %v1204_v20 = vrot.slane %v1202_v26, 7 }
 0x26a   :  { %v1156_v5 = vadd.f32 %v1154_v15, %v3136_v53  ;;  %v1181_v9 = vadd.f32 %v1179_v1, %v3138_v6  ;;  %v1213_v8 = vadd.f32 %v1211_v2, %v3140_v14  ;;  %v1206_v11 = vadd.f32 %v1204_v20, %v3156_v29 }
 0x26c   :  { %v1157_v37 = vadd.f32 %v1156_v5, %v3142_v55  ;;  %v1182_v12 = vadd.f32 %v1181_v9, %v3144_v10  ;;  %v1214_v3 = vadd.f32 %v1213_v8, %v3146_v18  ;;  %v1207_v34 = vadd.f32 %v1206_v11, %v3160_v38 }
 0x26e   :  { %v2358_v13 = vmul.f32 -1.442695, %v1157_v37  ;;  %v2359_v17 = vmul.f32 -1.442695, %v1182_v12  ;;  %v2360_v19 = vmul.f32 -1.442695, %v1214_v3 }
 0x270   :  { %2601 = vpow2.f32 %v2358_v13 }
 0x271   :  { %2603 = vpow2.f32 %v2359_v17 }
 0x272   :  { %2605 = vpow2.f32 %v2360_v19 }
 0x276   :  { %v2602_v22 = vpop.eup %2601 }
 0x277   :  { %v2604_v23 = vpop.eup %2603  ;;  %v1161_v24 = vadd.f32 1.0, %v2602_v22 }
 0x278   :  { %v2606_v7 = vpop.eup %2605  ;;  %v1186_v30 = vadd.f32 1.0, %v2604_v23 }
 0x279   :  { %2607 = vrcp.f32 %v1161_v24  ;;  %v1218_v35 = vadd.f32 1.0, %v2606_v7  ;;  %vm1167_vm2 = vweird.f32 %v1161_v24  ;;  %v1173_v41 = vand.u32 2147483648, %v1161_v24 }
 0x27a   :  { %2609 = vrcp.f32 %v1186_v30  ;;  %v1171_v45 = vand.u32 2147483647, %v1161_v24  ;;  %v1198_v46 = vand.u32 2147483648, %v1186_v30  ;;  %vm1192_vm8 = vweird.f32 %v1186_v30 }
 0x27b   :  { %2611 = vrcp.f32 %v1218_v35  ;;  %v1196_v49 = vand.u32 2147483647, %v1186_v30  ;;  %v1174_v51 = vor.u32 1.1754944e-38, %v1173_v41  ;;  %vm1224_vm15 = vweird.f32 %v1218_v35 }
 0x27c   :  { %2613 = vtanh.f32 %v1207_v34  ;;  %vm1172_vm11 = vcmp.eq.f32.partialorder %v1171_v45, 8.507059e+37  ;;  %v1199_v32 = vor.u32 1.1754944e-38, %v1198_v46  ;;  %v1230_v2 = vand.u32 2147483648, %v1218_v35 }
 0x27d   :  { %vm1197_vm13 = vcmp.eq.f32.partialorder %v1196_v49, 8.507059e+37  ;;  %v1228_v8 = vand.u32 2147483647, %v1218_v35 }
 0x27e   :  { %v1231_v12 = vor.u32 1.1754944e-38, %v1230_v2 }
 0x27f   :  { %v2608_v4 = vpop.eup %2607 }
 0x280   :  { %v2610_v36 = vpop.eup %2609  ;;  %v1163_v39 = vmul.f32 %v2608_v4, %v1161_v24  ;;  %vm1168_vm4 = vweird.f32 %v2608_v4 }
 0x281   :  { %v1188_v42 = vmul.f32 %v2610_v36, %v1186_v30  ;;  %v2612_v28 = vpop.eup %2611  ;;  %vm1193_vm9 = vweird.f32 %v2610_v36  ;;  %vm1169_vm7 = vmor %vm1167_vm2, %vm1168_vm4  ;;  %vm1229_vm4 = vcmp.eq.f32.partialorder %v1228_v8, 8.507059e+37 }
 0x282   :  { %v1164_v25 = vsub.f32 1.0, %v1163_v39  ;;  %v1220_v31 = vmul.f32 %v2612_v28, %v1218_v35  ;;  %vm1194_vm12 = vmor %vm1192_vm8, %vm1193_vm9  ;;  %v2614_v44 = vpop.eup %2613  ;;  %vm1225_vm0 = vweird.f32 %v2612_v28 }
 0x283   :  { %v1189_v47 = vsub.f32 1.0, %v1188_v42  ;;  %vm1226_vm2 = vmor %vm1224_vm15, %vm1225_vm0 }
 0x284   :  { %v1165_v16 = vmul.f32 %v2608_v4, %v1164_v25  ;;  %v1221_v54 = vsub.f32 1.0, %v1220_v31 }
 0x285   :  { %v1190_v50 = vmul.f32 %v2610_v36, %v1189_v47 }
 0x286   :  { %v1166_v52 = vadd.f32 %v2608_v4, %v1165_v16  ;;  %v1222_v60 = vmul.f32 %v2612_v28, %v1221_v54 }
 0x287   :  { %v1191_v56 = vadd.f32 %v2610_v36, %v1190_v50 }
 0x288   :  { %v1170_v58 = vsel %vm1169_vm7, %v2608_v4, %v1166_v52  ;;  %v1223_v9 = vadd.f32 %v2612_v28, %v1222_v60 }
 0x289   :  { %v1175_v57 = vsel %vm1172_vm11, %v1174_v51, %v1170_v58  ;;  %v1195_v61 = vsel %vm1194_vm12, %v2610_v36, %v1191_v56 }
 0x28a   :  { %v1200_v15 = vsel %vm1197_vm13, %v1199_v32, %v1195_v61  ;;  %v1238_v1 = vmul.f32 %v2614_v44, %v1175_v57  ;;  %v1227_v3 = vsel %vm1226_vm2, %v2612_v28, %v1223_v9 }
 0x28b   :  { %v1237_v5 = vmul.f32 %v1235_v43, %v1200_v15  ;;  %v1232_v40 = vsel %vm1229_vm4, %v1231_v12, %v1227_v3 }
 0x28d   :  { %v3256_v37 = vadd.f32 %v1238_v1, %v1237_v5 }
 0x28f   :  { %2615 = vtanh.f32 %v3256_v37 }
 0x295   :  { %v2616_v13 = vpop.eup %2615 }
 0x296   :  { %v3259_v17 = vmul.f32 %v2616_v13, %v1232_v40  ;;  %v1325_v13 = vrot.slane %v3256_v37, 7 }
 0x298   :  { %v1242_v19 = vmul.f32 %v3259_v17, %v3123_v62  ;;  %v1267_v26 = vmul.f32 %v3259_v17, %v3125_v63  ;;  %v1299_v20 = vmul.f32 %v3259_v17, %v3127_v0  ;;  %v1292_v42 = vmul.f32 %v3259_v17, %v3154_v27 }
 0x29a   :  { %v1244_v22 = vrot.slane %v1242_v19, 7  ;;  %v1269_v23 = vrot.slane %v1267_v26, 7  ;;  %v1301_v24 = vrot.slane %v1299_v20, 7  ;;  %v1294_v25 = vrot.slane %v1292_v42, 7 }
 0x29c   :  { %v1246_v7 = vadd.f32 %v1244_v22, %v3136_v53  ;;  %v1271_v30 = vadd.f32 %v1269_v23, %v3138_v6  ;;  %v1303_v11 = vadd.f32 %v1301_v24, %v3140_v14  ;;  %v1296_v16 = vadd.f32 %v1294_v25, %v3156_v29 }
 0x29e   :  { %v1247_v35 = vadd.f32 %v1246_v7, %v3142_v55  ;;  %v1272_v34 = vadd.f32 %v1271_v30, %v3144_v10  ;;  %v1304_v4 = vadd.f32 %v1303_v11, %v3146_v18  ;;  %v1297_v51 = vadd.f32 %v1296_v16, %v3160_v38 }
 0x2a0   :  { %v2361_v36 = vmul.f32 -1.442695, %v1247_v35  ;;  %v2362_v39 = vmul.f32 -1.442695, %v1272_v34  ;;  %v2363_v41 = vmul.f32 -1.442695, %v1304_v4 }
 0x2a2   :  { %2617 = vpow2.f32 %v2361_v36 }
 0x2a3   :  { %2619 = vpow2.f32 %v2362_v39 }
 0x2a4   :  { %2621 = vpow2.f32 %v2363_v41 }
 0x2a8   :  { %v2618_v45 = vpop.eup %2617 }
 0x2a9   :  { %v2620_v46 = vpop.eup %2619  ;;  %v1251_v28 = vadd.f32 1.0, %v2618_v45 }
 0x2aa   :  { %v2622_v47 = vpop.eup %2621  ;;  %v1276_v49 = vadd.f32 1.0, %v2620_v46 }
 0x2ab   :  { %2623 = vrcp.f32 %v1251_v28  ;;  %v1308_v31 = vadd.f32 1.0, %v2622_v47  ;;  %vm1257_vm8 = vweird.f32 %v1251_v28  ;;  %v1263_v54 = vand.u32 2147483648, %v1251_v28 }
 0x2ac   :  { %2625 = vrcp.f32 %v1276_v49  ;;  %v1261_v43 = vand.u32 2147483647, %v1251_v28  ;;  %v1288_v58 = vand.u32 2147483648, %v1276_v49  ;;  %vm1282_vm7 = vweird.f32 %v1276_v49 }
 0x2ad   :  { %2627 = vrcp.f32 %v1308_v31  ;;  %v1286_v61 = vand.u32 2147483647, %v1276_v49  ;;  %v1264_v2 = vor.u32 1.1754944e-38, %v1263_v54  ;;  %vm1314_vm2 = vweird.f32 %v1308_v31 }
 0x2ae   :  { %2629 = vtanh.f32 %v1297_v51  ;;  %vm1262_vm13 = vcmp.eq.f32.partialorder %v1261_v43, 8.507059e+37  ;;  %v1289_v8 = vor.u32 1.1754944e-38, %v1288_v58  ;;  %v1320_v7 = vand.u32 2147483648, %v1308_v31 }
 0x2af   :  { %vm1287_vm0 = vcmp.eq.f32.partialorder %v1286_v61, 8.507059e+37  ;;  %v1318_v35 = vand.u32 2147483647, %v1308_v31 }
 0x2b0   :  { %v1321_v4 = vor.u32 1.1754944e-38, %v1320_v7 }
 0x2b1   :  { %v2624_v50 = vpop.eup %2623 }
 0x2b2   :  { %v2626_v52 = vpop.eup %2625  ;;  %v1253_v32 = vmul.f32 %v2624_v50, %v1251_v28  ;;  %vm1258_vm9 = vweird.f32 %v2624_v50 }
 0x2b3   :  { %v1278_v44 = vmul.f32 %v2626_v52, %v1276_v49  ;;  %v2628_v60 = vpop.eup %2627  ;;  %vm1283_vm11 = vweird.f32 %v2626_v52  ;;  %vm1259_vm12 = vmor %vm1257_vm8, %vm1258_vm9  ;;  %vm1319_vm9 = vcmp.eq.f32.partialorder %v1318_v35, 8.507059e+37 }
 0x2b4   :  { %v1254_v56 = vsub.f32 1.0, %v1253_v32  ;;  %v1310_v1 = vmul.f32 %v2628_v60, %v1308_v31  ;;  %vm1284_vm15 = vmor %vm1282_vm7, %vm1283_vm11  ;;  %v2630_v3 = vpop.eup %2629  ;;  %vm1315_vm4 = vweird.f32 %v2628_v60 }
 0x2b5   :  { %v1279_v57 = vsub.f32 1.0, %v1278_v44  ;;  %vm1316_vm8 = vmor %vm1314_vm2, %vm1315_vm4 }
 0x2b6   :  { %v1255_v15 = vmul.f32 %v2624_v50, %v1254_v56  ;;  %v1311_v12 = vsub.f32 1.0, %v1310_v1 }
 0x2b7   :  { %v1280_v5 = vmul.f32 %v2626_v52, %v1279_v57 }
 0x2b8   :  { %v1256_v9 = vadd.f32 %v2624_v50, %v1255_v15  ;;  %v1312_v26 = vmul.f32 %v2628_v60, %v1311_v12 }
 0x2b9   :  { %v1281_v40 = vadd.f32 %v2626_v52, %v1280_v5 }
 0x2ba   :  { %v1260_v19 = vsel %vm1259_vm12, %v2624_v50, %v1256_v9  ;;  %v1313_v11 = vadd.f32 %v2628_v60, %v1312_v26 }
 0x2bb   :  { %v1265_v20 = vsel %vm1262_vm13, %v1264_v2, %v1260_v19  ;;  %v1285_v22 = vsel %vm1284_vm15, %v2626_v52, %v1281_v40 }
 0x2bc   :  { %v1290_v23 = vsel %vm1287_vm0, %v1289_v8, %v1285_v22  ;;  %v1328_v24 = vmul.f32 %v2630_v3, %v1265_v20  ;;  %v1317_v36 = vsel %vm1316_vm8, %v2628_v60, %v1313_v11 }
 0x2bd   :  { %v1327_v30 = vmul.f32 %v1325_v13, %v1290_v23  ;;  %v1322_v37 = vsel %vm1319_vm9, %v1321_v4, %v1317_v36 }
 0x2bf   :  { %v3279_v34 = vadd.f32 %v1328_v24, %v1327_v30 }
 0x2c1   :  { %2631 = vtanh.f32 %v3279_v34 }
 0x2c7   :  { %v2632_v39 = vpop.eup %2631 }
 0x2c8   :  { %v3282_v41 = vmul.f32 %v2632_v39, %v1322_v37 }
 0x2ca   :  { %v1332_v42 = vmul.f32 %v3282_v41, %v3123_v62  ;;  %v1357_v25 = vmul.f32 %v3282_v41, %v3125_v63  ;;  %v1389_v45 = vmul.f32 %v3282_v41, %v3127_v0  ;;  %v1382_v56 = vmul.f32 %v3282_v41, %v3154_v27 }
 0x2cc   :  { %v1334_v46 = vrot.slane %v1332_v42, 7  ;;  %v1359_v28 = vrot.slane %v1357_v25, 7  ;;  %v1391_v47 = vrot.slane %v1389_v45, 7  ;;  %v1384_v43 = vrot.slane %v1382_v56, 7 }
 0x2cd   :  { %v1415_v42 = vrot.slane %v3279_v34, 7 }
 0x2ce   :  { %v1336_v49 = vadd.f32 %v1334_v46, %v3136_v53  ;;  %v1361_v16 = vadd.f32 %v1359_v28, %v3138_v6  ;;  %v1393_v31 = vadd.f32 %v1391_v47, %v3140_v14  ;;  %v1386_v1 = vadd.f32 %v1384_v43, %v3156_v29 }
 0x2d0   :  { %v1337_v51 = vadd.f32 %v1336_v49, %v3142_v55  ;;  %v1362_v50 = vadd.f32 %v1361_v16, %v3144_v10  ;;  %v1394_v52 = vadd.f32 %v1393_v31, %v3146_v18  ;;  %v1387_v5 = vadd.f32 %v1386_v1, %v3160_v38 }
 0x2d2   :  { %v2364_v32 = vmul.f32 -1.442695, %v1337_v51  ;;  %v2365_v54 = vmul.f32 -1.442695, %v1362_v50  ;;  %v2366_v44 = vmul.f32 -1.442695, %v1394_v52 }
 0x2d4   :  { %2633 = vpow2.f32 %v2364_v32 }
 0x2d5   :  { %2635 = vpow2.f32 %v2365_v54 }
 0x2d6   :  { %2637 = vpow2.f32 %v2366_v44 }
 0x2da   :  { %v2634_v58 = vpop.eup %2633 }
 0x2db   :  { %v2636_v60 = vpop.eup %2635  ;;  %v1341_v57 = vadd.f32 1.0, %v2634_v58 }
 0x2dc   :  { %v2638_v61 = vpop.eup %2637  ;;  %v1366_v15 = vadd.f32 1.0, %v2636_v60 }
 0x2dd   :  { %2639 = vrcp.f32 %v1341_v57  ;;  %v1398_v2 = vadd.f32 1.0, %v2638_v61  ;;  %vm1347_vm7 = vweird.f32 %v1341_v57  ;;  %v1353_v3 = vand.u32 2147483648, %v1341_v57 }
 0x2de   :  { %2641 = vrcp.f32 %v1366_v15  ;;  %v1351_v19 = vand.u32 2147483647, %v1341_v57  ;;  %v1378_v26 = vand.u32 2147483648, %v1366_v15  ;;  %vm1372_vm12 = vweird.f32 %v1366_v15 }
 0x2df   :  { %2643 = vrcp.f32 %v1398_v2  ;;  %v1376_v23 = vand.u32 2147483647, %v1366_v15  ;;  %v1354_v30 = vor.u32 1.1754944e-38, %v1353_v3  ;;  %vm1404_vm8 = vweird.f32 %v1398_v2 }
 0x2e0   :  { %2645 = vtanh.f32 %v1387_v5  ;;  %vm1352_vm0 = vcmp.eq.f32.partialorder %v1351_v19, 8.507059e+37  ;;  %v1379_v4 = vor.u32 1.1754944e-38, %v1378_v26  ;;  %v1410_v16 = vand.u32 2147483648, %v1398_v2 }
 0x2e1   :  { %vm1377_vm4 = vcmp.eq.f32.partialorder %v1376_v23, 8.507059e+37  ;;  %v1408_v50 = vand.u32 2147483647, %v1398_v2 }
 0x2e2   :  { %v1411_v32 = vor.u32 1.1754944e-38, %v1410_v16 }
 0x2e3   :  { %v2640_v9 = vpop.eup %2639 }
 0x2e4   :  { %v2642_v8 = vpop.eup %2641  ;;  %v1343_v12 = vmul.f32 %v2640_v9, %v1341_v57  ;;  %vm1348_vm11 = vweird.f32 %v2640_v9 }
 0x2e5   :  { %v1368_v40 = vmul.f32 %v2642_v8, %v1366_v15  ;;  %v2644_v20 = vpop.eup %2643  ;;  %vm1373_vm13 = vweird.f32 %v2642_v8  ;;  %vm1349_vm15 = vmor %vm1347_vm7, %vm1348_vm11  ;;  %vm1409_vm11 = vcmp.eq.f32.partialorder %v1408_v50, 8.507059e+37 }
 0x2e6   :  { %v1344_v13 = vsub.f32 1.0, %v1343_v12  ;;  %v1400_v7 = vmul.f32 %v2644_v20, %v1398_v2  ;;  %vm1374_vm2 = vmor %vm1372_vm12, %vm1373_vm13  ;;  %v2646_v37 = vpop.eup %2645  ;;  %vm1405_vm9 = vweird.f32 %v2644_v20 }
 0x2e7   :  { %v1369_v22 = vsub.f32 1.0, %v1368_v40  ;;  %vm1406_vm7 = vmor %vm1404_vm8, %vm1405_vm9 }
 0x2e8   :  { %v1345_v24 = vmul.f32 %v2640_v9, %v1344_v13  ;;  %v1401_v36 = vsub.f32 1.0, %v1400_v7 }
 0x2e9   :  { %v1370_v11 = vmul.f32 %v2642_v8, %v1369_v22 }
 0x2ea   :  { %v1346_v35 = vadd.f32 %v2640_v9, %v1345_v24  ;;  %v1402_v45 = vmul.f32 %v2644_v20, %v1401_v36 }
 0x2eb   :  { %v1371_v39 = vadd.f32 %v2642_v8, %v1370_v11 }
 0x2ec   :  { %v1350_v25 = vsel %vm1349_vm15, %v2640_v9, %v1346_v35  ;;  %v1403_v51 = vadd.f32 %v2644_v20, %v1402_v45 }
 0x2ed   :  { %v1355_v46 = vsel %vm1352_vm0, %v1354_v30, %v1350_v25  ;;  %v1375_v28 = vsel %vm1374_vm2, %v2642_v8, %v1371_v39 }
 0x2ee   :  { %v1380_v47 = vsel %vm1377_vm4, %v1379_v4, %v1375_v28  ;;  %v1418_v49 = vmul.f32 %v2646_v37, %v1355_v46  ;;  %v1407_v54 = vsel %vm1406_vm7, %v2644_v20, %v1403_v51 }
 0x2ef   :  { %v1417_v31 = vmul.f32 %v1415_v42, %v1380_v47  ;;  %v1412_v34 = vsel %vm1409_vm11, %v1411_v32, %v1407_v54  ;;  %v1512_v42 = vsel %vm765_vm5, %v3167_v21, %v3190_v33 }
 0x2f0   :  { %v1513_v32 = vsel %vm767_vm10, %v1512_v42, %v3213_v48 }
 0x2f1   :  { %v3302_v52 = vadd.f32 %v1418_v49, %v1417_v31 }
 0x2f3   :  { %2647 = vtanh.f32 %v3302_v52  ;;  %v1505_v49 = vrot.slane %v3302_v52, 7 }
 0x2f9   :  { %v2648_v44 = vpop.eup %2647 }
 0x2fa   :  { %v3305_v56 = vmul.f32 %v2648_v44, %v1412_v34 }
 0x2fc   :  { %v1422_v43 = vmul.f32 %v3305_v56, %v3123_v62  ;;  %v1447_v58 = vmul.f32 %v3305_v56, %v3125_v63  ;;  %v1479_v60 = vmul.f32 %v3305_v56, %v3127_v0  ;;  %v1472_v0 = vmul.f32 %v3305_v56, %v3154_v27 }
 0x2fe   :  { %v1424_v57 = vrot.slane %v1422_v43, 7  ;;  %v1449_v61 = vrot.slane %v1447_v58, 7  ;;  %v1481_v15 = vrot.slane %v1479_v60, 7  ;;  %v1514_v43 = vsel %vm769_vm14, %v1513_v32, %v3236_v59 }
 0x2ff   :  { %v1515_v60 = vsel %vm771_vm1, %v1514_v43, %v3259_v17 }
 0x300   :  { %v1426_v1 = vadd.f32 %v1424_v57, %v3136_v53  ;;  %v1451_v2 = vadd.f32 %v1449_v61, %v3138_v6  ;;  %v1483_v5 = vadd.f32 %v1481_v15, %v3140_v14  ;;  %v1474_v53 = vrot.slane %v1472_v0, 7 }
 0x301   :  { %v1516_v61 = vsel %vm773_vm3, %v1515_v60, %v3282_v41  ;;  %v3344_v15 = vstv %s2374_s18 }
 0x302   :  { %v1427_v9 = vadd.f32 %v1426_v1, %v3142_v55  ;;  %v1452_v8 = vadd.f32 %v1451_v2, %v3144_v10  ;;  %v1484_v62 = vadd.f32 %v1483_v5, %v3146_v18  ;;  %v1476_v55 = vadd.f32 %v1474_v53, %v3156_v29 }
 0x303   :  { %v3346_v1 = vstv %s2375_s19  ;;  %v3348_v2 = vstv %s2377_s20 }
 0x304   :  { %v2367_v12 = vmul.f32 -1.442695, %v1427_v9  ;;  %v2368_v63 = vmul.f32 -1.442695, %v1452_v8  ;;  %v2369_v3 = vmul.f32 -1.442695, %v1484_v62  ;;  %v1477_v18 = vadd.f32 %v1476_v55, %v3160_v38 }
 0x305   :  { %v1517_v9 = vsel %vm775_vm6, %v1516_v61, %v3305_v56  ;;  %v1531_v8 = vstv %s3336_s17  ;;  %v1557_v62 = vstv %s2371_s21  ;;  %v1560_v41 = vmul.f32 0.0, %v3346_v1 }
 0x306   :  { %2649 = vpow2.f32 %v2367_v12  ;;  %v1591_v12 = vstv %s2373_s22  ;;  %v3363_v56 = vstv %s2378_s23 }
 0x307   :  { %2651 = vpow2.f32 %v2368_v63  ;;  %v1534_v63 = vmul.f32 0.0, %v3344_v15 }
 0x308   :  { %2653 = vpow2.f32 %v2369_v3  ;;  %v1594_v3 = vmul.f32 0.0, %v3348_v2 }
 0x30c   :  { %v2650_v40 = vpop.eup %2649 }
 0x30d   :  { %v2652_v6 = vpop.eup %2651  ;;  %v1431_v13 = vadd.f32 1.0, %v2650_v40 }
 0x30e   :  { %v2654_v14 = vpop.eup %2653  ;;  %v1456_v19 = vadd.f32 1.0, %v2652_v6 }
 0x30f   :  { %2655 = vrcp.f32 %v1431_v13  ;;  %v1488_v10 = vadd.f32 1.0, %v2654_v14  ;;  %vm1437_vm12 = vweird.f32 %v1431_v13  ;;  %v1443_v27 = vand.u32 2147483648, %v1431_v13 }
 0x310   :  { %2657 = vrcp.f32 %v1456_v19  ;;  %v1441_v7 = vand.u32 2147483647, %v1431_v13  ;;  %v1468_v30 = vand.u32 2147483648, %v1456_v19  ;;  %vm1462_vm15 = vweird.f32 %v1456_v19 }
 0x311   :  { %2659 = vrcp.f32 %v1488_v10  ;;  %v1466_v29 = vand.u32 2147483647, %v1456_v19  ;;  %v1444_v37 = vor.u32 1.1754944e-38, %v1443_v27  ;;  %vm1494_vm7 = vweird.f32 %v1488_v10 }
 0x312   :  { %2661 = vtanh.f32 %v1477_v18  ;;  %vm1442_vm4 = vcmp.eq.f32.partialorder %v1441_v7, 8.507059e+37  ;;  %v1469_v45 = vor.u32 1.1754944e-38, %v1468_v30  ;;  %v1500_v54 = vand.u32 2147483648, %v1488_v10 }
 0x313   :  { %vm1467_vm9 = vcmp.eq.f32.partialorder %v1466_v29, 8.507059e+37  ;;  %v1498_v44 = vand.u32 2147483647, %v1488_v10  ;;  %v3367_v14 = vstv %s2381_s25  ;;  %v3375_v7 = vstv %s2376_s27 }
 0x314   :  { %v1501_v48 = vor.u32 1.1754944e-38, %v1500_v54 }
 0x315   :  { %v2656_v26 = vpop.eup %2655 }
 0x316   :  { %v2658_v20 = vpop.eup %2657  ;;  %v1433_v22 = vmul.f32 %v2656_v26, %v1431_v13  ;;  %vm1438_vm13 = vweird.f32 %v2656_v26  ;;  %v3365_v13 = vstv %s2379_s24 }
 0x317   :  { %v1458_v23 = vmul.f32 %v2658_v20, %v1456_v19  ;;  %v2660_v11 = vpop.eup %2659  ;;  %vm1463_vm0 = vweird.f32 %v2658_v20  ;;  %vm3324_vm2 = vmor %vm1437_vm12, %vm1438_vm13  ;;  %vm1499_vm13 = vcmp.eq.f32.partialorder %v1498_v44, 8.507059e+37 }
 0x318   :  { %v1434_v24 = vsub.f32 1.0, %v1433_v22  ;;  %v1490_v36 = vmul.f32 %v2660_v11, %v1488_v10  ;;  %vm1464_vm8 = vmor %vm1462_vm15, %vm1463_vm0  ;;  %v2662_v28 = vpop.eup %2661  ;;  %vm1495_vm11 = vweird.f32 %v2660_v11  ;;  %vm3587_vm15 = vcmask 1046528  }
 0x319   :  { %v1459_v35 = vsub.f32 1.0, %v1458_v23  ;;  %vm1496_vm12 = vmor %vm1494_vm7, %vm1495_vm11 }
 0x31a   :  { %v1435_v4 = vmul.f32 %v2656_v26, %v1434_v24  ;;  %v1491_v46 = vsub.f32 1.0, %v1490_v36  ;;  %v1583_v24 = vstv %s2372_s26 }
 0x31b   :  { %v1460_v39 = vmul.f32 %v2658_v20, %v1459_v35 }
 0x31c   :  { %v1436_v25 = vadd.f32 %v2656_v26, %v1435_v4  ;;  %v1492_v31 = vmul.f32 %v2660_v11, %v1491_v46 }
 0x31d   :  { %v1461_v47 = vadd.f32 %v2658_v20, %v1460_v39  ;;  %v3381_v39 = vstv %s2380_s1 }
 0x31e   :  { %v1440_v16 = vsel %vm3324_vm2, %v2656_v26, %v1436_v25  ;;  %v1493_v52 = vadd.f32 %v2660_v11, %v1492_v31 }
 0x31f   :  { %v1445_v51 = vsel %vm1442_vm4, %v1444_v37, %v1440_v16  ;;  %v1465_v50 = vsel %vm1464_vm8, %v2658_v20, %v1461_v47 }
 0x320   :  { %v1470_v21 = vsel %vm1467_vm9, %v1469_v45, %v1465_v50  ;;  %v1508_v33 = vmul.f32 %v2662_v28, %v1445_v51  ;;  %v1497_v57 = vsel %vm1496_vm12, %v2660_v11, %v1493_v52  ;;  %v1586_v11 = vmul.f32 0.0, %v3375_v7 }
 0x321   :  { %v1507_v34 = vmul.f32 %v1505_v49, %v1470_v21  ;;  %v1502_v59 = vsel %vm1499_vm13, %v1501_v48, %v1497_v57 }
 0x323   :  { %v1509_v58 = vadd.f32 %v1508_v33, %v1507_v34 }
 0x325   :  { %2663 = vtanh.f32 %v1509_v58 }
 0x32b   :  { %v2664_v5 = vpop.eup %2663 }
 0x32c   :  { %v1511_v17 = vmul.f32 %v2664_v5, %v1502_v59 }
 0x32e   :  { %v1518_v0 = vsel %vm3587_vm15, %v1517_v9, %v1511_v17 }
 0x32f   :  { %v3357_v53 = vmul.f32 %v1531_v8, %v1518_v0  ;;  %v3359_v40 = vmul.f32 %v1557_v62, %v1518_v0  ;;  %v3361_v6 = vmul.f32 %v1591_v12, %v1518_v0  ;;  %v3377_v30 = vmul.f32 %v1583_v24, %v1518_v0 }
 0x331   :  { %v1535_v19 = vadd.f32 %v1534_v63, %v3357_v53  ;;  %v1561_v55 = vadd.f32 %v1560_v41, %v3359_v40  ;;  %v1595_v10 = vadd.f32 %v1594_v3, %v3361_v6  ;;  %v1587_v37 = vadd.f32 %v1586_v11, %v3377_v30 }
 0x333   :  { %v1537_v18 = vadd.f32 %v3363_v56, %v1535_v19  ;;  %v1563_v26 = vadd.f32 %v3365_v13, %v1561_v55  ;;  %v1597_v20 = vadd.f32 %v3367_v14, %v1595_v10  ;;  %v1589_v25 = vadd.f32 %v3381_v39, %v1587_v37 }
 0x335   :  { %v2382_v22 = vmul.f32 -1.442695, %v1537_v18  ;;  %v2383_v27 = vmul.f32 -1.442695, %v1563_v26  ;;  %v2384_v23 = vmul.f32 -1.442695, %v1597_v20 }
 0x337   :  { %2665 = vpow2.f32 %v2382_v22 }
 0x338   :  { %2667 = vpow2.f32 %v2383_v27 }
 0x339   :  { %2669 = vpow2.f32 %v2384_v23 }
 0x33d   :  { %v2666_v35 = vpop.eup %2665 }
 0x33e   :  { %v2668_v29 = vpop.eup %2667  ;;  %v1541_v4 = vadd.f32 1.0, %v2666_v35 }
 0x33f   :  { %v2670_v36 = vpop.eup %2669  ;;  %v1567_v38 = vadd.f32 1.0, %v2668_v29 }
 0x340   :  { %2671 = vrcp.f32 %v1541_v4  ;;  %v1601_v42 = vadd.f32 1.0, %v2670_v36  ;;  %vm1547_vm0 = vweird.f32 %v1541_v4  ;;  %v1553_v47 = vand.u32 2147483648, %v1541_v4 }
 0x341   :  { %2673 = vrcp.f32 %v1567_v38  ;;  %v1551_v31 = vand.u32 2147483647, %v1541_v4  ;;  %v1579_v51 = vand.u32 2147483648, %v1567_v38  ;;  %vm1573_vm4 = vweird.f32 %v1567_v38 }
 0x342   :  { %2675 = vrcp.f32 %v1601_v42  ;;  %v1577_v21 = vand.u32 2147483647, %v1567_v38  ;;  %v1554_v34 = vor.u32 1.1754944e-38, %v1553_v47  ;;  %vm1607_vm13 = vweird.f32 %v1601_v42 }
 0x343   :  { %2677 = vtanh.f32 %v1589_v25  ;;  %vm1552_vm7 = vcmp.eq.f32.partialorder %v1551_v31, 8.507059e+37  ;;  %v1580_v43 = vor.u32 1.1754944e-38, %v1579_v51  ;;  %v1613_v8 = vand.u32 2147483648, %v1601_v42 }
 0x344   :  { %vm1578_vm12 = vcmp.eq.f32.partialorder %v1577_v21, 8.507059e+37  ;;  %v1611_v63 = vand.u32 2147483647, %v1601_v42 }
 0x345   :  { %v1614_v3 = vor.u32 1.1754944e-38, %v1613_v8 }
 0x346   :  { %v2672_v45 = vpop.eup %2671 }
 0x347   :  { %v2674_v46 = vpop.eup %2673  ;;  %v1543_v28 = vmul.f32 %v2672_v45, %v1541_v4  ;;  %vm1548_vm2 = vweird.f32 %v2672_v45 }
 0x348   :  { %v1569_v49 = vmul.f32 %v2674_v46, %v1567_v38  ;;  %v2676_v50 = vpop.eup %2675  ;;  %vm1574_vm8 = vweird.f32 %v2674_v46  ;;  %vm1549_vm9 = vmor %vm1547_vm0, %vm1548_vm2  ;;  %vm1612_vm2 = vcmp.eq.f32.partialorder %v1611_v63, 8.507059e+37 }
 0x349   :  { %v1544_v16 = vsub.f32 1.0, %v1543_v28  ;;  %v1603_v54 = vmul.f32 %v2676_v50, %v1601_v42  ;;  %vm1575_vm11 = vmor %vm1573_vm4, %vm1574_vm8  ;;  %v2678_v48 = vpop.eup %2677  ;;  %vm1608_vm15 = vweird.f32 %v2676_v50 }
 0x34a   :  { %v1570_v32 = vsub.f32 1.0, %v1569_v49  ;;  %vm1609_vm0 = vmor %vm1607_vm13, %vm1608_vm15 }
 0x34b   :  { %v1545_v33 = vmul.f32 %v2672_v45, %v1544_v16  ;;  %v1604_v58 = vsub.f32 1.0, %v1603_v54 }
 0x34c   :  { %v1571_v52 = vmul.f32 %v2674_v46, %v1570_v32 }
 0x34d   :  { %v1546_v44 = vadd.f32 %v2672_v45, %v1545_v33  ;;  %v1605_v61 = vmul.f32 %v2676_v50, %v1604_v58 }
 0x34e   :  { %v1572_v60 = vadd.f32 %v2674_v46, %v1571_v52 }
 0x34f   :  { %v1550_v57 = vsel %vm1549_vm9, %v2672_v45, %v1546_v44  ;;  %v1606_v12 = vadd.f32 %v2676_v50, %v1605_v61 }
 0x350   :  { %v1555_v59 = vsel %vm1552_vm7, %v1554_v34, %v1550_v57  ;;  %v1576_v5 = vsel %vm1575_vm11, %v2674_v46, %v1572_v60 }
 0x351   :  { %v1581_v9 = vsel %vm1578_vm12, %v1580_v43, %v1576_v5  ;;  %v1618_v17 = vmul.f32 %v2678_v48, %v1555_v59  ;;  %v1610_v0 = vsel %vm1609_vm0, %v2676_v50, %v1606_v12 }
 0x352   :  { %v1617_v62 = vmul.f32 0.0, %v1581_v9  ;;  %v1615_v19 = vsel %vm1612_vm2, %v1614_v3, %v1610_v0 }
 0x354   :  { %v3385_v41 = vadd.f32 %v1618_v17, %v1617_v62 }
 0x356   :  { %2679 = vtanh.f32 %v3385_v41  ;;  %v1705_v63 = vrot.slane %v3385_v41, 7 }
 0x35c   :  { %v2680_v55 = vpop.eup %2679 }
 0x35d   :  { %v3388_v10 = vmul.f32 %v2680_v55, %v1615_v19 }
 0x35f   :  { %v1622_v18 = vmul.f32 %v3388_v10, %v3344_v15  ;;  %v1647_v26 = vmul.f32 %v3388_v10, %v3346_v1  ;;  %v1679_v20 = vmul.f32 %v3388_v10, %v3348_v2  ;;  %v1672_v25 = vmul.f32 %v3388_v10, %v3375_v7 }
 0x361   :  { %v1624_v22 = vrot.slane %v1622_v18, 7  ;;  %v1649_v27 = vrot.slane %v1647_v26, 7  ;;  %v1681_v23 = vrot.slane %v1679_v20, 7  ;;  %v1674_v45 = vrot.slane %v1672_v25, 7 }
 0x363   :  { %v1626_v24 = vadd.f32 %v1624_v22, %v3357_v53  ;;  %v1651_v11 = vadd.f32 %v1649_v27, %v3359_v40  ;;  %v1683_v35 = vadd.f32 %v1681_v23, %v3361_v6  ;;  %v1676_v31 = vadd.f32 %v1674_v45, %v3377_v30 }
 0x365   :  { %v1627_v29 = vadd.f32 %v1626_v24, %v3363_v56  ;;  %v1652_v4 = vadd.f32 %v1651_v11, %v3365_v13  ;;  %v1684_v36 = vadd.f32 %v1683_v35, %v3367_v14  ;;  %v1677_v50 = vadd.f32 %v1676_v31, %v3381_v39 }
 0x367   :  { %v2385_v38 = vmul.f32 -1.442695, %v1627_v29  ;;  %v2386_v37 = vmul.f32 -1.442695, %v1652_v4  ;;  %v2387_v42 = vmul.f32 -1.442695, %v1684_v36 }
 0x369   :  { %2681 = vpow2.f32 %v2385_v38 }
 0x36a   :  { %2683 = vpow2.f32 %v2386_v37 }
 0x36b   :  { %2685 = vpow2.f32 %v2387_v42 }
 0x36f   :  { %v2682_v46 = vpop.eup %2681 }
 0x370   :  { %v2684_v28 = vpop.eup %2683  ;;  %v1631_v47 = vadd.f32 1.0, %v2682_v46 }
 0x371   :  { %v2686_v49 = vpop.eup %2685  ;;  %v1656_v16 = vadd.f32 1.0, %v2684_v28 }
 0x372   :  { %2687 = vrcp.f32 %v1631_v47  ;;  %v1688_v51 = vadd.f32 1.0, %v2686_v49  ;;  %vm1637_vm4 = vweird.f32 %v1631_v47  ;;  %v1643_v54 = vand.u32 2147483648, %v1631_v47 }
 0x373   :  { %2689 = vrcp.f32 %v1656_v16  ;;  %v1641_v44 = vand.u32 2147483647, %v1631_v47  ;;  %v1668_v43 = vand.u32 2147483648, %v1656_v16  ;;  %vm1662_vm9 = vweird.f32 %v1656_v16 }
 0x374   :  { %2691 = vrcp.f32 %v1688_v51  ;;  %v1666_v60 = vand.u32 2147483647, %v1656_v16  ;;  %v1644_v59 = vor.u32 1.1754944e-38, %v1643_v54  ;;  %vm1694_vm0 = vweird.f32 %v1688_v51 }
 0x375   :  { %2693 = vtanh.f32 %v1677_v50  ;;  %vm1642_vm12 = vcmp.eq.f32.partialorder %v1641_v44, 8.507059e+37  ;;  %v1669_v17 = vor.u32 1.1754944e-38, %v1668_v43  ;;  %v1700_v20 = vand.u32 2147483648, %v1688_v51 }
 0x376   :  { %vm1667_vm15 = vcmp.eq.f32.partialorder %v1666_v60, 8.507059e+37  ;;  %v1698_v23 = vand.u32 2147483647, %v1688_v51 }
 0x377   :  { %v1701_v11 = vor.u32 1.1754944e-38, %v1700_v20 }
 0x378   :  { %v2688_v32 = vpop.eup %2687 }
 0x379   :  { %v2690_v21 = vpop.eup %2689  ;;  %v1633_v33 = vmul.f32 %v2688_v32, %v1631_v47  ;;  %vm1638_vm8 = vweird.f32 %v2688_v32 }
 0x37a   :  { %v1658_v34 = vmul.f32 %v2690_v21, %v1656_v16  ;;  %v2692_v58 = vpop.eup %2691  ;;  %vm1663_vm7 = vweird.f32 %v2690_v21  ;;  %vm1639_vm11 = vmor %vm1637_vm4, %vm1638_vm8  ;;  %vm1699_vm8 = vcmp.eq.f32.partialorder %v1698_v23, 8.507059e+37 }
 0x37b   :  { %v1634_v52 = vsub.f32 1.0, %v1633_v33  ;;  %v1690_v61 = vmul.f32 %v2692_v58, %v1688_v51  ;;  %vm1664_vm13 = vmor %vm1662_vm9, %vm1663_vm7  ;;  %v2694_v62 = vpop.eup %2693  ;;  %vm1695_vm2 = vweird.f32 %v2692_v58 }
 0x37c   :  { %v1659_v48 = vsub.f32 1.0, %v1658_v34  ;;  %vm1696_vm4 = vmor %vm1694_vm0, %vm1695_vm2 }
 0x37d   :  { %v1635_v57 = vmul.f32 %v2688_v32, %v1634_v52  ;;  %v1691_v8 = vsub.f32 1.0, %v1690_v61 }
 0x37e   :  { %v1660_v5 = vmul.f32 %v2690_v21, %v1659_v48 }
 0x37f   :  { %v1636_v9 = vadd.f32 %v2688_v32, %v1635_v57  ;;  %v1692_v0 = vmul.f32 %v2692_v58, %v1691_v8 }
 0x380   :  { %v1661_v12 = vadd.f32 %v2690_v21, %v1660_v5 }
 0x381   :  { %v1640_v3 = vsel %vm1639_vm11, %v2688_v32, %v1636_v9  ;;  %v1693_v27 = vadd.f32 %v2692_v58, %v1692_v0 }
 0x382   :  { %v1645_v19 = vsel %vm1642_vm12, %v1644_v59, %v1640_v3  ;;  %v1665_v55 = vsel %vm1664_vm13, %v2690_v21, %v1661_v12 }
 0x383   :  { %v1670_v18 = vsel %vm1667_vm15, %v1669_v17, %v1665_v55  ;;  %v1708_v26 = vmul.f32 %v2694_v62, %v1645_v19  ;;  %v1697_v35 = vsel %vm1696_vm4, %v2692_v58, %v1693_v27 }
 0x384   :  { %v1707_v22 = vmul.f32 %v1705_v63, %v1670_v18  ;;  %v1702_v41 = vsel %vm1699_vm8, %v1701_v11, %v1697_v35 }
 0x386   :  { %v3408_v24 = vadd.f32 %v1708_v26, %v1707_v22 }
 0x388   :  { %2695 = vtanh.f32 %v3408_v24  ;;  %v1795_v11 = vrot.slane %v3408_v24, 7 }
 0x38e   :  { %v2696_v29 = vpop.eup %2695 }
 0x38f   :  { %v3411_v4 = vmul.f32 %v2696_v29, %v1702_v41 }
 0x391   :  { %v1712_v36 = vmul.f32 %v3411_v4, %v3344_v15  ;;  %v1737_v38 = vmul.f32 %v3411_v4, %v3346_v1  ;;  %v1769_v37 = vmul.f32 %v3411_v4, %v3348_v2  ;;  %v1762_v21 = vmul.f32 %v3411_v4, %v3375_v7 }
 0x393   :  { %v1714_v42 = vrot.slane %v1712_v36, 7  ;;  %v1739_v25 = vrot.slane %v1737_v38, 7  ;;  %v1771_v45 = vrot.slane %v1769_v37, 7  ;;  %v1764_v33 = vrot.slane %v1762_v21, 7 }
 0x395   :  { %v1716_v46 = vadd.f32 %v1714_v42, %v3357_v53  ;;  %v1741_v28 = vadd.f32 %v1739_v25, %v3359_v40  ;;  %v1773_v47 = vadd.f32 %v1771_v45, %v3361_v6  ;;  %v1766_v58 = vadd.f32 %v1764_v33, %v3377_v30 }
 0x397   :  { %v1717_v49 = vadd.f32 %v1716_v46, %v3363_v56  ;;  %v1742_v16 = vadd.f32 %v1741_v28, %v3365_v13  ;;  %v1774_v31 = vadd.f32 %v1773_v47, %v3367_v14  ;;  %v1767_v60 = vadd.f32 %v1766_v58, %v3381_v39 }
 0x399   :  { %v2388_v51 = vmul.f32 -1.442695, %v1717_v49  ;;  %v2389_v50 = vmul.f32 -1.442695, %v1742_v16  ;;  %v2390_v32 = vmul.f32 -1.442695, %v1774_v31 }
 0x39b   :  { %2697 = vpow2.f32 %v2388_v51 }
 0x39c   :  { %2699 = vpow2.f32 %v2389_v50 }
 0x39d   :  { %2701 = vpow2.f32 %v2390_v32 }
 0x3a1   :  { %v2698_v54 = vpop.eup %2697 }
 0x3a2   :  { %v2700_v34 = vpop.eup %2699  ;;  %v1721_v52 = vadd.f32 1.0, %v2698_v54 }
 0x3a3   :  { %v2702_v44 = vpop.eup %2701  ;;  %v1746_v43 = vadd.f32 1.0, %v2700_v34 }
 0x3a4   :  { %2703 = vrcp.f32 %v1721_v52  ;;  %v1778_v48 = vadd.f32 1.0, %v2702_v44  ;;  %vm1727_vm9 = vweird.f32 %v1721_v52  ;;  %v1733_v5 = vand.u32 2147483648, %v1721_v52 }
 0x3a5   :  { %2705 = vrcp.f32 %v1746_v43  ;;  %v1731_v8 = vand.u32 2147483647, %v1721_v52  ;;  %v1758_v62 = vand.u32 2147483648, %v1746_v43  ;;  %vm1752_vm11 = vweird.f32 %v1746_v43 }
 0x3a6   :  { %2707 = vrcp.f32 %v1778_v48  ;;  %v1756_v3 = vand.u32 2147483647, %v1746_v43  ;;  %v1734_v55 = vor.u32 1.1754944e-38, %v1733_v5  ;;  %vm1784_vm4 = vweird.f32 %v1778_v48 }
 0x3a7   :  { %2709 = vtanh.f32 %v1767_v60  ;;  %vm1732_vm15 = vcmp.eq.f32.partialorder %v1731_v8, 8.507059e+37  ;;  %v1759_v20 = vor.u32 1.1754944e-38, %v1758_v62  ;;  %v1790_v42 = vand.u32 2147483648, %v1778_v48 }
 0x3a8   :  { %vm1757_vm2 = vcmp.eq.f32.partialorder %v1756_v3, 8.507059e+37  ;;  %v1788_v46 = vand.u32 2147483647, %v1778_v48 }
 0x3a9   :  { %v1791_v47 = vor.u32 1.1754944e-38, %v1790_v42 }
 0x3aa   :  { %v2704_v57 = vpop.eup %2703 }
 0x3ab   :  { %v2706_v61 = vpop.eup %2705  ;;  %v1723_v59 = vmul.f32 %v2704_v57, %v1721_v52  ;;  %vm1728_vm7 = vweird.f32 %v2704_v57 }
 0x3ac   :  { %v1748_v9 = vmul.f32 %v2706_v61, %v1746_v43  ;;  %v2708_v12 = vpop.eup %2707  ;;  %vm1753_vm12 = vweird.f32 %v2706_v61  ;;  %vm1729_vm13 = vmor %vm1727_vm9, %vm1728_vm7  ;;  %vm1789_vm7 = vcmp.eq.f32.partialorder %v1788_v46, 8.507059e+37 }
 0x3ad   :  { %v1724_v17 = vsub.f32 1.0, %v1723_v59  ;;  %v1780_v19 = vmul.f32 %v2708_v12, %v1778_v48  ;;  %vm1754_vm0 = vmor %vm1752_vm11, %vm1753_vm12  ;;  %v2710_v27 = vpop.eup %2709  ;;  %vm1785_vm8 = vweird.f32 %v2708_v12 }
 0x3ae   :  { %v1749_v63 = vsub.f32 1.0, %v1748_v9  ;;  %vm1786_vm9 = vmor %vm1784_vm4, %vm1785_vm8 }
 0x3af   :  { %v1725_v0 = vmul.f32 %v2704_v57, %v1724_v17  ;;  %v1781_v22 = vsub.f32 1.0, %v1780_v19 }
 0x3b0   :  { %v1750_v18 = vmul.f32 %v2706_v61, %v1749_v63 }
 0x3b1   :  { %v1726_v26 = vadd.f32 %v2704_v57, %v1725_v0  ;;  %v1782_v41 = vmul.f32 %v2708_v12, %v1781_v22 }
 0x3b2   :  { %v1751_v23 = vadd.f32 %v2706_v61, %v1750_v18 }
 0x3b3   :  { %v1730_v35 = vsel %vm1729_vm13, %v2704_v57, %v1726_v26  ;;  %v1783_v45 = vadd.f32 %v2708_v12, %v1782_v41 }
 0x3b4   :  { %v1735_v29 = vsel %vm1732_vm15, %v1734_v55, %v1730_v35  ;;  %v1755_v36 = vsel %vm1754_vm0, %v2706_v61, %v1751_v23 }
 0x3b5   :  { %v1760_v38 = vsel %vm1757_vm2, %v1759_v20, %v1755_v36  ;;  %v1798_v37 = vmul.f32 %v2710_v27, %v1735_v29  ;;  %v1787_v49 = vsel %vm1786_vm9, %v2708_v12, %v1783_v45 }
 0x3b6   :  { %v1797_v25 = vmul.f32 %v1795_v11, %v1760_v38  ;;  %v1792_v24 = vsel %vm1789_vm7, %v1791_v47, %v1787_v49 }
 0x3b8   :  { %v3431_v28 = vadd.f32 %v1798_v37, %v1797_v25 }
 0x3ba   :  { %2711 = vtanh.f32 %v3431_v28  ;;  %v1885_v49 = vrot.slane %v3431_v28, 7 }
 0x3c0   :  { %v2712_v16 = vpop.eup %2711 }
 0x3c1   :  { %v3434_v31 = vmul.f32 %v2712_v16, %v1792_v24 }
 0x3c3   :  { %v1802_v51 = vmul.f32 %v3434_v31, %v3344_v15  ;;  %v1827_v50 = vmul.f32 %v3434_v31, %v3346_v1  ;;  %v1859_v32 = vmul.f32 %v3434_v31, %v3348_v2  ;;  %v1852_v59 = vmul.f32 %v3434_v31, %v3375_v7 }
 0x3c5   :  { %v1804_v21 = vrot.slane %v1802_v51, 7  ;;  %v1829_v33 = vrot.slane %v1827_v50, 7  ;;  %v1861_v54 = vrot.slane %v1859_v32, 7  ;;  %v1854_v5 = vrot.slane %v1852_v59, 7 }
 0x3c7   :  { %v1806_v34 = vadd.f32 %v1804_v21, %v3357_v53  ;;  %v1831_v52 = vadd.f32 %v1829_v33, %v3359_v40  ;;  %v1863_v44 = vadd.f32 %v1861_v54, %v3361_v6  ;;  %v1856_v63 = vadd.f32 %v1854_v5, %v3377_v30 }
 0x3c9   :  { %v1807_v43 = vadd.f32 %v1806_v34, %v3363_v56  ;;  %v1832_v58 = vadd.f32 %v1831_v52, %v3365_v13  ;;  %v1864_v48 = vadd.f32 %v1863_v44, %v3367_v14  ;;  %v1857_v0 = vadd.f32 %v1856_v63, %v3381_v39 }
 0x3cb   :  { %v2391_v60 = vmul.f32 -1.442695, %v1807_v43  ;;  %v2392_v57 = vmul.f32 -1.442695, %v1832_v58  ;;  %v2393_v61 = vmul.f32 -1.442695, %v1864_v48 }
 0x3cd   :  { %2713 = vpow2.f32 %v2391_v60 }
 0x3ce   :  { %2715 = vpow2.f32 %v2392_v57 }
 0x3cf   :  { %2717 = vpow2.f32 %v2393_v61 }
 0x3d3   :  { %v2714_v9 = vpop.eup %2713 }
 0x3d4   :  { %v2716_v17 = vpop.eup %2715  ;;  %v1811_v8 = vadd.f32 1.0, %v2714_v9 }
 0x3d5   :  { %v2718_v62 = vpop.eup %2717  ;;  %v1836_v12 = vadd.f32 1.0, %v2716_v17 }
 0x3d6   :  { %2719 = vrcp.f32 %v1811_v8  ;;  %v1868_v3 = vadd.f32 1.0, %v2718_v62  ;;  %vm1817_vm11 = vweird.f32 %v1811_v8  ;;  %v1823_v26 = vand.u32 2147483648, %v1811_v8 }
 0x3d7   :  { %2721 = vrcp.f32 %v1836_v12  ;;  %v1821_v27 = vand.u32 2147483647, %v1811_v8  ;;  %v1848_v23 = vand.u32 2147483648, %v1836_v12  ;;  %vm1842_vm13 = vweird.f32 %v1836_v12 }
 0x3d8   :  { %2723 = vrcp.f32 %v1868_v3  ;;  %v1846_v41 = vand.u32 2147483647, %v1836_v12  ;;  %v1824_v38 = vor.u32 1.1754944e-38, %v1823_v26  ;;  %vm1874_vm9 = vweird.f32 %v1868_v3 }
 0x3d9   :  { %2725 = vtanh.f32 %v1857_v0  ;;  %vm1822_vm2 = vcmp.eq.f32.partialorder %v1821_v27, 8.507059e+37  ;;  %v1849_v25 = vor.u32 1.1754944e-38, %v1848_v23  ;;  %v1880_v33 = vand.u32 2147483648, %v1868_v3 }
 0x3da   :  { %vm1847_vm8 = vcmp.eq.f32.partialorder %v1846_v41, 8.507059e+37  ;;  %v1878_v52 = vand.u32 2147483647, %v1868_v3 }
 0x3db   :  { %v1881_v43 = vor.u32 1.1754944e-38, %v1880_v33 }
 0x3dc   :  { %v2720_v19 = vpop.eup %2719 }
 0x3dd   :  { %v2722_v55 = vpop.eup %2721  ;;  %v1813_v18 = vmul.f32 %v2720_v19, %v1811_v8  ;;  %vm1818_vm12 = vweird.f32 %v2720_v19 }
 0x3de   :  { %v1838_v20 = vmul.f32 %v2722_v55, %v1836_v12  ;;  %v2724_v11 = vpop.eup %2723  ;;  %vm1843_vm15 = vweird.f32 %v2722_v55  ;;  %vm1819_vm0 = vmor %vm1817_vm11, %vm1818_vm12  ;;  %vm1879_vm12 = vcmp.eq.f32.partialorder %v1878_v52, 8.507059e+37 }
 0x3df   :  { %v1814_v22 = vsub.f32 1.0, %v1813_v18  ;;  %v1870_v36 = vmul.f32 %v2724_v11, %v1868_v3  ;;  %vm1844_vm4 = vmor %vm1842_vm13, %vm1843_vm15  ;;  %v2726_v46 = vpop.eup %2725  ;;  %vm1875_vm7 = vweird.f32 %v2724_v11 }
 0x3e0   :  { %v1839_v35 = vsub.f32 1.0, %v1838_v20  ;;  %vm1876_vm11 = vmor %vm1874_vm9, %vm1875_vm7 }
 0x3e1   :  { %v1815_v29 = vmul.f32 %v2720_v19, %v1814_v22  ;;  %v1871_v45 = vsub.f32 1.0, %v1870_v36 }
 0x3e2   :  { %v1840_v37 = vmul.f32 %v2722_v55, %v1839_v35 }
 0x3e3   :  { %v1816_v42 = vadd.f32 %v2720_v19, %v1815_v29  ;;  %v1872_v16 = vmul.f32 %v2724_v11, %v1871_v45 }
 0x3e4   :  { %v1841_v47 = vadd.f32 %v2722_v55, %v1840_v37 }
 0x3e5   :  { %v1820_v24 = vsel %vm1819_vm0, %v2720_v19, %v1816_v42  ;;  %v1873_v34 = vadd.f32 %v2724_v11, %v1872_v16 }
 0x3e6   :  { %v1825_v51 = vsel %vm1822_vm2, %v1824_v38, %v1820_v24  ;;  %v1845_v50 = vsel %vm1844_vm4, %v2722_v55, %v1841_v47 }
 0x3e7   :  { %v1850_v32 = vsel %vm1847_vm8, %v1849_v25, %v1845_v50  ;;  %v1888_v21 = vmul.f32 %v2726_v46, %v1825_v51  ;;  %v1877_v58 = vsel %vm1876_vm11, %v2724_v11, %v1873_v34 }
 0x3e8   :  { %v1887_v54 = vmul.f32 %v1885_v49, %v1850_v32  ;;  %v1882_v28 = vsel %vm1879_vm12, %v1881_v43, %v1877_v58 }
 0x3ea   :  { %v3454_v44 = vadd.f32 %v1888_v21, %v1887_v54 }
 0x3ec   :  { %2727 = vtanh.f32 %v3454_v44 }
 0x3f2   :  { %v2728_v48 = vpop.eup %2727 }
 0x3f3   :  { %v3457_v60 = vmul.f32 %v2728_v48, %v1882_v28  ;;  %v1975_v28 = vrot.slane %v3454_v44, 7 }
 0x3f5   :  { %v1892_v57 = vmul.f32 %v3457_v60, %v3344_v15  ;;  %v1917_v61 = vmul.f32 %v3457_v60, %v3346_v1  ;;  %v1949_v59 = vmul.f32 %v3457_v60, %v3348_v2  ;;  %v1942_v26 = vmul.f32 %v3457_v60, %v3375_v7 }
 0x3f7   :  { %v1894_v5 = vrot.slane %v1892_v57, 7  ;;  %v1919_v9 = vrot.slane %v1917_v61, 7  ;;  %v1951_v17 = vrot.slane %v1949_v59, 7  ;;  %v1944_v20 = vrot.slane %v1942_v26, 7 }
 0x3f9   :  { %v1896_v8 = vadd.f32 %v1894_v5, %v3357_v53  ;;  %v1921_v62 = vadd.f32 %v1919_v9, %v3359_v40  ;;  %v1953_v12 = vadd.f32 %v1951_v17, %v3361_v6  ;;  %v1946_v41 = vadd.f32 %v1944_v20, %v3377_v30 }
 0x3fb   :  { %v1897_v63 = vadd.f32 %v1896_v8, %v3363_v56  ;;  %v1922_v3 = vadd.f32 %v1921_v62, %v3365_v13  ;;  %v1954_v0 = vadd.f32 %v1953_v12, %v3367_v14  ;;  %v1947_v36 = vadd.f32 %v1946_v41, %v3381_v39 }
 0x3fd   :  { %v2394_v19 = vmul.f32 -1.442695, %v1897_v63  ;;  %v2395_v55 = vmul.f32 -1.442695, %v1922_v3  ;;  %v2396_v18 = vmul.f32 -1.442695, %v1954_v0 }
 0x3ff   :  { %2729 = vpow2.f32 %v2394_v19 }
 0x400   :  { %2731 = vpow2.f32 %v2395_v55 }
 0x401   :  { %2733 = vpow2.f32 %v2396_v18 }
 0x405   :  { %v2730_v22 = vpop.eup %2729 }
 0x406   :  { %v2732_v27 = vpop.eup %2731  ;;  %v1901_v23 = vadd.f32 1.0, %v2730_v22 }
 0x407   :  { %v2734_v11 = vpop.eup %2733  ;;  %v1926_v35 = vadd.f32 1.0, %v2732_v27 }
 0x408   :  { %2735 = vrcp.f32 %v1901_v23  ;;  %v1958_v29 = vadd.f32 1.0, %v2734_v11  ;;  %vm1907_vm13 = vweird.f32 %v1901_v23  ;;  %v1913_v25 = vand.u32 2147483648, %v1901_v23 }
 0x409   :  { %2737 = vrcp.f32 %v1926_v35  ;;  %v1911_v47 = vand.u32 2147483647, %v1901_v23  ;;  %v1938_v49 = vand.u32 2147483648, %v1926_v35  ;;  %vm1932_vm0 = vweird.f32 %v1926_v35 }
 0x40a   :  { %2739 = vrcp.f32 %v1958_v29  ;;  %v1936_v51 = vand.u32 2147483647, %v1926_v35  ;;  %v1914_v21 = vor.u32 1.1754944e-38, %v1913_v25  ;;  %vm1964_vm11 = vweird.f32 %v1958_v29 }
 0x40b   :  { %2741 = vtanh.f32 %v1947_v36  ;;  %vm1912_vm8 = vcmp.eq.f32.partialorder %v1911_v47, 8.507059e+37  ;;  %v1939_v34 = vor.u32 1.1754944e-38, %v1938_v49  ;;  %v1970_v17 = vand.u32 2147483648, %v1958_v29 }
 0x40c   :  { %vm1937_vm7 = vcmp.eq.f32.partialorder %v1936_v51, 8.507059e+37  ;;  %v1968_v12 = vand.u32 2147483647, %v1958_v29 }
 0x40d   :  { %v1971_v3 = vor.u32 1.1754944e-38, %v1970_v17 }
 0x40e   :  { %v2736_v38 = vpop.eup %2735 }
 0x40f   :  { %v2738_v37 = vpop.eup %2737  ;;  %v1903_v42 = vmul.f32 %v2736_v38, %v1901_v23  ;;  %vm1908_vm15 = vweird.f32 %v2736_v38 }
 0x410   :  { %v1928_v45 = vmul.f32 %v2738_v37, %v1926_v35  ;;  %v2740_v24 = vpop.eup %2739  ;;  %vm1933_vm2 = vweird.f32 %v2738_v37  ;;  %vm1909_vm4 = vmor %vm1907_vm13, %vm1908_vm15  ;;  %vm1969_vm15 = vcmp.eq.f32.partialorder %v1968_v12, 8.507059e+37 }
 0x411   :  { %v1904_v46 = vsub.f32 1.0, %v1903_v42  ;;  %v1960_v32 = vmul.f32 %v2740_v24, %v1958_v29  ;;  %vm1934_vm9 = vmor %vm1932_vm0, %vm1933_vm2  ;;  %v2742_v43 = vpop.eup %2741  ;;  %vm1965_vm12 = vweird.f32 %v2740_v24 }
 0x412   :  { %v1929_v16 = vsub.f32 1.0, %v1928_v45  ;;  %vm1966_vm13 = vmor %vm1964_vm11, %vm1965_vm12 }
 0x413   :  { %v1905_v50 = vmul.f32 %v2736_v38, %v1904_v46  ;;  %v1961_v52 = vsub.f32 1.0, %v1960_v32 }
 0x414   :  { %v1930_v33 = vmul.f32 %v2738_v37, %v1929_v16 }
 0x415   :  { %v1906_v54 = vadd.f32 %v2736_v38, %v1905_v50  ;;  %v1962_v57 = vmul.f32 %v2740_v24, %v1961_v52 }
 0x416   :  { %v1931_v58 = vadd.f32 %v2738_v37, %v1930_v33 }
 0x417   :  { %v1910_v48 = vsel %vm1909_vm4, %v2736_v38, %v1906_v54  ;;  %v1963_v62 = vadd.f32 %v2740_v24, %v1962_v57 }
 0x418   :  { %v1915_v61 = vsel %vm1912_vm8, %v1914_v21, %v1910_v48  ;;  %v1935_v59 = vsel %vm1934_vm9, %v2738_v37, %v1931_v58 }
 0x419   :  { %v1940_v5 = vsel %vm1937_vm7, %v1939_v34, %v1935_v59  ;;  %v1978_v9 = vmul.f32 %v2742_v43, %v1915_v61  ;;  %v1967_v0 = vsel %vm1966_vm13, %v2740_v24, %v1963_v62 }
 0x41a   :  { %v1977_v8 = vmul.f32 %v1975_v28, %v1940_v5  ;;  %v1972_v44 = vsel %vm1969_vm15, %v1971_v3, %v1967_v0 }
 0x41c   :  { %v3477_v63 = vadd.f32 %v1978_v9, %v1977_v8 }
 0x41e   :  { %2743 = vtanh.f32 %v3477_v63 }
 0x424   :  { %v2744_v19 = vpop.eup %2743 }
 0x425   :  { %v3480_v55 = vmul.f32 %v2744_v19, %v1972_v44  ;;  %v2065_v19 = vrot.slane %v3477_v63, 7 }
 0x427   :  { %v1982_v18 = vmul.f32 %v3480_v55, %v3344_v15  ;;  %v2007_v26 = vmul.f32 %v3480_v55, %v3346_v1  ;;  %v2039_v20 = vmul.f32 %v3480_v55, %v3348_v2  ;;  %v2032_v45 = vmul.f32 %v3480_v55, %v3375_v7 }
 0x429   :  { %v1984_v22 = vrot.slane %v1982_v18, 7  ;;  %v2009_v27 = vrot.slane %v2007_v26, 7  ;;  %v2041_v23 = vrot.slane %v2039_v20, 7  ;;  %v2034_v46 = vrot.slane %v2032_v45, 7 }
 0x42b   :  { %v1986_v11 = vadd.f32 %v1984_v22, %v3357_v53  ;;  %v2011_v35 = vadd.f32 %v2009_v27, %v3359_v40  ;;  %v2043_v41 = vadd.f32 %v2041_v23, %v3361_v6  ;;  %v2036_v50 = vadd.f32 %v2034_v46, %v3377_v30 }
 0x42d   :  { %v1987_v29 = vadd.f32 %v1986_v11, %v3363_v56  ;;  %v2012_v36 = vadd.f32 %v2011_v35, %v3365_v13  ;;  %v2044_v38 = vadd.f32 %v2043_v41, %v3367_v14  ;;  %v2037_v21 = vadd.f32 %v2036_v50, %v3381_v39 }
 0x42f   :  { %v2397_v37 = vmul.f32 -1.442695, %v1987_v29  ;;  %v2398_v42 = vmul.f32 -1.442695, %v2012_v36  ;;  %v2399_v25 = vmul.f32 -1.442695, %v2044_v38 }
 0x431   :  { %2745 = vpow2.f32 %v2397_v37 }
 0x432   :  { %2747 = vpow2.f32 %v2398_v42 }
 0x433   :  { %2749 = vpow2.f32 %v2399_v25 }
 0x437   :  { %v2746_v47 = vpop.eup %2745 }
 0x438   :  { %v2748_v49 = vpop.eup %2747  ;;  %v1991_v24 = vadd.f32 1.0, %v2746_v47 }
 0x439   :  { %v2750_v16 = vpop.eup %2749  ;;  %v2016_v51 = vadd.f32 1.0, %v2748_v49 }
 0x43a   :  { %2751 = vrcp.f32 %v1991_v24  ;;  %v2048_v32 = vadd.f32 1.0, %v2750_v16  ;;  %vm1997_vm0 = vweird.f32 %v1991_v24  ;;  %v2003_v52 = vand.u32 2147483648, %v1991_v24 }
 0x43b   :  { %2753 = vrcp.f32 %v2016_v51  ;;  %v2001_v28 = vand.u32 2147483647, %v1991_v24  ;;  %v2028_v48 = vand.u32 2147483648, %v2016_v51  ;;  %vm2022_vm4 = vweird.f32 %v2016_v51 }
 0x43c   :  { %2755 = vrcp.f32 %v2048_v32  ;;  %v2026_v59 = vand.u32 2147483647, %v2016_v51  ;;  %v2004_v17 = vor.u32 1.1754944e-38, %v2003_v52  ;;  %vm2054_vm13 = vweird.f32 %v2048_v32 }
 0x43d   :  { %2757 = vtanh.f32 %v2037_v21  ;;  %vm2002_vm7 = vcmp.eq.f32.partialorder %v2001_v28, 8.507059e+37  ;;  %v2029_v12 = vor.u32 1.1754944e-38, %v2028_v48  ;;  %v2060_v11 = vand.u32 2147483648, %v2048_v32 }
 0x43e   :  { %vm2027_vm12 = vcmp.eq.f32.partialorder %v2026_v59, 8.507059e+37  ;;  %v2058_v29 = vand.u32 2147483647, %v2048_v32 }
 0x43f   :  { %v2061_v38 = vor.u32 1.1754944e-38, %v2060_v11 }
 0x440   :  { %v2752_v33 = vpop.eup %2751 }
 0x441   :  { %v2754_v54 = vpop.eup %2753  ;;  %v1993_v34 = vmul.f32 %v2752_v33, %v1991_v24  ;;  %vm1998_vm2 = vweird.f32 %v2752_v33 }
 0x442   :  { %v2018_v43 = vmul.f32 %v2754_v54, %v2016_v51  ;;  %v2756_v57 = vpop.eup %2755  ;;  %vm2023_vm8 = vweird.f32 %v2754_v54  ;;  %vm1999_vm9 = vmor %vm1997_vm0, %vm1998_vm2  ;;  %vm2059_vm2 = vcmp.eq.f32.partialorder %v2058_v29, 8.507059e+37 }
 0x443   :  { %v1994_v58 = vsub.f32 1.0, %v1993_v34  ;;  %v2050_v9 = vmul.f32 %v2756_v57, %v2048_v32  ;;  %vm2024_vm11 = vmor %vm2022_vm4, %vm2023_vm8  ;;  %v2758_v0 = vpop.eup %2757  ;;  %vm2055_vm15 = vweird.f32 %v2756_v57 }
 0x444   :  { %v2019_v61 = vsub.f32 1.0, %v2018_v43  ;;  %vm2056_vm0 = vmor %vm2054_vm13, %vm2055_vm15 }
 0x445   :  { %v1995_v5 = vmul.f32 %v2752_v33, %v1994_v58  ;;  %v2051_v3 = vsub.f32 1.0, %v2050_v9 }
 0x446   :  { %v2020_v8 = vmul.f32 %v2754_v54, %v2019_v61 }
 0x447   :  { %v1996_v62 = vadd.f32 %v2752_v33, %v1995_v5  ;;  %v2052_v26 = vmul.f32 %v2756_v57, %v2051_v3 }
 0x448   :  { %v2021_v44 = vadd.f32 %v2754_v54, %v2020_v8 }
 0x449   :  { %v2000_v18 = vsel %vm1999_vm9, %v2752_v33, %v1996_v62  ;;  %v2053_v41 = vadd.f32 %v2756_v57, %v2052_v26 }
 0x44a   :  { %v2005_v20 = vsel %vm2002_vm7, %v2004_v17, %v2000_v18  ;;  %v2025_v22 = vsel %vm2024_vm11, %v2754_v54, %v2021_v44 }
 0x44b   :  { %v2030_v27 = vsel %vm2027_vm12, %v2029_v12, %v2025_v22  ;;  %v2068_v23 = vmul.f32 %v2758_v0, %v2005_v20  ;;  %v2057_v37 = vsel %vm2056_vm0, %v2756_v57, %v2053_v41 }
 0x44c   :  { %v2067_v35 = vmul.f32 %v2065_v19, %v2030_v27  ;;  %v2062_v63 = vsel %vm2059_vm2, %v2061_v38, %v2057_v37 }
 0x44e   :  { %v3500_v36 = vadd.f32 %v2068_v23, %v2067_v35 }
 0x450   :  { %2759 = vtanh.f32 %v3500_v36 }
 0x456   :  { %v2760_v42 = vpop.eup %2759 }
 0x457   :  { %v3503_v25 = vmul.f32 %v2760_v42, %v2062_v63 }
 0x459   :  { %v2072_v45 = vmul.f32 %v3503_v25, %v3344_v15  ;;  %v2097_v46 = vmul.f32 %v3503_v25, %v3346_v1  ;;  %v2129_v47 = vmul.f32 %v3503_v25, %v3348_v2  ;;  %v2122_v58 = vmul.f32 %v3503_v25, %v3375_v7 }
 0x45b   :  { %v2074_v49 = vrot.slane %v2072_v45, 7  ;;  %v2099_v24 = vrot.slane %v2097_v46, 7  ;;  %v2131_v16 = vrot.slane %v2129_v47, 7  ;;  %v2124_v28 = vrot.slane %v2122_v58, 7 }
 0x45c   :  { %v2155_v45 = vrot.slane %v3500_v36, 7 }
 0x45d   :  { %v2076_v51 = vadd.f32 %v2074_v49, %v3357_v53  ;;  %v2101_v50 = vadd.f32 %v2099_v24, %v3359_v40  ;;  %v2133_v32 = vadd.f32 %v2131_v16, %v3361_v6  ;;  %v2126_v9 = vadd.f32 %v2124_v28, %v3377_v30 }
 0x45f   :  { %v2077_v21 = vadd.f32 %v2076_v51, %v3363_v56  ;;  %v2102_v33 = vadd.f32 %v2101_v50, %v3365_v13  ;;  %v2134_v54 = vadd.f32 %v2133_v32, %v3367_v14  ;;  %v2127_v8 = vadd.f32 %v2126_v9, %v3381_v39 }
 0x461   :  { %v2400_v34 = vmul.f32 -1.442695, %v2077_v21  ;;  %v2401_v52 = vmul.f32 -1.442695, %v2102_v33  ;;  %v2402_v43 = vmul.f32 -1.442695, %v2134_v54 }
 0x463   :  { %2761 = vpow2.f32 %v2400_v34 }
 0x464   :  { %2763 = vpow2.f32 %v2401_v52 }
 0x465   :  { %2765 = vpow2.f32 %v2402_v43 }
 0x469   :  { %v2762_v48 = vpop.eup %2761 }
 0x46a   :  { %v2764_v57 = vpop.eup %2763  ;;  %v2081_v61 = vadd.f32 1.0, %v2762_v48 }
 0x46b   :  { %v2766_v59 = vpop.eup %2765  ;;  %v2106_v5 = vadd.f32 1.0, %v2764_v57 }
 0x46c   :  { %2767 = vrcp.f32 %v2081_v61  ;;  %v2138_v17 = vadd.f32 1.0, %v2766_v59  ;;  %vm2087_vm4 = vweird.f32 %v2081_v61  ;;  %v2093_v0 = vand.u32 2147483648, %v2081_v61 }
 0x46d   :  { %2769 = vrcp.f32 %v2106_v5  ;;  %v2091_v18 = vand.u32 2147483647, %v2081_v61  ;;  %v2118_v26 = vand.u32 2147483648, %v2106_v5  ;;  %vm2112_vm9 = vweird.f32 %v2106_v5 }
 0x46e   :  { %2771 = vrcp.f32 %v2138_v17  ;;  %v2116_v27 = vand.u32 2147483647, %v2106_v5  ;;  %v2094_v35 = vor.u32 1.1754944e-38, %v2093_v0  ;;  %vm2144_vm0 = vweird.f32 %v2138_v17 }
 0x46f   :  { %2773 = vtanh.f32 %v2127_v8  ;;  %vm2092_vm12 = vcmp.eq.f32.partialorder %v2091_v18, 8.507059e+37  ;;  %v2119_v38 = vor.u32 1.1754944e-38, %v2118_v26  ;;  %v2150_v50 = vand.u32 2147483648, %v2138_v17 }
 0x470   :  { %vm2117_vm15 = vcmp.eq.f32.partialorder %v2116_v27, 8.507059e+37  ;;  %v2148_v33 = vand.u32 2147483647, %v2138_v17 }
 0x471   :  { %v2151_v34 = vor.u32 1.1754944e-38, %v2150_v50 }
 0x472   :  { %v2768_v62 = vpop.eup %2767 }
 0x473   :  { %v2770_v12 = vpop.eup %2769  ;;  %v2083_v3 = vmul.f32 %v2768_v62, %v2081_v61  ;;  %vm2088_vm8 = vweird.f32 %v2768_v62 }
 0x474   :  { %v2108_v44 = vmul.f32 %v2770_v12, %v2106_v5  ;;  %v2772_v20 = vpop.eup %2771  ;;  %vm2113_vm7 = vweird.f32 %v2770_v12  ;;  %vm2089_vm11 = vmor %vm2087_vm4, %vm2088_vm8  ;;  %vm2149_vm8 = vcmp.eq.f32.partialorder %v2148_v33, 8.507059e+37 }
 0x475   :  { %v2084_v19 = vsub.f32 1.0, %v2083_v3  ;;  %v2140_v11 = vmul.f32 %v2772_v20, %v2138_v17  ;;  %vm2114_vm13 = vmor %vm2112_vm9, %vm2113_vm7  ;;  %v2774_v63 = vpop.eup %2773  ;;  %vm2145_vm2 = vweird.f32 %v2772_v20  ;;  %vm2264_vm9 = vcmask 8192  }
 0x476   :  { %v2109_v22 = vsub.f32 1.0, %v2108_v44  ;;  %vm2146_vm4 = vmor %vm2144_vm0, %vm2145_vm2 }
 0x477   :  { %v2085_v23 = vmul.f32 %v2768_v62, %v2084_v19  ;;  %v2141_v37 = vsub.f32 1.0, %v2140_v11 }
 0x478   :  { %v2110_v41 = vmul.f32 %v2770_v12, %v2109_v22 }
 0x479   :  { %v2086_v29 = vadd.f32 %v2768_v62, %v2085_v23  ;;  %v2142_v47 = vmul.f32 %v2772_v20, %v2141_v37 }
 0x47a   :  { %v2111_v42 = vadd.f32 %v2770_v12, %v2110_v41 }
 0x47b   :  { %v2090_v46 = vsel %vm2089_vm11, %v2768_v62, %v2086_v29  ;;  %v2143_v21 = vadd.f32 %v2772_v20, %v2142_v47 }
 0x47c   :  { %v2095_v49 = vsel %vm2092_vm12, %v2094_v35, %v2090_v46  ;;  %v2115_v24 = vsel %vm2114_vm13, %v2770_v12, %v2111_v42 }
 0x47d   :  { %v2120_v16 = vsel %vm2117_vm15, %v2119_v38, %v2115_v24  ;;  %v2158_v51 = vmul.f32 %v2774_v63, %v2095_v49  ;;  %v2147_v52 = vsel %vm2146_vm4, %v2772_v20, %v2143_v21  ;;  %v2252_v49 = vsel %vm765_vm5, %v3388_v10, %v3411_v4 }
 0x47e   :  { %v2157_v32 = vmul.f32 %v2155_v45, %v2120_v16  ;;  %v2152_v36 = vsel %vm2149_vm8, %v2151_v34, %v2147_v52 }
 0x480   :  { %v3523_v54 = vadd.f32 %v2158_v51, %v2157_v32 }
 0x482   :  { %2775 = vtanh.f32 %v3523_v54  ;;  %v2245_v21 = vrot.slane %v3523_v54, 7 }
 0x488   :  { %v2776_v43 = vpop.eup %2775 }
 0x489   :  { %v3526_v58 = vmul.f32 %v2776_v43, %v2152_v36  ;;  %v2253_v43 = vsel %vm767_vm10, %v2252_v49, %v3434_v31 }
 0x48a   :  { %v2254_v54 = vsel %vm769_vm14, %v2253_v43, %v3457_v60  ;;  %vm2259_vm14 = vcmask 15360  }
 0x48b   :  { %v2162_v28 = vmul.f32 %v3526_v58, %v3344_v15  ;;  %v2187_v48 = vmul.f32 %v3526_v58, %v3346_v1  ;;  %v2219_v57 = vmul.f32 %v3526_v58, %v3348_v2  ;;  %v2212_v2 = vmul.f32 %v3526_v58, %v3375_v7 }
 0x48d   :  { %v2164_v61 = vrot.slane %v2162_v28, 7  ;;  %v2189_v59 = vrot.slane %v2187_v48, 7  ;;  %v2221_v5 = vrot.slane %v2219_v57, 7 }
 0x48f   :  { %v2166_v9 = vadd.f32 %v2164_v61, %v3357_v53  ;;  %v2191_v17 = vadd.f32 %v2189_v59, %v3359_v40  ;;  %v2223_v8 = vadd.f32 %v2221_v5, %v3361_v6  ;;  %v2261_v53 = vld [vmem:[%s3577_s2] sm:$0x1]  ;;  %v2214_v40 = vrot.slane %v2212_v2, 7  ;;  %s2861_s2 = smov [#allocation5]  }
 0x490   :  { %v2262_v6 = vcvt.s32.f32 %v2261_v53  ;;  %s2271_s4 = sshll.u32 %s2861_s2, 4  ;;  %s2272_s4 = int_to_ptr.vmem [resolvable:$true] %s2271_s4 }
 0x491   :  { %v2167_v62 = vadd.f32 %v2166_v9, %v3363_v56  ;;  %v2192_v12 = vadd.f32 %v2191_v17, %v3365_v13  ;;  %v2224_v15 = vadd.f32 %v2223_v8, %v3367_v14  ;;  %v2216_v18 = vadd.f32 %v2214_v40, %v3377_v30 }
 0x492   :  { %v2263_v44 = vmul.f32 5.9604645e-08, %v2262_v6  ;;  %v2255_v9 = vsel %vm771_vm1, %v2254_v54, %v3480_v55  ;;  %vm3590_vm1 = vcmask 1046528  }
 0x493   :  { %v2403_v3 = vmul.f32 -1.442695, %v2167_v62  ;;  %v2404_v1 = vmul.f32 -1.442695, %v2192_v12  ;;  %v2405_v0 = vmul.f32 -1.442695, %v2224_v15  ;;  %v2217_v20 = vadd.f32 %v2216_v18, %v3381_v39 }
 0x494   :  { %2265 = vst.msk [vmem:[#allocation6] sm:$0x1] %vm2264_vm9, %v2263_v44  ;;  %v2256_v31 = vsel %vm773_vm3, %v2255_v9, %v3503_v25 }
 0x495   :  { %2777 = vpow2.f32 %v2403_v3  ;;  %2287 = dma.vmem_to_hbm [thread:$0]  %s2283_s30, 16, %s2285_s7, [#allocation7]   ;;  %v2257_v62 = vsel %vm775_vm6, %v2256_v31, %v3526_v58 }
 0x496   :  { %2779 = vpow2.f32 %v2404_v1 }
 0x497   :  { %2781 = vpow2.f32 %v2405_v0 }
 0x49b   :  { %v2778_v56 = vpop.eup %2777 }
 0x49c   :  { %v2780_v13 = vpop.eup %2779  ;;  %v2171_v14 = vadd.f32 1.0, %v2778_v56 }
 0x49d   :  { %v2782_v7 = vpop.eup %2781  ;;  %v2196_v19 = vadd.f32 1.0, %v2780_v13 }
 0x49e   :  { %2783 = vrcp.f32 %v2171_v14  ;;  %v2228_v26 = vadd.f32 1.0, %v2782_v7  ;;  %vm2177_vm7 = vweird.f32 %v2171_v14  ;;  %v2183_v11 = vand.u32 2147483648, %v2171_v14 }
 0x49f   :  { %2785 = vrcp.f32 %v2196_v19  ;;  %v2181_v29 = vand.u32 2147483647, %v2171_v14  ;;  %v2208_v38 = vand.u32 2147483648, %v2196_v19  ;;  %vm2202_vm12 = vweird.f32 %v2196_v19 }
 0x4a0   :  { %2787 = vrcp.f32 %v2228_v26  ;;  %v2206_v63 = vand.u32 2147483647, %v2196_v19  ;;  %v2184_v46 = vor.u32 1.1754944e-38, %v2183_v11  ;;  %vm2234_vm5 = vweird.f32 %v2228_v26 }
 0x4a1   :  { %2789 = vtanh.f32 %v2217_v20  ;;  %vm2182_vm0 = vcmp.eq.f32.partialorder %v2181_v29, 8.507059e+37  ;;  %v2209_v16 = vor.u32 1.1754944e-38, %v2208_v38  ;;  %v2240_v28 = vand.u32 2147483648, %v2228_v26 }
 0x4a2   :  { %vm2207_vm4 = vcmp.eq.f32.partialorder %v2206_v63, 8.507059e+37  ;;  %v2238_v61 = vand.u32 2147483647, %v2228_v26 }
 0x4a3   :  { %v2241_v5 = vor.u32 1.1754944e-38, %v2240_v28 }
 0x4a4   :  { %v2784_v22 = vpop.eup %2783  ;;  %vm2239_vm10 = vcmp.eq.f32.partialorder %v2238_v61, 8.507059e+37 }
 0x4a5   :  { %v2786_v27 = vpop.eup %2785  ;;  %v2173_v23 = vmul.f32 %v2784_v22, %v2171_v14  ;;  %vm2178_vm11 = vweird.f32 %v2784_v22 }
 0x4a6   :  { %v2198_v35 = vmul.f32 %v2786_v27, %v2196_v19  ;;  %v2788_v37 = vpop.eup %2787  ;;  %vm2203_vm13 = vweird.f32 %v2786_v27  ;;  %vm3551_vm15 = vmor %vm2177_vm7, %vm2178_vm11 }
 0x4a7   :  { %v2174_v41 = vsub.f32 1.0, %v2173_v23  ;;  %v2230_v45 = vmul.f32 %v2788_v37, %v2228_v26  ;;  %vm2204_vm2 = vmor %vm2202_vm12, %vm2203_vm13  ;;  %v2790_v50 = vpop.eup %2789  ;;  %vm2235_vm8 = vweird.f32 %v2788_v37 }
 0x4a8   :  { %v2199_v30 = vsub.f32 1.0, %v2198_v35  ;;  %vm2236_vm9 = vmor %vm2234_vm5, %vm2235_vm8 }
 0x4a9   :  { %v2175_v42 = vmul.f32 %v2784_v22, %v2174_v41  ;;  %v2231_v51 = vsub.f32 1.0, %v2230_v45 }
 0x4aa   :  { %v2200_v47 = vmul.f32 %v2786_v27, %v2199_v30 }
 0x4ab   :  { %v2176_v24 = vadd.f32 %v2784_v22, %v2175_v42  ;;  %v2232_v34 = vmul.f32 %v2788_v37, %v2231_v51 }
 0x4ac   :  { %v2201_v32 = vadd.f32 %v2786_v27, %v2200_v47 }
 0x4ad   :  { %v2180_v33 = vsel %vm3551_vm15, %v2784_v22, %v2176_v24  ;;  %v2233_v57 = vadd.f32 %v2788_v37, %v2232_v34 }
 0x4ae   :  { %v2185_v52 = vsel %vm2182_vm0, %v2184_v46, %v2180_v33  ;;  %v2205_v36 = vsel %vm2204_vm2, %v2786_v27, %v2201_v32 }
 0x4af   :  { %v2210_v10 = vsel %vm2207_vm4, %v2209_v16, %v2205_v36  ;;  %v2248_v4 = vmul.f32 %v2790_v50, %v2185_v52  ;;  %v2237_v17 = vsel %vm2236_vm9, %v2788_v37, %v2233_v57 }
 0x4b0   :  { %v2247_v48 = vmul.f32 %v2245_v21, %v2210_v10  ;;  %v2242_v8 = vsel %vm2239_vm10, %v2241_v5, %v2237_v17 }
 0x4b2   :  { %v2249_v59 = vadd.f32 %v2248_v4, %v2247_v48 }
 0x4b4   :  { %2791 = vtanh.f32 %v2249_v59 }
 0x4ba   :  { %v2792_v60 = vpop.eup %2791 }
 0x4bb   :  { %v2251_v12 = vmul.f32 %v2792_v60, %v2242_v8 }
 0x4bd   :  { %v2258_v55 = vsel %vm3590_vm1, %v2257_v62, %v2251_v12 }
 0x4be   :  { %2260 = vst.msk [vmem:[#allocation5] sm:$0xff] %vm2259_vm14, %v2258_v55 }
 0x4bf   :  { %2276 = dma.vmem_to_hbm [thread:$0]  %s2272_s4, 128, %s2274_s10, [#allocation3]  }
 0x4c0   :  { %2855 = dma.done.wait [#allocation3], 128  }
 0x4c1   :  { %2856 = vsyncadd [#allocation3], 4294967168 }
 0x4c2   :  { %2857 = dma.done.wait [#allocation7], 16  }
 0x4c3   :  { %2858 = vsyncadd [#allocation7], 4294967280 }
 0x4c4   :  { %2296 = vsyncpa [#allocation3], 1 }
 0x4c5   :  { %2297 = vsyncpa [#allocation7], 1 }
 0x4c6   :  { %2298 = vsyncpa [#allocation4], 1 }

</bundles_post_ra>
